<compile_context>
chip_gen: v7x
topology: tpu7x:2x2x1
jax: 0.10.0
libtpu: 0.0.40
codegen_flags: <defaults>
</compile_context>

<pallas_src>
import functools

import jax
import jax.numpy as jnp
from jax import lax
from jax.experimental import pallas as pl
from jax.experimental.pallas import tpu as pltpu


def ppeg_fused_kernel(x_hbm, w_ref, b_ref, o_ref, xp_scratch, dma_sem, *, tr):
    """One (batch, channel-block, H row-band) grid step of the fused PPEG conv.

    x_hbm      : (B, H, W, C)        full input, left in HBM (memory_space=ANY)
    w_ref      : (7, 7, Cblk)        folded depthwise weight (7x7+5x5+3x3+identity)
    b_ref      : (1, 1, Cblk)        summed biases
    o_ref      : (1, TH, W, Cblk)    output row-band
    xp_scratch : (1, H+6, W+6, Cblk) pad-3 image in VMEM, carried across hb
    dma_sem    : DMA semaphore for the HBM -> scratch interior copy
    tr         : static rows per register-resident accumulator chunk
    """
    b = pl.program_id(0)
    cb = pl.program_id(1)
    hb = pl.program_id(2)

    TH = o_ref.shape[1]
    H = xp_scratch.shape[1] - 6
    W = xp_scratch.shape[2] - 6
    Cb = xp_scratch.shape[3]

    # First band of each (batch, channel-block): zero ONLY the 3-wide borders
    # (interior is fully overwritten below, borders never touched afterwards),
    # then DMA the unpadded image straight from HBM into the scratch interior.
    @pl.when(hb == 0)
    def _():
        zrow = jnp.zeros((3, W + 6, Cb), xp_scratch.dtype)
        zcol = jnp.zeros((H + 6, 3, Cb), xp_scratch.dtype)
        xp_scratch[0, pl.ds(0, 3), :, :] = zrow
        xp_scratch[0, pl.ds(H + 3, 3), :, :] = zrow
        xp_scratch[0, :, pl.ds(0, 3), :] = zcol
        xp_scratch[0, :, pl.ds(W + 3, 3), :] = zcol

        c0 = pl.multiple_of(cb * Cb, Cb)
        cp = pltpu.make_async_copy(
            x_hbm.at[pl.ds(b, 1), :, :, pl.ds(c0, Cb)],
            xp_scratch.at[:, pl.ds(3, H), pl.ds(3, W), :],
            dma_sem,
        )
        cp.start()
        cp.wait()

    # Hoisted loads: folded weight (7 vregs) + bias, once per grid step.
    w_all = w_ref[...]          # (7, 7, Cb)
    bias = b_ref[0, 0]          # (Cb,)

    row0 = pl.multiple_of(hb * TH, TH)
    n_chunks = TH // tr

    # Each chunk keeps its accumulator register-resident for all 49 taps and
    # stores every output vreg exactly once.  One sublane-shifted load per kw
    # column offset; row (kh) offsets are free slices of the loaded band.
    @pl.loop(0, n_chunks)
    def _(c):
        rs = row0 + c * tr
        acc = jnp.zeros((tr, W, Cb), jnp.float32)
        for kw in range(7):
            win = xp_scratch[0, pl.ds(rs, tr + 6), pl.ds(kw, W), :]  # (tr+6, W, Cb)
            for kh in range(7):
                acc = acc + win[kh:kh + tr] * w_all[kh, kw]
        o_ref[0, pl.ds(c * tr, tr)] = (acc + bias).astype(o_ref.dtype)


def _largest_divisor_leq(n, cap):
    d = max(1, min(cap, n))
    while n % d != 0:
        d -= 1
    return d


def ppeg_conv_pallas(feat_nhwc, w_comb, bias_sum, *, tile_c=128, band_h=32,
                     row_chunk=8, vmem_cap_bytes=56 * 1024 * 1024):
    """feat_nhwc: (B, H, W, C) -> fused PPEG conv output (B, H, W, C)."""
    B, H, W, C = feat_nhwc.shape

    # Channel block: 128 lanes when possible, otherwise the full extent.
    if C % tile_c != 0:
        tile_c = C

    # Row chunk: keep the per-chunk accumulator <= ~24 vregs of f32
    # (tr * ceil(W/8) * ceil(tile_c/128)) and require tr | H.
    lane_slabs = max(1, -(-tile_c // 128))
    max_tr = max(1, (24 * 8) // (max(8, W) * lane_slabs))
    tr = _largest_divisor_leq(H, min(row_chunk, max_tr))

    # Row-band height: largest multiple of tr that is <= band_h and divides H.
    th = tr
    for m in range(max(1, min(band_h, H) // tr), 0, -1):
        if H % (m * tr) == 0:
            th = m * tr
            break

    n_cb = C // tile_c
    n_hb = H // th
    bias3 = bias_sum.reshape(1, 1, C)

    # VMEM budget derived from the actual scratch / block sizes, capped so it
    # also fits v7x's 64 MiB physical VMEM (raise cap on v5e/v6e if needed).
    itemsize = jnp.dtype(feat_nhwc.dtype).itemsize
    vmem_need = ((H + 6) * (W + 6) * tile_c * itemsize        # padded scratch
                 + 2 * th * W * tile_c * itemsize             # out block (dbl-buf)
                 + 2 * (7 * 7 + 1) * tile_c * 4               # weight + bias blocks
                 + (8 << 20))                                  # headroom
    vmem_limit = int(min(max(vmem_need, 16 << 20), vmem_cap_bytes))

    kernel = functools.partial(ppeg_fused_kernel, tr=tr)

    return pl.pallas_call(
        kernel,
        out_shape=jax.ShapeDtypeStruct((B, H, W, C), feat_nhwc.dtype),
        grid_spec=pltpu.PrefetchScalarGridSpec(
            num_scalar_prefetch=0,
            grid=(B, n_cb, n_hb),
            in_specs=[
                pl.BlockSpec(memory_space=pl.ANY),                        # x in HBM
                pl.BlockSpec((7, 7, tile_c), lambda b, cb, hb: (0, 0, cb)),
                pl.BlockSpec((1, 1, tile_c), lambda b, cb, hb: (0, 0, cb)),
            ],
            out_specs=pl.BlockSpec((1, th, W, tile_c),
                                   lambda b, cb, hb: (b, hb, 0, cb)),
            scratch_shapes=[
                pltpu.VMEM((1, H + 6, W + 6, tile_c), feat_nhwc.dtype),
                pltpu.SemaphoreType.DMA(()),
            ],
        ),
        compiler_params=pltpu.CompilerParams(
            dimension_semantics=("parallel", "parallel", "arbitrary"),
            vmem_limit_bytes=vmem_limit,
        ),
    )(feat_nhwc, w_comb, bias3)


def fold_ppeg_weights(w7, w5, w3):
    """Fold 7x7 + 5x5 + 3x3 depthwise weights + identity into one 7x7 weight."""
    w = w7
    w = w.at[1:6, 1:6, :].add(w5)   # 5x5, pad 2 -> offset 1 inside the 7x7 footprint
    w = w.at[2:5, 2:5, :].add(w3)   # 3x3, pad 1 -> offset 2
    w = w.at[3, 3, :].add(1.0)      # identity (cnn_feat) term
    return w


def ppeg_forward(x, H, W, params, **conv_kwargs):
    """PPEG forward.

    x      : (B, 1 + H*W, C) token sequence (cls token first)
    params : dict with w7/w5/w3 of shape (k, k, C) and b7/b5/b3 of shape (C,)
    returns: (B, 1 + H*W, C)
    """
    B, N, C = x.shape
    assert N == 1 + H * W
    cls_token = x[:, :1, :]                       # (B, 1, C)
    feat = x[:, 1:, :].reshape(B, H, W, C)        # matches torch view(B, C, H, W)
    w_comb = fold_ppeg_weights(params["w7"], params["w5"], params["w3"])
    bias_sum = params["b7"] + params["b5"] + params["b3"]
    out = ppeg_conv_pallas(feat, w_comb, bias_sum, **conv_kwargs)
    return jnp.concatenate([cls_token, out.reshape(B, H * W, C)], axis=1)


def _reference_depthwise(feat_nhwc, w, b):
    """Pure-JAX depthwise conv reference (SAME padding)."""
    C = feat_nhwc.shape[-1]
    k = w.shape[0]
    kern = w.reshape(k, k, 1, C)
    out = lax.conv_general_dilated(
        feat_nhwc, kern, window_strides=(1, 1), padding="SAME",
        dimension_numbers=("NHWC", "HWIO", "NHWC"),
        feature_group_count=C)
    return out + b


if __name__ == "__main__":
    # Small shapes consistent with the module: channels on the lane dim with
    # two 128-lane blocks (C=256), H=W=16 so both the default single-band path
    # and an explicit multi-band path (band_h=8) are exercised.
    B, C, H, W = 2, 256, 16, 16
    N = 1 + H * W

    key = jax.random.PRNGKey(0)
    kx, k7, k5, k3, kb7, kb5, kb3 = jax.random.split(key, 7)

    x = jax.random.normal(kx, (B, N, C), dtype=jnp.float32)

    # Conv2d(dim, dim, k, groups=dim) weights expressed as (k, k, C).
    params = {
        "w7": 0.05 * jax.random.normal(k7, (7, 7, C), dtype=jnp.float32),
        "w5": 0.05 * jax.random.normal(k5, (5, 5, C), dtype=jnp.float32),
        "w3": 0.05 * jax.random.normal(k3, (3, 3, C), dtype=jnp.float32),
        "b7": 0.01 * jax.random.normal(kb7, (C,), dtype=jnp.float32),
        "b5": 0.01 * jax.random.normal(kb5, (C,), dtype=jnp.float32),
        "b3": 0.01 * jax.random.normal(kb3, (C,), dtype=jnp.float32),
    }

    # Pure-JAX reference of the PyTorch forward.
    feat = x[:, 1:, :].reshape(B, H, W, C)
    ref = (feat
           + _reference_depthwise(feat, params["w7"], params["b7"])
           + _reference_depthwise(feat, params["w5"], params["b5"])
           + _reference_depthwise(feat, params["w3"], params["b3"]))
    ref = jnp.concatenate([x[:, :1, :], ref.reshape(B, H * W, C)], axis=1)

    # Default tiling: single row-band, two register-resident chunks per band.
    out = jax.block_until_ready(ppeg_forward(x, H, W, params))
    assert out.shape == (B, N, C), out.shape
    err = float(jnp.max(jnp.abs(out - ref)))
    assert jnp.allclose(out, ref, atol=2e-4, rtol=2e-4), err

    # Multi-band tiling: exercises the carried padded-image scratch across hb.
    out2 = jax.block_until_ready(ppeg_forward(x, H, W, params, band_h=8))
    err2 = float(jnp.max(jnp.abs(out2 - ref)))
    assert jnp.allclose(out2, ref, atol=2e-4, rtol=2e-4), err2

    print("KERNEL_OK")
</pallas_src>

<mosaic_0001>
module attributes {stable_mosaic.version = 11 : i64} {
  func.func @ppeg_fused_kernel(%arg0: i32, %arg1: i32, %arg2: i32, %arg3: memref<2x16x16x256xf32, #tpu.memory_space<any>>, %arg4: memref<7x7x128xf32, #tpu.memory_space<vmem>>, %arg5: memref<1x1x128xf32, #tpu.memory_space<vmem>>, %arg6: memref<1x16x16x128xf32, #tpu.memory_space<vmem>>, %arg7: memref<1x22x22x128xf32, #tpu.memory_space<vmem>>, %arg8: memref<!tpu.dma_semaphore, #tpu.memory_space<semaphore_mem>>) attributes {dimension_semantics = [#tpu.dimension_semantics<parallel>, #tpu.dimension_semantics<parallel>, #tpu.dimension_semantics<arbitrary>], iteration_bounds = array<i64: 2, 2, 1>, scalar_prefetch = 0 : i64, scratch_operands = 2 : i64, tpu.core_type = #tpu.core_type<tc>, window_params = [{}, {transform_indices = @transform_1, window_bounds = array<i64: 7, 7, 128>}, {transform_indices = @transform_2, window_bounds = array<i64: 1, 1, 128>}, {transform_indices = @transform_3, window_bounds = array<i64: 1, 16, 16, 128>}]} {
    %c0_i32 = arith.constant 0 : i32
    %0 = arith.cmpi eq, %arg2, %c0_i32 : i32
    %1 = arith.extui %0 : i1 to i32
    %c0_i32_0 = arith.constant 0 : i32
    %2 = arith.cmpi ne, %1, %c0_i32_0 : i32
    scf.if %2 {
      %cst = arith.constant 0.000000e+00 : f32
      %9 = vector.broadcast %cst : f32 to vector<3x22x128xf32>
      %cst_8 = arith.constant 0.000000e+00 : f32
      %10 = vector.broadcast %cst_8 : f32 to vector<22x3x128xf32>
      %c0_9 = arith.constant 0 : index
      %c0_10 = arith.constant 0 : index
      %c0_11 = arith.constant 0 : index
      %c0_12 = arith.constant 0 : index
      %11 = vector.load %arg7[%c0_9, %c0_10, %c0_11, %c0_12] : memref<1x22x22x128xf32, #tpu.memory_space<vmem>>, vector<1x3x22x128xf32>
      %12 = vector.shape_cast %11 : vector<1x3x22x128xf32> to vector<3x22x128xf32>
      %13 = vector.shape_cast %9 : vector<3x22x128xf32> to vector<1x3x22x128xf32>
      tpu.vector_store %arg7[%c0_9, %c0_10, %c0_11, %c0_12], %13 {strides = array<i32>} : memref<1x22x22x128xf32, #tpu.memory_space<vmem>>, vector<1x3x22x128xf32>,
      %c0_13 = arith.constant 0 : index
      %c19 = arith.constant 19 : index
      %c0_14 = arith.constant 0 : index
      %c0_15 = arith.constant 0 : index
      %14 = vector.load %arg7[%c0_13, %c19, %c0_14, %c0_15] : memref<1x22x22x128xf32, #tpu.memory_space<vmem>>, vector<1x3x22x128xf32>
      %15 = vector.shape_cast %14 : vector<1x3x22x128xf32> to vector<3x22x128xf32>
      %16 = vector.shape_cast %9 : vector<3x22x128xf32> to vector<1x3x22x128xf32>
      tpu.vector_store %arg7[%c0_13, %c19, %c0_14, %c0_15], %16 {strides = array<i32>} : memref<1x22x22x128xf32, #tpu.memory_space<vmem>>, vector<1x3x22x128xf32>,
      %c0_16 = arith.constant 0 : index
      %c0_17 = arith.constant 0 : index
      %c0_18 = arith.constant 0 : index
      %c0_19 = arith.constant 0 : index
      %17 = vector.load %arg7[%c0_16, %c0_17, %c0_18, %c0_19] : memref<1x22x22x128xf32, #tpu.memory_space<vmem>>, vector<1x22x3x128xf32>
      %18 = vector.shape_cast %17 : vector<1x22x3x128xf32> to vector<22x3x128xf32>
      %19 = vector.shape_cast %10 : vector<22x3x128xf32> to vector<1x22x3x128xf32>
      tpu.vector_store %arg7[%c0_16, %c0_17, %c0_18, %c0_19], %19 {strides = array<i32>} : memref<1x22x22x128xf32, #tpu.memory_space<vmem>>, vector<1x22x3x128xf32>,
      %c0_20 = arith.constant 0 : index
      %c0_21 = arith.constant 0 : index
      %c19_22 = arith.constant 19 : index
      %c0_23 = arith.constant 0 : index
      %20 = vector.load %arg7[%c0_20, %c0_21, %c19_22, %c0_23] : memref<1x22x22x128xf32, #tpu.memory_space<vmem>>, vector<1x22x3x128xf32>
      %21 = vector.shape_cast %20 : vector<1x22x3x128xf32> to vector<22x3x128xf32>
      %22 = vector.shape_cast %10 : vector<22x3x128xf32> to vector<1x22x3x128xf32>
      tpu.vector_store %arg7[%c0_20, %c0_21, %c19_22, %c0_23], %22 {strides = array<i32>} : memref<1x22x22x128xf32, #tpu.memory_space<vmem>>, vector<1x22x3x128xf32>,
      %c128_i32 = arith.constant 128 : i32
      %23 = arith.muli %arg1, %c128_i32 : i32
      %24 = tpu.assume_multiple %23, 128 : i32
      %c0_i32_24 = arith.constant 0 : i32
      %c0_i32_25 = arith.constant 0 : i32
      %25 = tpu.memref_slice %arg3[%arg0, %c0_i32_24, %c0_i32_25, %24] : memref<2x16x16x256xf32, #tpu.memory_space<any>> -> memref<1x16x16x128xf32, #tpu.memory_space<any>>
      %c0_i32_26 = arith.constant 0 : i32
      %c3_i32 = arith.constant 3 : i32
      %c3_i32_27 = arith.constant 3 : i32
      %c0_i32_28 = arith.constant 0 : i32
      %26 = tpu.memref_slice %arg7[%c0_i32_26, %c3_i32, %c3_i32_27, %c0_i32_28] : memref<1x22x22x128xf32, #tpu.memory_space<vmem>> -> memref<1x16x16x128xf32, #tpu.memory_space<vmem>>
      tpu.enqueue_dma source(%25 : memref<1x16x16x128xf32, #tpu.memory_space<any>>) target(%26 : memref<1x16x16x128xf32, #tpu.memory_space<vmem>>) target_semaphore(%arg8 : memref<!tpu.dma_semaphore, #tpu.memory_space<semaphore_mem>>)
      %c0_i32_29 = arith.constant 0 : i32
      %c0_i32_30 = arith.constant 0 : i32
      %27 = tpu.memref_slice %arg3[%arg0, %c0_i32_29, %c0_i32_30, %24] : memref<2x16x16x256xf32, #tpu.memory_space<any>> -> memref<1x16x16x128xf32, #tpu.memory_space<any>>
      %c0_i32_31 = arith.constant 0 : i32
      %c3_i32_32 = arith.constant 3 : i32
      %c3_i32_33 = arith.constant 3 : i32
      %c0_i32_34 = arith.constant 0 : i32
      %28 = tpu.memref_slice %arg7[%c0_i32_31, %c3_i32_32, %c3_i32_33, %c0_i32_34] : memref<1x22x22x128xf32, #tpu.memory_space<vmem>> -> memref<1x16x16x128xf32, #tpu.memory_space<vmem>>
      tpu.wait_dma2 semaphore(%arg8 : memref<!tpu.dma_semaphore, #tpu.memory_space<semaphore_mem>>) src(%27 : memref<1x16x16x128xf32, #tpu.memory_space<any>>) dst(%28 : memref<1x16x16x128xf32, #tpu.memory_space<vmem>>)
    } else {
    }
    %c0 = arith.constant 0 : index
    %c0_1 = arith.constant 0 : index
    %c0_2 = arith.constant 0 : index
    %3 = vector.load %arg4[%c0, %c0_1, %c0_2] : memref<7x7x128xf32, #tpu.memory_space<vmem>>, vector<7x7x128xf32>
    %c0_3 = arith.constant 0 : index
    %c0_4 = arith.constant 0 : index
    %c0_5 = arith.constant 0 : index
    %4 = vector.load %arg5[%c0_3, %c0_4, %c0_5] : memref<1x1x128xf32, #tpu.memory_space<vmem>>, vector<1x1x128xf32>
    %5 = vector.shape_cast %4 : vector<1x1x128xf32> to vector<128xf32>
    %c16_i32 = arith.constant 16 : i32
    %6 = arith.muli %arg2, %c16_i32 : i32
    %7 = tpu.assume_multiple %6, 16 : i32
    %c0_i32_6 = arith.constant 0 : i32
    %c2_i32 = arith.constant 2 : i32
    %8 = arith.addi %c0_i32_6, %c2_i32 : i32
    %c1_i32 = arith.constant 1 : i32
    scf.for %arg9 = %c0_i32_6 to %8 step %c1_i32  : i32 {
      %c1_i32_8 = arith.constant 1 : i32
      %9 = arith.muli %arg9, %c1_i32_8 : i32
      %c0_i32_9 = arith.constant 0 : i32
      %10 = arith.addi %c0_i32_9, %9 : i32
      %c8_i32 = arith.constant 8 : i32
      %11 = arith.muli %10, %c8_i32 : i32
      %12 = arith.addi %7, %11 : i32
      %cst = arith.constant 0.000000e+00 : f32
      %13 = vector.broadcast %cst : f32 to vector<8x16x128xf32>
      %c0_10 = arith.constant 0 : index
      %14 = arith.index_cast %12 : i32 to index
      %c0_11 = arith.constant 0 : index
      %c0_12 = arith.constant 0 : index
      %15 = vector.load %arg7[%c0_10, %14, %c0_11, %c0_12] : memref<1x22x22x128xf32, #tpu.memory_space<vmem>>, vector<1x14x16x128xf32>
      %16 = vector.shape_cast %15 : vector<1x14x16x128xf32> to vector<14x16x128xf32>
      %17 = vector.extract_strided_slice %16 {offsets = [0, 0, 0], sizes = [8, 16, 128], strides = [1, 1, 1]} : vector<14x16x128xf32> to vector<8x16x128xf32>
      %18 = vector.extract_strided_slice %3 {offsets = [0, 0, 0], sizes = [1, 1, 128], strides = [1, 1, 1]} : vector<7x7x128xf32> to vector<1x1x128xf32>
      %19 = vector.shape_cast %18 : vector<1x1x128xf32> to vector<128xf32>
      %20 = vector.shape_cast %19 : vector<128xf32> to vector<1x1x128xf32>
      %21 = vector.broadcast %20 : vector<1x1x128xf32> to vector<8x16x128xf32>
      %22 = arith.mulf %17, %21 : vector<8x16x128xf32>
      %23 = arith.addf %13, %22 : vector<8x16x128xf32>
      %24 = vector.extract_strided_slice %16 {offsets = [1, 0, 0], sizes = [8, 16, 128], strides = [1, 1, 1]} : vector<14x16x128xf32> to vector<8x16x128xf32>
      %25 = vector.extract_strided_slice %3 {offsets = [1, 0, 0], sizes = [1, 1, 128], strides = [1, 1, 1]} : vector<7x7x128xf32> to vector<1x1x128xf32>
      %26 = vector.shape_cast %25 : vector<1x1x128xf32> to vector<128xf32>
      %27 = vector.shape_cast %26 : vector<128xf32> to vector<1x1x128xf32>
      %28 = vector.broadcast %27 : vector<1x1x128xf32> to vector<8x16x128xf32>
      %29 = arith.mulf %24, %28 : vector<8x16x128xf32>
      %30 = arith.addf %23, %29 : vector<8x16x128xf32>
      %31 = vector.extract_strided_slice %16 {offsets = [2, 0, 0], sizes = [8, 16, 128], strides = [1, 1, 1]} : vector<14x16x128xf32> to vector<8x16x128xf32>
      %32 = vector.extract_strided_slice %3 {offsets = [2, 0, 0], sizes = [1, 1, 128], strides = [1, 1, 1]} : vector<7x7x128xf32> to vector<1x1x128xf32>
      %33 = vector.shape_cast %32 : vector<1x1x128xf32> to vector<128xf32>
      %34 = vector.shape_cast %33 : vector<128xf32> to vector<1x1x128xf32>
      %35 = vector.broadcast %34 : vector<1x1x128xf32> to vector<8x16x128xf32>
      %36 = arith.mulf %31, %35 : vector<8x16x128xf32>
      %37 = arith.addf %30, %36 : vector<8x16x128xf32>
      %38 = vector.extract_strided_slice %16 {offsets = [3, 0, 0], sizes = [8, 16, 128], strides = [1, 1, 1]} : vector<14x16x128xf32> to vector<8x16x128xf32>
      %39 = vector.extract_strided_slice %3 {offsets = [3, 0, 0], sizes = [1, 1, 128], strides = [1, 1, 1]} : vector<7x7x128xf32> to vector<1x1x128xf32>
      %40 = vector.shape_cast %39 : vector<1x1x128xf32> to vector<128xf32>
      %41 = vector.shape_cast %40 : vector<128xf32> to vector<1x1x128xf32>
      %42 = vector.broadcast %41 : vector<1x1x128xf32> to vector<8x16x128xf32>
      %43 = arith.mulf %38, %42 : vector<8x16x128xf32>
      %44 = arith.addf %37, %43 : vector<8x16x128xf32>
      %45 = vector.extract_strided_slice %16 {offsets = [4, 0, 0], sizes = [8, 16, 128], strides = [1, 1, 1]} : vector<14x16x128xf32> to vector<8x16x128xf32>
      %46 = vector.extract_strided_slice %3 {offsets = [4, 0, 0], sizes = [1, 1, 128], strides = [1, 1, 1]} : vector<7x7x128xf32> to vector<1x1x128xf32>
      %47 = vector.shape_cast %46 : vector<1x1x128xf32> to vector<128xf32>
      %48 = vector.shape_cast %47 : vector<128xf32> to vector<1x1x128xf32>
      %49 = vector.broadcast %48 : vector<1x1x128xf32> to vector<8x16x128xf32>
      %50 = arith.mulf %45, %49 : vector<8x16x128xf32>
      %51 = arith.addf %44, %50 : vector<8x16x128xf32>
      %52 = vector.extract_strided_slice %16 {offsets = [5, 0, 0], sizes = [8, 16, 128], strides = [1, 1, 1]} : vector<14x16x128xf32> to vector<8x16x128xf32>
      %53 = vector.extract_strided_slice %3 {offsets = [5, 0, 0], sizes = [1, 1, 128], strides = [1, 1, 1]} : vector<7x7x128xf32> to vector<1x1x128xf32>
      %54 = vector.shape_cast %53 : vector<1x1x128xf32> to vector<128xf32>
      %55 = vector.shape_cast %54 : vector<128xf32> to vector<1x1x128xf32>
      %56 = vector.broadcast %55 : vector<1x1x128xf32> to vector<8x16x128xf32>
      %57 = arith.mulf %52, %56 : vector<8x16x128xf32>
      %58 = arith.addf %51, %57 : vector<8x16x128xf32>
      %59 = vector.extract_strided_slice %16 {offsets = [6, 0, 0], sizes = [8, 16, 128], strides = [1, 1, 1]} : vector<14x16x128xf32> to vector<8x16x128xf32>
      %60 = vector.extract_strided_slice %3 {offsets = [6, 0, 0], sizes = [1, 1, 128], strides = [1, 1, 1]} : vector<7x7x128xf32> to vector<1x1x128xf32>
      %61 = vector.shape_cast %60 : vector<1x1x128xf32> to vector<128xf32>
      %62 = vector.shape_cast %61 : vector<128xf32> to vector<1x1x128xf32>
      %63 = vector.broadcast %62 : vector<1x1x128xf32> to vector<8x16x128xf32>
      %64 = arith.mulf %59, %63 : vector<8x16x128xf32>
      %65 = arith.addf %58, %64 : vector<8x16x128xf32>
      %c0_13 = arith.constant 0 : index
      %66 = arith.index_cast %12 : i32 to index
      %c1 = arith.constant 1 : index
      %c0_14 = arith.constant 0 : index
      %67 = vector.load %arg7[%c0_13, %66, %c1, %c0_14] : memref<1x22x22x128xf32, #tpu.memory_space<vmem>>, vector<1x14x16x128xf32>
      %68 = vector.shape_cast %67 : vector<1x14x16x128xf32> to vector<14x16x128xf32>
      %69 = vector.extract_strided_slice %68 {offsets = [0, 0, 0], sizes = [8, 16, 128], strides = [1, 1, 1]} : vector<14x16x128xf32> to vector<8x16x128xf32>
      %70 = vector.extract_strided_slice %3 {offsets = [0, 1, 0], sizes = [1, 1, 128], strides = [1, 1, 1]} : vector<7x7x128xf32> to vector<1x1x128xf32>
      %71 = vector.shape_cast %70 : vector<1x1x128xf32> to vector<128xf32>
      %72 = vector.shape_cast %71 : vector<128xf32> to vector<1x1x128xf32>
      %73 = vector.broadcast %72 : vector<1x1x128xf32> to vector<8x16x128xf32>
      %74 = arith.mulf %69, %73 : vector<8x16x128xf32>
      %75 = arith.addf %65, %74 : vector<8x16x128xf32>
      %76 = vector.extract_strided_slice %68 {offsets = [1, 0, 0], sizes = [8, 16, 128], strides = [1, 1, 1]} : vector<14x16x128xf32> to vector<8x16x128xf32>
      %77 = vector.extract_strided_slice %3 {offsets = [1, 1, 0], sizes = [1, 1, 128], strides = [1, 1, 1]} : vector<7x7x128xf32> to vector<1x1x128xf32>
      %78 = vector.shape_cast %77 : vector<1x1x128xf32> to vector<128xf32>
      %79 = vector.shape_cast %78 : vector<128xf32> to vector<1x1x128xf32>
      %80 = vector.broadcast %79 : vector<1x1x128xf32> to vector<8x16x128xf32>
      %81 = arith.mulf %76, %80 : vector<8x16x128xf32>
      %82 = arith.addf %75, %81 : vector<8x16x128xf32>
      %83 = vector.extract_strided_slice %68 {offsets = [2, 0, 0], sizes = [8, 16, 128], strides = [1, 1, 1]} : vector<14x16x128xf32> to vector<8x16x128xf32>
      %84 = vector.extract_strided_slice %3 {offsets = [2, 1, 0], sizes = [1, 1, 128], strides = [1, 1, 1]} : vector<7x7x128xf32> to vector<1x1x128xf32>
      %85 = vector.shape_cast %84 : vector<1x1x128xf32> to vector<128xf32>
      %86 = vector.shape_cast %85 : vector<128xf32> to vector<1x1x128xf32>
      %87 = vector.broadcast %86 : vector<1x1x128xf32> to vector<8x16x128xf32>
      %88 = arith.mulf %83, %87 : vector<8x16x128xf32>
      %89 = arith.addf %82, %88 : vector<8x16x128xf32>
      %90 = vector.extract_strided_slice %68 {offsets = [3, 0, 0], sizes = [8, 16, 128], strides = [1, 1, 1]} : vector<14x16x128xf32> to vector<8x16x128xf32>
      %91 = vector.extract_strided_slice %3 {offsets = [3, 1, 0], sizes = [1, 1, 128], strides = [1, 1, 1]} : vector<7x7x128xf32> to vector<1x1x128xf32>
      %92 = vector.shape_cast %91 : vector<1x1x128xf32> to vector<128xf32>
      %93 = vector.shape_cast %92 : vector<128xf32> to vector<1x1x128xf32>
      %94 = vector.broadcast %93 : vector<1x1x128xf32> to vector<8x16x128xf32>
      %95 = arith.mulf %90, %94 : vector<8x16x128xf32>
      %96 = arith.addf %89, %95 : vector<8x16x128xf32>
      %97 = vector.extract_strided_slice %68 {offsets = [4, 0, 0], sizes = [8, 16, 128], strides = [1, 1, 1]} : vector<14x16x128xf32> to vector<8x16x128xf32>
      %98 = vector.extract_strided_slice %3 {offsets = [4, 1, 0], sizes = [1, 1, 128], strides = [1, 1, 1]} : vector<7x7x128xf32> to vector<1x1x128xf32>
      %99 = vector.shape_cast %98 : vector<1x1x128xf32> to vector<128xf32>
      %100 = vector.shape_cast %99 : vector<128xf32> to vector<1x1x128xf32>
      %101 = vector.broadcast %100 : vector<1x1x128xf32> to vector<8x16x128xf32>
      %102 = arith.mulf %97, %101 : vector<8x16x128xf32>
      %103 = arith.addf %96, %102 : vector<8x16x128xf32>
      %104 = vector.extract_strided_slice %68 {offsets = [5, 0, 0], sizes = [8, 16, 128], strides = [1, 1, 1]} : vector<14x16x128xf32> to vector<8x16x128xf32>
      %105 = vector.extract_strided_slice %3 {offsets = [5, 1, 0], sizes = [1, 1, 128], strides = [1, 1, 1]} : vector<7x7x128xf32> to vector<1x1x128xf32>
      %106 = vector.shape_cast %105 : vector<1x1x128xf32> to vector<128xf32>
      %107 = vector.shape_cast %106 : vector<128xf32> to vector<1x1x128xf32>
      %108 = vector.broadcast %107 : vector<1x1x128xf32> to vector<8x16x128xf32>
      %109 = arith.mulf %104, %108 : vector<8x16x128xf32>
      %110 = arith.addf %103, %109 : vector<8x16x128xf32>
      %111 = vector.extract_strided_slice %68 {offsets = [6, 0, 0], sizes = [8, 16, 128], strides = [1, 1, 1]} : vector<14x16x128xf32> to vector<8x16x128xf32>
      %112 = vector.extract_strided_slice %3 {offsets = [6, 1, 0], sizes = [1, 1, 128], strides = [1, 1, 1]} : vector<7x7x128xf32> to vector<1x1x128xf32>
      %113 = vector.shape_cast %112 : vector<1x1x128xf32> to vector<128xf32>
      %114 = vector.shape_cast %113 : vector<128xf32> to vector<1x1x128xf32>
      %115 = vector.broadcast %114 : vector<1x1x128xf32> to vector<8x16x128xf32>
      %116 = arith.mulf %111, %115 : vector<8x16x128xf32>
      %117 = arith.addf %110, %116 : vector<8x16x128xf32>
      %c0_15 = arith.constant 0 : index
      %118 = arith.index_cast %12 : i32 to index
      %c2 = arith.constant 2 : index
      %c0_16 = arith.constant 0 : index
      %119 = vector.load %arg7[%c0_15, %118, %c2, %c0_16] : memref<1x22x22x128xf32, #tpu.memory_space<vmem>>, vector<1x14x16x128xf32>
      %120 = vector.shape_cast %119 : vector<1x14x16x128xf32> to vector<14x16x128xf32>
      %121 = vector.extract_strided_slice %120 {offsets = [0, 0, 0], sizes = [8, 16, 128], strides = [1, 1, 1]} : vector<14x16x128xf32> to vector<8x16x128xf32>
      %122 = vector.extract_strided_slice %3 {offsets = [0, 2, 0], sizes = [1, 1, 128], strides = [1, 1, 1]} : vector<7x7x128xf32> to vector<1x1x128xf32>
      %123 = vector.shape_cast %122 : vector<1x1x128xf32> to vector<128xf32>
      %124 = vector.shape_cast %123 : vector<128xf32> to vector<1x1x128xf32>
      %125 = vector.broadcast %124 : vector<1x1x128xf32> to vector<8x16x128xf32>
      %126 = arith.mulf %121, %125 : vector<8x16x128xf32>
      %127 = arith.addf %117, %126 : vector<8x16x128xf32>
      %128 = vector.extract_strided_slice %120 {offsets = [1, 0, 0], sizes = [8, 16, 128], strides = [1, 1, 1]} : vector<14x16x128xf32> to vector<8x16x128xf32>
      %129 = vector.extract_strided_slice %3 {offsets = [1, 2, 0], sizes = [1, 1, 128], strides = [1, 1, 1]} : vector<7x7x128xf32> to vector<1x1x128xf32>
      %130 = vector.shape_cast %129 : vector<1x1x128xf32> to vector<128xf32>
      %131 = vector.shape_cast %130 : vector<128xf32> to vector<1x1x128xf32>
      %132 = vector.broadcast %131 : vector<1x1x128xf32> to vector<8x16x128xf32>
      %133 = arith.mulf %128, %132 : vector<8x16x128xf32>
      %134 = arith.addf %127, %133 : vector<8x16x128xf32>
      %135 = vector.extract_strided_slice %120 {offsets = [2, 0, 0], sizes = [8, 16, 128], strides = [1, 1, 1]} : vector<14x16x128xf32> to vector<8x16x128xf32>
      %136 = vector.extract_strided_slice %3 {offsets = [2, 2, 0], sizes = [1, 1, 128], strides = [1, 1, 1]} : vector<7x7x128xf32> to vector<1x1x128xf32>
      %137 = vector.shape_cast %136 : vector<1x1x128xf32> to vector<128xf32>
      %138 = vector.shape_cast %137 : vector<128xf32> to vector<1x1x128xf32>
      %139 = vector.broadcast %138 : vector<1x1x128xf32> to vector<8x16x128xf32>
      %140 = arith.mulf %135, %139 : vector<8x16x128xf32>
      %141 = arith.addf %134, %140 : vector<8x16x128xf32>
      %142 = vector.extract_strided_slice %120 {offsets = [3, 0, 0], sizes = [8, 16, 128], strides = [1, 1, 1]} : vector<14x16x128xf32> to vector<8x16x128xf32>
      %143 = vector.extract_strided_slice %3 {offsets = [3, 2, 0], sizes = [1, 1, 128], strides = [1, 1, 1]} : vector<7x7x128xf32> to vector<1x1x128xf32>
      %144 = vector.shape_cast %143 : vector<1x1x128xf32> to vector<128xf32>
      %145 = vector.shape_cast %144 : vector<128xf32> to vector<1x1x128xf32>
      %146 = vector.broadcast %145 : vector<1x1x128xf32> to vector<8x16x128xf32>
      %147 = arith.mulf %142, %146 : vector<8x16x128xf32>
      %148 = arith.addf %141, %147 : vector<8x16x128xf32>
      %149 = vector.extract_strided_slice %120 {offsets = [4, 0, 0], sizes = [8, 16, 128], strides = [1, 1, 1]} : vector<14x16x128xf32> to vector<8x16x128xf32>
      %150 = vector.extract_strided_slice %3 {offsets = [4, 2, 0], sizes = [1, 1, 128], strides = [1, 1, 1]} : vector<7x7x128xf32> to vector<1x1x128xf32>
      %151 = vector.shape_cast %150 : vector<1x1x128xf32> to vector<128xf32>
      %152 = vector.shape_cast %151 : vector<128xf32> to vector<1x1x128xf32>
      %153 = vector.broadcast %152 : vector<1x1x128xf32> to vector<8x16x128xf32>
      %154 = arith.mulf %149, %153 : vector<8x16x128xf32>
      %155 = arith.addf %148, %154 : vector<8x16x128xf32>
      %156 = vector.extract_strided_slice %120 {offsets = [5, 0, 0], sizes = [8, 16, 128], strides = [1, 1, 1]} : vector<14x16x128xf32> to vector<8x16x128xf32>
      %157 = vector.extract_strided_slice %3 {offsets = [5, 2, 0], sizes = [1, 1, 128], strides = [1, 1, 1]} : vector<7x7x128xf32> to vector<1x1x128xf32>
      %158 = vector.shape_cast %157 : vector<1x1x128xf32> to vector<128xf32>
      %159 = vector.shape_cast %158 : vector<128xf32> to vector<1x1x128xf32>
      %160 = vector.broadcast %159 : vector<1x1x128xf32> to vector<8x16x128xf32>
      %161 = arith.mulf %156, %160 : vector<8x16x128xf32>
      %162 = arith.addf %155, %161 : vector<8x16x128xf32>
      %163 = vector.extract_strided_slice %120 {offsets = [6, 0, 0], sizes = [8, 16, 128], strides = [1, 1, 1]} : vector<14x16x128xf32> to vector<8x16x128xf32>
      %164 = vector.extract_strided_slice %3 {offsets = [6, 2, 0], sizes = [1, 1, 128], strides = [1, 1, 1]} : vector<7x7x128xf32> to vector<1x1x128xf32>
      %165 = vector.shape_cast %164 : vector<1x1x128xf32> to vector<128xf32>
      %166 = vector.shape_cast %165 : vector<128xf32> to vector<1x1x128xf32>
      %167 = vector.broadcast %166 : vector<1x1x128xf32> to vector<8x16x128xf32>
      %168 = arith.mulf %163, %167 : vector<8x16x128xf32>
      %169 = arith.addf %162, %168 : vector<8x16x128xf32>
      %c0_17 = arith.constant 0 : index
      %170 = arith.index_cast %12 : i32 to index
      %c3 = arith.constant 3 : index
      %c0_18 = arith.constant 0 : index
      %171 = vector.load %arg7[%c0_17, %170, %c3, %c0_18] : memref<1x22x22x128xf32, #tpu.memory_space<vmem>>, vector<1x14x16x128xf32>
      %172 = vector.shape_cast %171 : vector<1x14x16x128xf32> to vector<14x16x128xf32>
      %173 = vector.extract_strided_slice %172 {offsets = [0, 0, 0], sizes = [8, 16, 128], strides = [1, 1, 1]} : vector<14x16x128xf32> to vector<8x16x128xf32>
      %174 = vector.extract_strided_slice %3 {offsets = [0, 3, 0], sizes = [1, 1, 128], strides = [1, 1, 1]} : vector<7x7x128xf32> to vector<1x1x128xf32>
      %175 = vector.shape_cast %174 : vector<1x1x128xf32> to vector<128xf32>
      %176 = vector.shape_cast %175 : vector<128xf32> to vector<1x1x128xf32>
      %177 = vector.broadcast %176 : vector<1x1x128xf32> to vector<8x16x128xf32>
      %178 = arith.mulf %173, %177 : vector<8x16x128xf32>
      %179 = arith.addf %169, %178 : vector<8x16x128xf32>
      %180 = vector.extract_strided_slice %172 {offsets = [1, 0, 0], sizes = [8, 16, 128], strides = [1, 1, 1]} : vector<14x16x128xf32> to vector<8x16x128xf32>
      %181 = vector.extract_strided_slice %3 {offsets = [1, 3, 0], sizes = [1, 1, 128], strides = [1, 1, 1]} : vector<7x7x128xf32> to vector<1x1x128xf32>
      %182 = vector.shape_cast %181 : vector<1x1x128xf32> to vector<128xf32>
      %183 = vector.shape_cast %182 : vector<128xf32> to vector<1x1x128xf32>
      %184 = vector.broadcast %183 : vector<1x1x128xf32> to vector<8x16x128xf32>
      %185 = arith.mulf %180, %184 : vector<8x16x128xf32>
      %186 = arith.addf %179, %185 : vector<8x16x128xf32>
      %187 = vector.extract_strided_slice %172 {offsets = [2, 0, 0], sizes = [8, 16, 128], strides = [1, 1, 1]} : vector<14x16x128xf32> to vector<8x16x128xf32>
      %188 = vector.extract_strided_slice %3 {offsets = [2, 3, 0], sizes = [1, 1, 128], strides = [1, 1, 1]} : vector<7x7x128xf32> to vector<1x1x128xf32>
      %189 = vector.shape_cast %188 : vector<1x1x128xf32> to vector<128xf32>
      %190 = vector.shape_cast %189 : vector<128xf32> to vector<1x1x128xf32>
      %191 = vector.broadcast %190 : vector<1x1x128xf32> to vector<8x16x128xf32>
      %192 = arith.mulf %187, %191 : vector<8x16x128xf32>
      %193 = arith.addf %186, %192 : vector<8x16x128xf32>
      %194 = vector.extract_strided_slice %172 {offsets = [3, 0, 0], sizes = [8, 16, 128], strides = [1, 1, 1]} : vector<14x16x128xf32> to vector<8x16x128xf32>
      %195 = vector.extract_strided_slice %3 {offsets = [3, 3, 0], sizes = [1, 1, 128], strides = [1, 1, 1]} : vector<7x7x128xf32> to vector<1x1x128xf32>
      %196 = vector.shape_cast %195 : vector<1x1x128xf32> to vector<128xf32>
      %197 = vector.shape_cast %196 : vector<128xf32> to vector<1x1x128xf32>
      %198 = vector.broadcast %197 : vector<1x1x128xf32> to vector<8x16x128xf32>
      %199 = arith.mulf %194, %198 : vector<8x16x128xf32>
      %200 = arith.addf %193, %199 : vector<8x16x128xf32>
      %201 = vector.extract_strided_slice %172 {offsets = [4, 0, 0], sizes = [8, 16, 128], strides = [1, 1, 1]} : vector<14x16x128xf32> to vector<8x16x128xf32>
      %202 = vector.extract_strided_slice %3 {offsets = [4, 3, 0], sizes = [1, 1, 128], strides = [1, 1, 1]} : vector<7x7x128xf32> to vector<1x1x128xf32>
      %203 = vector.shape_cast %202 : vector<1x1x128xf32> to vector<128xf32>
      %204 = vector.shape_cast %203 : vector<128xf32> to vector<1x1x128xf32>
      %205 = vector.broadcast %204 : vector<1x1x128xf32> to vector<8x16x128xf32>
      %206 = arith.mulf %201, %205 : vector<8x16x128xf32>
      %207 = arith.addf %200, %206 : vector<8x16x128xf32>
      %208 = vector.extract_strided_slice %172 {offsets = [5, 0, 0], sizes = [8, 16, 128], strides = [1, 1, 1]} : vector<14x16x128xf32> to vector<8x16x128xf32>
      %209 = vector.extract_strided_slice %3 {offsets = [5, 3, 0], sizes = [1, 1, 128], strides = [1, 1, 1]} : vector<7x7x128xf32> to vector<1x1x128xf32>
      %210 = vector.shape_cast %209 : vector<1x1x128xf32> to vector<128xf32>
      %211 = vector.shape_cast %210 : vector<128xf32> to vector<1x1x128xf32>
      %212 = vector.broadcast %211 : vector<1x1x128xf32> to vector<8x16x128xf32>
      %213 = arith.mulf %208, %212 : vector<8x16x128xf32>
      %214 = arith.addf %207, %213 : vector<8x16x128xf32>
      %215 = vector.extract_strided_slice %172 {offsets = [6, 0, 0], sizes = [8, 16, 128], strides = [1, 1, 1]} : vector<14x16x128xf32> to vector<8x16x128xf32>
      %216 = vector.extract_strided_slice %3 {offsets = [6, 3, 0], sizes = [1, 1, 128], strides = [1, 1, 1]} : vector<7x7x128xf32> to vector<1x1x128xf32>
      %217 = vector.shape_cast %216 : vector<1x1x128xf32> to vector<128xf32>
      %218 = vector.shape_cast %217 : vector<128xf32> to vector<1x1x128xf32>
      %219 = vector.broadcast %218 : vector<1x1x128xf32> to vector<8x16x128xf32>
      %220 = arith.mulf %215, %219 : vector<8x16x128xf32>
      %221 = arith.addf %214, %220 : vector<8x16x128xf32>
      %c0_19 = arith.constant 0 : index
      %222 = arith.index_cast %12 : i32 to index
      %c4 = arith.constant 4 : index
      %c0_20 = arith.constant 0 : index
      %223 = vector.load %arg7[%c0_19, %222, %c4, %c0_20] : memref<1x22x22x128xf32, #tpu.memory_space<vmem>>, vector<1x14x16x128xf32>
      %224 = vector.shape_cast %223 : vector<1x14x16x128xf32> to vector<14x16x128xf32>
      %225 = vector.extract_strided_slice %224 {offsets = [0, 0, 0], sizes = [8, 16, 128], strides = [1, 1, 1]} : vector<14x16x128xf32> to vector<8x16x128xf32>
      %226 = vector.extract_strided_slice %3 {offsets = [0, 4, 0], sizes = [1, 1, 128], strides = [1, 1, 1]} : vector<7x7x128xf32> to vector<1x1x128xf32>
      %227 = vector.shape_cast %226 : vector<1x1x128xf32> to vector<128xf32>
      %228 = vector.shape_cast %227 : vector<128xf32> to vector<1x1x128xf32>
      %229 = vector.broadcast %228 : vector<1x1x128xf32> to vector<8x16x128xf32>
      %230 = arith.mulf %225, %229 : vector<8x16x128xf32>
      %231 = arith.addf %221, %230 : vector<8x16x128xf32>
      %232 = vector.extract_strided_slice %224 {offsets = [1, 0, 0], sizes = [8, 16, 128], strides = [1, 1, 1]} : vector<14x16x128xf32> to vector<8x16x128xf32>
      %233 = vector.extract_strided_slice %3 {offsets = [1, 4, 0], sizes = [1, 1, 128], strides = [1, 1, 1]} : vector<7x7x128xf32> to vector<1x1x128xf32>
      %234 = vector.shape_cast %233 : vector<1x1x128xf32> to vector<128xf32>
      %235 = vector.shape_cast %234 : vector<128xf32> to vector<1x1x128xf32>
      %236 = vector.broadcast %235 : vector<1x1x128xf32> to vector<8x16x128xf32>
      %237 = arith.mulf %232, %236 : vector<8x16x128xf32>
      %238 = arith.addf %231, %237 : vector<8x16x128xf32>
      %239 = vector.extract_strided_slice %224 {offsets = [2, 0, 0], sizes = [8, 16, 128], strides = [1, 1, 1]} : vector<14x16x128xf32> to vector<8x16x128xf32>
      %240 = vector.extract_strided_slice %3 {offsets = [2, 4, 0], sizes = [1, 1, 128], strides = [1, 1, 1]} : vector<7x7x128xf32> to vector<1x1x128xf32>
      %241 = vector.shape_cast %240 : vector<1x1x128xf32> to vector<128xf32>
      %242 = vector.shape_cast %241 : vector<128xf32> to vector<1x1x128xf32>
      %243 = vector.broadcast %242 : vector<1x1x128xf32> to vector<8x16x128xf32>
      %244 = arith.mulf %239, %243 : vector<8x16x128xf32>
      %245 = arith.addf %238, %244 : vector<8x16x128xf32>
      %246 = vector.extract_strided_slice %224 {offsets = [3, 0, 0], sizes = [8, 16, 128], strides = [1, 1, 1]} : vector<14x16x128xf32> to vector<8x16x128xf32>
      %247 = vector.extract_strided_slice %3 {offsets = [3, 4, 0], sizes = [1, 1, 128], strides = [1, 1, 1]} : vector<7x7x128xf32> to vector<1x1x128xf32>
      %248 = vector.shape_cast %247 : vector<1x1x128xf32> to vector<128xf32>
      %249 = vector.shape_cast %248 : vector<128xf32> to vector<1x1x128xf32>
      %250 = vector.broadcast %249 : vector<1x1x128xf32> to vector<8x16x128xf32>
      %251 = arith.mulf %246, %250 : vector<8x16x128xf32>
      %252 = arith.addf %245, %251 : vector<8x16x128xf32>
      %253 = vector.extract_strided_slice %224 {offsets = [4, 0, 0], sizes = [8, 16, 128], strides = [1, 1, 1]} : vector<14x16x128xf32> to vector<8x16x128xf32>
      %254 = vector.extract_strided_slice %3 {offsets = [4, 4, 0], sizes = [1, 1, 128], strides = [1, 1, 1]} : vector<7x7x128xf32> to vector<1x1x128xf32>
      %255 = vector.shape_cast %254 : vector<1x1x128xf32> to vector<128xf32>
      %256 = vector.shape_cast %255 : vector<128xf32> to vector<1x1x128xf32>
      %257 = vector.broadcast %256 : vector<1x1x128xf32> to vector<8x16x128xf32>
      %258 = arith.mulf %253, %257 : vector<8x16x128xf32>
      %259 = arith.addf %252, %258 : vector<8x16x128xf32>
      %260 = vector.extract_strided_slice %224 {offsets = [5, 0, 0], sizes = [8, 16, 128], strides = [1, 1, 1]} : vector<14x16x128xf32> to vector<8x16x128xf32>
      %261 = vector.extract_strided_slice %3 {offsets = [5, 4, 0], sizes = [1, 1, 128], strides = [1, 1, 1]} : vector<7x7x128xf32> to vector<1x1x128xf32>
      %262 = vector.shape_cast %261 : vector<1x1x128xf32> to vector<128xf32>
      %263 = vector.shape_cast %262 : vector<128xf32> to vector<1x1x128xf32>
      %264 = vector.broadcast %263 : vector<1x1x128xf32> to vector<8x16x128xf32>
      %265 = arith.mulf %260, %264 : vector<8x16x128xf32>
      %266 = arith.addf %259, %265 : vector<8x16x128xf32>
      %267 = vector.extract_strided_slice %224 {offsets = [6, 0, 0], sizes = [8, 16, 128], strides = [1, 1, 1]} : vector<14x16x128xf32> to vector<8x16x128xf32>
      %268 = vector.extract_strided_slice %3 {offsets = [6, 4, 0], sizes = [1, 1, 128], strides = [1, 1, 1]} : vector<7x7x128xf32> to vector<1x1x128xf32>
      %269 = vector.shape_cast %268 : vector<1x1x128xf32> to vector<128xf32>
      %270 = vector.shape_cast %269 : vector<128xf32> to vector<1x1x128xf32>
      %271 = vector.broadcast %270 : vector<1x1x128xf32> to vector<8x16x128xf32>
      %272 = arith.mulf %267, %271 : vector<8x16x128xf32>
      %273 = arith.addf %266, %272 : vector<8x16x128xf32>
      %c0_21 = arith.constant 0 : index
      %274 = arith.index_cast %12 : i32 to index
      %c5 = arith.constant 5 : index
      %c0_22 = arith.constant 0 : index
      %275 = vector.load %arg7[%c0_21, %274, %c5, %c0_22] : memref<1x22x22x128xf32, #tpu.memory_space<vmem>>, vector<1x14x16x128xf32>
      %276 = vector.shape_cast %275 : vector<1x14x16x128xf32> to vector<14x16x128xf32>
      %277 = vector.extract_strided_slice %276 {offsets = [0, 0, 0], sizes = [8, 16, 128], strides = [1, 1, 1]} : vector<14x16x128xf32> to vector<8x16x128xf32>
      %278 = vector.extract_strided_slice %3 {offsets = [0, 5, 0], sizes = [1, 1, 128], strides = [1, 1, 1]} : vector<7x7x128xf32> to vector<1x1x128xf32>
      %279 = vector.shape_cast %278 : vector<1x1x128xf32> to vector<128xf32>
      %280 = vector.shape_cast %279 : vector<128xf32> to vector<1x1x128xf32>
      %281 = vector.broadcast %280 : vector<1x1x128xf32> to vector<8x16x128xf32>
      %282 = arith.mulf %277, %281 : vector<8x16x128xf32>
      %283 = arith.addf %273, %282 : vector<8x16x128xf32>
      %284 = vector.extract_strided_slice %276 {offsets = [1, 0, 0], sizes = [8, 16, 128], strides = [1, 1, 1]} : vector<14x16x128xf32> to vector<8x16x128xf32>
      %285 = vector.extract_strided_slice %3 {offsets = [1, 5, 0], sizes = [1, 1, 128], strides = [1, 1, 1]} : vector<7x7x128xf32> to vector<1x1x128xf32>
      %286 = vector.shape_cast %285 : vector<1x1x128xf32> to vector<128xf32>
      %287 = vector.shape_cast %286 : vector<128xf32> to vector<1x1x128xf32>
      %288 = vector.broadcast %287 : vector<1x1x128xf32> to vector<8x16x128xf32>
      %289 = arith.mulf %284, %288 : vector<8x16x128xf32>
      %290 = arith.addf %283, %289 : vector<8x16x128xf32>
      %291 = vector.extract_strided_slice %276 {offsets = [2, 0, 0], sizes = [8, 16, 128], strides = [1, 1, 1]} : vector<14x16x128xf32> to vector<8x16x128xf32>
      %292 = vector.extract_strided_slice %3 {offsets = [2, 5, 0], sizes = [1, 1, 128], strides = [1, 1, 1]} : vector<7x7x128xf32> to vector<1x1x128xf32>
      %293 = vector.shape_cast %292 : vector<1x1x128xf32> to vector<128xf32>
      %294 = vector.shape_cast %293 : vector<128xf32> to vector<1x1x128xf32>
      %295 = vector.broadcast %294 : vector<1x1x128xf32> to vector<8x16x128xf32>
      %296 = arith.mulf %291, %295 : vector<8x16x128xf32>
      %297 = arith.addf %290, %296 : vector<8x16x128xf32>
      %298 = vector.extract_strided_slice %276 {offsets = [3, 0, 0], sizes = [8, 16, 128], strides = [1, 1, 1]} : vector<14x16x128xf32> to vector<8x16x128xf32>
      %299 = vector.extract_strided_slice %3 {offsets = [3, 5, 0], sizes = [1, 1, 128], strides = [1, 1, 1]} : vector<7x7x128xf32> to vector<1x1x128xf32>
      %300 = vector.shape_cast %299 : vector<1x1x128xf32> to vector<128xf32>
      %301 = vector.shape_cast %300 : vector<128xf32> to vector<1x1x128xf32>
      %302 = vector.broadcast %301 : vector<1x1x128xf32> to vector<8x16x128xf32>
      %303 = arith.mulf %298, %302 : vector<8x16x128xf32>
      %304 = arith.addf %297, %303 : vector<8x16x128xf32>
      %305 = vector.extract_strided_slice %276 {offsets = [4, 0, 0], sizes = [8, 16, 128], strides = [1, 1, 1]} : vector<14x16x128xf32> to vector<8x16x128xf32>
      %306 = vector.extract_strided_slice %3 {offsets = [4, 5, 0], sizes = [1, 1, 128], strides = [1, 1, 1]} : vector<7x7x128xf32> to vector<1x1x128xf32>
      %307 = vector.shape_cast %306 : vector<1x1x128xf32> to vector<128xf32>
      %308 = vector.shape_cast %307 : vector<128xf32> to vector<1x1x128xf32>
      %309 = vector.broadcast %308 : vector<1x1x128xf32> to vector<8x16x128xf32>
      %310 = arith.mulf %305, %309 : vector<8x16x128xf32>
      %311 = arith.addf %304, %310 : vector<8x16x128xf32>
      %312 = vector.extract_strided_slice %276 {offsets = [5, 0, 0], sizes = [8, 16, 128], strides = [1, 1, 1]} : vector<14x16x128xf32> to vector<8x16x128xf32>
      %313 = vector.extract_strided_slice %3 {offsets = [5, 5, 0], sizes = [1, 1, 128], strides = [1, 1, 1]} : vector<7x7x128xf32> to vector<1x1x128xf32>
      %314 = vector.shape_cast %313 : vector<1x1x128xf32> to vector<128xf32>
      %315 = vector.shape_cast %314 : vector<128xf32> to vector<1x1x128xf32>
      %316 = vector.broadcast %315 : vector<1x1x128xf32> to vector<8x16x128xf32>
      %317 = arith.mulf %312, %316 : vector<8x16x128xf32>
      %318 = arith.addf %311, %317 : vector<8x16x128xf32>
      %319 = vector.extract_strided_slice %276 {offsets = [6, 0, 0], sizes = [8, 16, 128], strides = [1, 1, 1]} : vector<14x16x128xf32> to vector<8x16x128xf32>
      %320 = vector.extract_strided_slice %3 {offsets = [6, 5, 0], sizes = [1, 1, 128], strides = [1, 1, 1]} : vector<7x7x128xf32> to vector<1x1x128xf32>
      %321 = vector.shape_cast %320 : vector<1x1x128xf32> to vector<128xf32>
      %322 = vector.shape_cast %321 : vector<128xf32> to vector<1x1x128xf32>
      %323 = vector.broadcast %322 : vector<1x1x128xf32> to vector<8x16x128xf32>
      %324 = arith.mulf %319, %323 : vector<8x16x128xf32>
      %325 = arith.addf %318, %324 : vector<8x16x128xf32>
      %c0_23 = arith.constant 0 : index
      %326 = arith.index_cast %12 : i32 to index
      %c6 = arith.constant 6 : index
      %c0_24 = arith.constant 0 : index
      %327 = vector.load %arg7[%c0_23, %326, %c6, %c0_24] : memref<1x22x22x128xf32, #tpu.memory_space<vmem>>, vector<1x14x16x128xf32>
      %328 = vector.shape_cast %327 : vector<1x14x16x128xf32> to vector<14x16x128xf32>
      %329 = vector.extract_strided_slice %328 {offsets = [0, 0, 0], sizes = [8, 16, 128], strides = [1, 1, 1]} : vector<14x16x128xf32> to vector<8x16x128xf32>
      %330 = vector.extract_strided_slice %3 {offsets = [0, 6, 0], sizes = [1, 1, 128], strides = [1, 1, 1]} : vector<7x7x128xf32> to vector<1x1x128xf32>
      %331 = vector.shape_cast %330 : vector<1x1x128xf32> to vector<128xf32>
      %332 = vector.shape_cast %331 : vector<128xf32> to vector<1x1x128xf32>
      %333 = vector.broadcast %332 : vector<1x1x128xf32> to vector<8x16x128xf32>
      %334 = arith.mulf %329, %333 : vector<8x16x128xf32>
      %335 = arith.addf %325, %334 : vector<8x16x128xf32>
      %336 = vector.extract_strided_slice %328 {offsets = [1, 0, 0], sizes = [8, 16, 128], strides = [1, 1, 1]} : vector<14x16x128xf32> to vector<8x16x128xf32>
      %337 = vector.extract_strided_slice %3 {offsets = [1, 6, 0], sizes = [1, 1, 128], strides = [1, 1, 1]} : vector<7x7x128xf32> to vector<1x1x128xf32>
      %338 = vector.shape_cast %337 : vector<1x1x128xf32> to vector<128xf32>
      %339 = vector.shape_cast %338 : vector<128xf32> to vector<1x1x128xf32>
      %340 = vector.broadcast %339 : vector<1x1x128xf32> to vector<8x16x128xf32>
      %341 = arith.mulf %336, %340 : vector<8x16x128xf32>
      %342 = arith.addf %335, %341 : vector<8x16x128xf32>
      %343 = vector.extract_strided_slice %328 {offsets = [2, 0, 0], sizes = [8, 16, 128], strides = [1, 1, 1]} : vector<14x16x128xf32> to vector<8x16x128xf32>
      %344 = vector.extract_strided_slice %3 {offsets = [2, 6, 0], sizes = [1, 1, 128], strides = [1, 1, 1]} : vector<7x7x128xf32> to vector<1x1x128xf32>
      %345 = vector.shape_cast %344 : vector<1x1x128xf32> to vector<128xf32>
      %346 = vector.shape_cast %345 : vector<128xf32> to vector<1x1x128xf32>
      %347 = vector.broadcast %346 : vector<1x1x128xf32> to vector<8x16x128xf32>
      %348 = arith.mulf %343, %347 : vector<8x16x128xf32>
      %349 = arith.addf %342, %348 : vector<8x16x128xf32>
      %350 = vector.extract_strided_slice %328 {offsets = [3, 0, 0], sizes = [8, 16, 128], strides = [1, 1, 1]} : vector<14x16x128xf32> to vector<8x16x128xf32>
      %351 = vector.extract_strided_slice %3 {offsets = [3, 6, 0], sizes = [1, 1, 128], strides = [1, 1, 1]} : vector<7x7x128xf32> to vector<1x1x128xf32>
      %352 = vector.shape_cast %351 : vector<1x1x128xf32> to vector<128xf32>
      %353 = vector.shape_cast %352 : vector<128xf32> to vector<1x1x128xf32>
      %354 = vector.broadcast %353 : vector<1x1x128xf32> to vector<8x16x128xf32>
      %355 = arith.mulf %350, %354 : vector<8x16x128xf32>
      %356 = arith.addf %349, %355 : vector<8x16x128xf32>
      %357 = vector.extract_strided_slice %328 {offsets = [4, 0, 0], sizes = [8, 16, 128], strides = [1, 1, 1]} : vector<14x16x128xf32> to vector<8x16x128xf32>
      %358 = vector.extract_strided_slice %3 {offsets = [4, 6, 0], sizes = [1, 1, 128], strides = [1, 1, 1]} : vector<7x7x128xf32> to vector<1x1x128xf32>
      %359 = vector.shape_cast %358 : vector<1x1x128xf32> to vector<128xf32>
      %360 = vector.shape_cast %359 : vector<128xf32> to vector<1x1x128xf32>
      %361 = vector.broadcast %360 : vector<1x1x128xf32> to vector<8x16x128xf32>
      %362 = arith.mulf %357, %361 : vector<8x16x128xf32>
      %363 = arith.addf %356, %362 : vector<8x16x128xf32>
      %364 = vector.extract_strided_slice %328 {offsets = [5, 0, 0], sizes = [8, 16, 128], strides = [1, 1, 1]} : vector<14x16x128xf32> to vector<8x16x128xf32>
      %365 = vector.extract_strided_slice %3 {offsets = [5, 6, 0], sizes = [1, 1, 128], strides = [1, 1, 1]} : vector<7x7x128xf32> to vector<1x1x128xf32>
      %366 = vector.shape_cast %365 : vector<1x1x128xf32> to vector<128xf32>
      %367 = vector.shape_cast %366 : vector<128xf32> to vector<1x1x128xf32>
      %368 = vector.broadcast %367 : vector<1x1x128xf32> to vector<8x16x128xf32>
      %369 = arith.mulf %364, %368 : vector<8x16x128xf32>
      %370 = arith.addf %363, %369 : vector<8x16x128xf32>
      %371 = vector.extract_strided_slice %328 {offsets = [6, 0, 0], sizes = [8, 16, 128], strides = [1, 1, 1]} : vector<14x16x128xf32> to vector<8x16x128xf32>
      %372 = vector.extract_strided_slice %3 {offsets = [6, 6, 0], sizes = [1, 1, 128], strides = [1, 1, 1]} : vector<7x7x128xf32> to vector<1x1x128xf32>
      %373 = vector.shape_cast %372 : vector<1x1x128xf32> to vector<128xf32>
      %374 = vector.shape_cast %373 : vector<128xf32> to vector<1x1x128xf32>
      %375 = vector.broadcast %374 : vector<1x1x128xf32> to vector<8x16x128xf32>
      %376 = arith.mulf %371, %375 : vector<8x16x128xf32>
      %377 = arith.addf %370, %376 : vector<8x16x128xf32>
      %378 = vector.shape_cast %5 : vector<128xf32> to vector<1x1x128xf32>
      %379 = vector.broadcast %378 : vector<1x1x128xf32> to vector<8x16x128xf32>
      %380 = arith.addf %377, %379 : vector<8x16x128xf32>
      %c8_i32_25 = arith.constant 8 : i32
      %381 = arith.muli %10, %c8_i32_25 : i32
      %c0_26 = arith.constant 0 : index
      %382 = arith.index_cast %381 : i32 to index
      %c0_27 = arith.constant 0 : index
      %c0_28 = arith.constant 0 : index
      %383 = vector.load %arg6[%c0_26, %382, %c0_27, %c0_28] : memref<1x16x16x128xf32, #tpu.memory_space<vmem>>, vector<1x8x16x128xf32>
      %384 = vector.shape_cast %383 : vector<1x8x16x128xf32> to vector<8x16x128xf32>
      %385 = vector.shape_cast %380 : vector<8x16x128xf32> to vector<1x8x16x128xf32>
      tpu.vector_store %arg6[%c0_26, %382, %c0_27, %c0_28], %385 {strides = array<i32>} : memref<1x16x16x128xf32, #tpu.memory_space<vmem>>, vector<1x8x16x128xf32>,
    }
    %c2_i32_7 = arith.constant 2 : i32
    return
  }
  func.func @transform_1(%arg0: i32, %arg1: i32, %arg2: i32) -> (i32, i32, i32) {
    %c0_i32 = arith.constant 0 : i32
    %c0_i32_0 = arith.constant 0 : i32
    %c0_i32_1 = arith.constant 0 : i32
    return %c0_i32, %c0_i32_0, %arg1 : i32, i32, i32
  }
  func.func @transform_2(%arg0: i32, %arg1: i32, %arg2: i32) -> (i32, i32, i32) {
    %c0_i32 = arith.constant 0 : i32
    %c0_i32_0 = arith.constant 0 : i32
    %c0_i32_1 = arith.constant 0 : i32
    return %c0_i32, %c0_i32_0, %arg1 : i32, i32, i32
  }
  func.func @transform_3(%arg0: i32, %arg1: i32, %arg2: i32) -> (i32, i32, i32, i32) {
    %c0_i32 = arith.constant 0 : i32
    %c0_i32_0 = arith.constant 0 : i32
    return %arg0, %arg2, %c0_i32, %arg1 : i32, i32, i32, i32
  }
}

</mosaic_0001>

<bundles_post_ra>
// kernel: tpu_custom_call.1
= control target key start
LH: loop header
LB: loop body
LE: loop exit
PB: predicated region body
PF: predicated region fallthrough
CT: control target
= control target key end

     0   :  { %s5175_s0 = inlined_call_operand.hbm [shape: f32[2,16,16,256], index: 0, kind: input, shape index: {}]   ;;  %s5176_s1 = inlined_call_operand.hbm [shape: f32[7,7,256], index: 1, kind: input, shape index: {}]   ;;  %s5177_s2 = inlined_call_operand.vmem [shape: f32[1,1,256], index: 2, kind: input, shape index: {}]   ;;  %s5178_s3 = inlined_call_operand.hbm [shape: f32[2,16,16,256], index: 3, kind: output, shape index: {}]  }
   0x1   :  { %5245 = sst [smem:[#allocation37_spill]] %s5176_s1 }
   0x2   :  { %8 = vsyncpa [#allocation5], 0 }
   0x3   :  { %10 = vsyncpa [#allocation5 + $0x1], 0 }
   0x4   :  { %11 = vsyncpa [#allocation6], 0 }
   0x5   :  { %13 = vsyncpa [#allocation6 + $0x1], 0  ;;  %s2822_s12 = smov 0   ;;  %s2824_s13 = smov 0  }
   0x6   :  { %s2826_s14 = smov 0   ;;  %s2828_s15 = smov 0  }
   0x7   :  { %s2830_s16 = smov 0   ;;  %s2832_s17 = smov 0  }
   0x8   :  { %s2834_s18 = smov 0   ;;  %s2836_s19 = smov 0  }
   0x9   :  { %s2838_s20 = smov 0   ;;  %s2840_s21 = smov 0  }
   0xa   :  { %s2842_s22 = smov 0  }
   0xb LB: > { %5246 = sst [smem:[#allocation13_spill]] %s2754_s16  ;;  %s2469_s23 = sadd.s32 4294967295, %s2778_s22   ;;  %s2778_s22 = sphi %s2842_s22, %s19_s22   ;;  %s2774_s21 = sphi %s2840_s21, %s5415_s21   ;;  %s2770_s20 = sphi %s2838_s20, %s5414_s20   ;;  %s2766_s19 = sphi %s2836_s19, %s5413_s19   ;;  %s2762_s18 = sphi %s2834_s18, %s5412_s18   ;;  %s2758_s17 = sphi %s2832_s17, %s5411_s17   ;;  %s2754_s16 = sphi %s2830_s16, %s5410_s16   ;;  %s2750_s15 = sphi %s2828_s15, %s5409_s15   ;;  %s2746_s14 = sphi %s2826_s14, %s5418_s14   ;;  %s2742_s13 = sphi %s2824_s13, %s5417_s13   ;;  %s2738_s12 = sphi %s2822_s12, %s5416_s12  }
   0xc   : > { %5247 = sst [smem:[#allocation14_spill]] %s2758_s17  ;;  %s2470_s24 = sadd.s32 4294967294, %s2778_s22  }
   0xd   : > { %5248 = sst [smem:[#allocation15_spill]] %s2770_s20  ;;  %s34_s25 = sadd.s32 1, %s2770_s20 }
   0xe   : > { %5249 = sst [smem:[#allocation16_spill]] %s2774_s21  ;;  %s38_s26 = sadd.s32 1, %s2774_s21 }
   0xf   : > { %p36_p0 = scmp.ge.s32.totalorder %s34_s25, 2  ;;  %s45_s27 = sadd.s32 1, %s2758_s17 }
  0x10   : > { %p52_p1 = scmp.ne.s32.totalorder %s2758_s17, %s2754_s16  ;;  %p53_p2 = scmp.eq.s32.totalorder %s2778_s22, 0 }
  0x11   : > { %s5420_s25 = smov (%p36_p0, %s34_s25), 0  ;;  %s5422_s26 = smov (!%p36_p0, %s38_s26), %s2774_s21 }
  0x12   : > { %5250 = sst [smem:[#allocation17_spill]] %s5420_s25  ;;  %s42_s28 = ssub.s32 %s2770_s20, %s5420_s25 }
  0x13   : > { %p2888_p3 = por %p53_p2, %p52_p1  ;;  %p40_p4 = scmp.ge.s32.totalorder %s5422_s26, 2 }
  0x14   : > { %p43_p5 = scmp.eq.s32.totalorder %s42_s28, 0  ;;  %p58_p6 = scmp.ne.s32.totalorder %s2754_s16, %s2750_s15 }
  0x15   : > { %p59_p7 = scmp.eq.s32.totalorder %s2469_s23, 0  ;;  %s5424_s26 = smov (%p40_p4, %s5422_s26), 0 }
  0x16   : > { %5252 = sst [smem:[#allocation18_spill]] %s5424_s26  ;;  %s94_s5 = ssub.s32 %s2774_s21, %s5424_s26 }
  0x17   : > { %s2896_s30 = scalar_select %p43_p5, %s2758_s17, %s45_s27  }
  0x18   : > { %p2898_p8 = por %p59_p7, %p58_p6  ;;  %s98_s6 = sor.u32 %s94_s5, %s42_s28 }
  0x19   : > { %5253 = sst [smem:[#allocation19_spill]] %s2896_s30  ;;  %s101_s7 = sadd.s32 1, %s2746_s14 }
  0x1a   : > { %p99_p9 = scmp.eq.s32.totalorder %s98_s6, 0  ;;  %p111_p10 = scmp.ne.s32.totalorder %s2746_s14, %s2742_s13 }
  0x1b   : > { %p112_p11 = scmp.eq.s32.totalorder %s2469_s23, 3  ;;  %p117_p12 = scmp.ne.s32.totalorder %s2742_s13, %s2738_s12 }
  0x1c   : > { %s2910_s8 = scalar_select %p99_p9, %s2746_s14, %s101_s7  }
  0x1d   : > { %p2912_p13 = por %p112_p11, %p111_p10  ;;  %p118_p0 = scmp.eq.s32.totalorder %s2470_s24, 3 }
  0x1e   : > { %5255 = sst [smem:[#allocation20_spill]] %s2910_s8  ;;  %p2506_p1 = scmp.lt.s32.totalorder %s2778_s22, 4 }
  0x1f   : > { %s5256_s9 = scalar_select %p2912_p13, 1, 0 }
  0x20   : > { %p2917_p2 = por %p118_p0, %p117_p12  ;;  %s138_s11 = sand.u32 1, %s2758_s17  }
  0x21   : > { %s2492_s15 = smul.u32 56, %s138_s11  ;;  %s2473_s27 = sshll.u32 %s2770_s20, 7 }
  0x22   : > { %s5257_s10 = scalar_select %p2917_p2, 1, 0 }
  0x23   : > { %p2925_p4 = pnand %p2506_p1, %p2888_p3  ;;  %s5259_s1 = sld [smem:[#allocation37_spill]] }
  0x24   : > { %s142_s24 = scalar_lea.vmem [#allocation4], %s2492_s15  ;;  %s2936_s29 = scalar_lea.sflag [#allocation5], %s138_s11 }
  0x25   : > { %s148_s7 = sshll.u32 %s142_s24, 4  ;;  %p2622_p5 = pneg %p2925_p4  ;;  %s2934_s7 = int_to_ptr.vmem [resolvable:$true] %s148_s7 }
  0x29   : > { %s2932_s6 = scalar_lea.hbm %s5259_s1, %s2473_s27  ;;  %s2625_s5 = scalar_lea.hbm %s5259_s1, 1792 }
  0x2a   : > { %s2620_s26 = scalar_lea.hbm %s2932_s6, 896  ;;  %p2626_p9 = scmp.lt.u32.totalorder %s2932_s6, %s5259_s1 }
  0x2b   : > { %p2621_p3 = scmp.ne.s32.totalorder %s2932_s6, %s2620_s26  ;;  %p2627_p10 = scmp.lt.u32.totalorder %s2625_s5, %s2620_s26 }
  0x2c   : > { %p2629_p12 = scmp.lt.u32.totalorder %s2620_s26, %s2932_s6 }
  0x2d   : > { %p2623_p6 = pnand %p2622_p5, %p2621_p3  ;;  %p2628_p11 = por %p2627_p10, %p2626_p9 }
  0x2f   : > { %p2624_p7 = pneg %p2623_p6  ;;  %p2630_p0 = por %p2629_p12, %p2628_p11 }
  0x31   : > { %p2631_p1 = pnand %p2630_p0, %p2624_p7 }
  0x33   : > { %2634 = shalt.err (!%p2631_p1)
}
  0x34   : > { %s2635_s11 = scalar_lea.vmem %s2934_s7, 896  ;;  %s2784_s15 = smov [#allocation4]  }
  0x35   : > { %p2636_p3 = scmp.ne.s32.totalorder %s2934_s7, %s2635_s11  ;;  %s2640_s24 = sshll.u32 %s2784_s15, 4  ;;  %s2641_s24 = int_to_ptr.vmem [resolvable:$false] %s2640_s24 }
  0x36   : > { %s2642_s21 = scalar_lea.vmem %s2641_s24, 1792  ;;  %p2643_p13 = scmp.lt.s32.totalorder %s2934_s7, %s2641_s24 }
  0x37   : > { %p2638_p6 = pnand %p2636_p3, %p2622_p5  ;;  %p2644_p9 = scmp.lt.s32.totalorder %s2642_s21, %s2635_s11 }
  0x39   : > { %p2639_p2 = pneg %p2638_p6  ;;  %p2645_p10 = por %p2644_p9, %p2643_p13 }
  0x3b   : > { %p2646_p11 = pnand %p2645_p10, %p2639_p2 }
  0x3d   : > { %2649 = shalt.err (!%p2646_p11)
}
  0x3e   : > { %s2785_s25 = smov 256   ;;  %s2786_s26 = smov 128  }
  0x3f   : > { %s2787_s27 = smov 8   ;;  %p2474_p5 = scmp.ge.s32.totalorder %s2778_s22, 1 }
  0x40   : > { %2501 = dma.hbm_to_vmem [thread:$0]  (!%p2925_p4), %s2932_s6, 896, %s2934_s7, %s2936_s29, %s2785_s25, %s2786_s26, %s2787_s27  }
  0x41   : > { %p162_p7 = scmp.lt.s32.totalorder %s2778_s22, 5 }
  0x43   : > { %p163_p12 = pnand %p2474_p5, %p162_p7 }
  0x45   : > { %166 = sbr.rel (%p163_p12) target bundleno = 561 (0x231), region = 28 }
  0x4c   : > { %s168_s23 = sand.u32 1, %s2754_s16  }
  0x4d   : > { %s2493_s5 = smul.u32 56, %s168_s23  ;;  %s169_s11 = scalar_lea.sflag [#allocation5], %s168_s23 }
  0x4f   : > { %s2967_s15 = scalar_lea.vmem [#allocation4], %s2493_s5 }
  0x50   : > { %2727 = dma.done.wait (%p2898_p8), %s169_s11, 896  }
  0x51   : > { %2729 = vsyncadd (%p2898_p8), %s169_s11, 4294966400  ;;  %s5183_s28 = sand.u32 1, %s2742_s13   ;;  %p196_p13 = scmp.lt.s32.totalorder %s2762_s18, 1 }
  0x52   : > { %s2977_s6 = sshll.u32 %s5183_s28, 8 }
  0x53   : > { %s2980_s7 = scalar_select %p196_p13, %s2762_s18, 1 }
  0x54   : > { %s2476_s4 = sshll.u32 %s2762_s18, 7  ;;  %s2477_s26 = sshll.u32 %s2766_s19, 6  ;;  %v2788_v0 = vmov 0.0  }
  0x55   : > { %204 = vst [vmem:[#allocation2] sm:$0xff] %v2788_v0  ;;  %205 = vst [vmem:[#allocation2 + $0x8] sm:$0xff] %v2788_v0  ;;  %s268_s27 = sshra.s32 %s2476_s4, 7  ;;  %s279_s23 = sld [smem:[#allocation0]]  }
  0x56   : > { %206 = vst [vmem:[#allocation2 + $0x10] sm:$0x3f] %v2788_v0  ;;  %207 = vst [vmem:[#allocation2 + $0x18] sm:$0xff] %v2788_v0  ;;  %s271_s5 = sadd.s32 %s2477_s26, %s268_s27  ;;  %s2789_s29 = smov [#allocation2 + $0x4b]  }
  0x57   : > { %208 = vst [vmem:[#allocation2 + $0x20] sm:$0xff] %v2788_v0  ;;  %209 = vst [vmem:[#allocation2 + $0x28] sm:$0x3f] %v2788_v0  ;;  %s2478_s11 = sshll.u32 %s271_s5, 7  ;;  %s287_s24 = sshll.u32 %s2789_s29, 4  ;;  %s288_s24 = int_to_ptr.vmem [resolvable:$true] %s287_s24 }
  0x58   : > { %210 = vst [vmem:[#allocation2 + $0x30] sm:$0xff] %v2788_v0  ;;  %211 = vst [vmem:[#allocation2 + $0x38] sm:$0xff] %v2788_v0  ;;  %s273_s25 = scalar_lea.hbm %s5175_s0, %s2478_s11  ;;  %s2790_s21 = smov 512  }
  0x59   : > { %212 = vst [vmem:[#allocation2 + $0x40] sm:$0x3f] %v2788_v0  ;;  %214 = vst [vmem:[#allocation2 + $0x1c8] sm:$0xff] %v2788_v0  ;;  %291 = sst [smem:[#allocation9]] %s2790_s21  ;;  %s2791_s20 = smov 384  }
  0x5a   : > { %215 = vst [vmem:[#allocation2 + $0x1d0] sm:$0xff] %v2788_v0  ;;  %216 = vst [vmem:[#allocation2 + $0x1d8] sm:$0x3f] %v2788_v0  ;;  %293 = sst [smem:[#allocation9 + $0x1]] %s2791_s20  ;;  %s2792_s17 = smov 2  }
  0x5b   : > { %217 = vst [vmem:[#allocation2 + $0x1e0] sm:$0xff] %v2788_v0  ;;  %218 = vst [vmem:[#allocation2 + $0x1e8] sm:$0xff] %v2788_v0  ;;  %s2479_s1 = sshll.u32 %s279_s23, 26  ;;  %295 = sst [smem:[#allocation9 + $0x2]] %s2792_s17 }
  0x5c   : > { %219 = vst [vmem:[#allocation2 + $0x1f0] sm:$0x3f] %v2788_v0  ;;  %220 = vst [vmem:[#allocation2 + $0x1f8] sm:$0xff] %v2788_v0  ;;  %s2480_s30 = sadd.s32 134217728, %s2479_s1  ;;  %s2793_s16 = smov 256  }
  0x5d   : > { %221 = vst [vmem:[#allocation2 + $0x200] sm:$0xff] %v2788_v0  ;;  %222 = vst [vmem:[#allocation2 + $0x208] sm:$0x3f] %v2788_v0  ;;  %297 = sst [smem:[#allocation9 + $0x3]] %s2793_s16  ;;  %s2794_s8 = smov 128  }
  0x5e   : > { %226 = vst [vmem:[#allocation2 + $0x48] sm:$0x7] %v2788_v0  ;;  %227 = vst [vmem:[#allocation2 + $0x60] sm:$0x7] %v2788_v0  ;;  %299 = sst [smem:[#allocation9 + $0x4]] %s2794_s8  ;;  %s2795_s27 = smov 8  }
  0x5f   : > { %228 = vst [vmem:[#allocation2 + $0x78] sm:$0x7] %v2788_v0  ;;  %229 = vst [vmem:[#allocation2 + $0x90] sm:$0x7] %v2788_v0  ;;  %301 = sst [smem:[#allocation9 + $0x5]] %s2795_s27  ;;  %s2796_s5 = smov [#allocation3]  }
  0x60   : > { %230 = vst [vmem:[#allocation2 + $0xa8] sm:$0x7] %v2788_v0  ;;  %231 = vst [vmem:[#allocation2 + $0xc0] sm:$0x7] %v2788_v0  ;;  %s2797_s29 = smov [#allocation8]  }
  0x61   : > { %232 = vst [vmem:[#allocation2 + $0xd8] sm:$0x7] %v2788_v0  ;;  %233 = vst [vmem:[#allocation2 + $0xf0] sm:$0x7] %v2788_v0 }
  0x62   : > { %234 = vst [vmem:[#allocation2 + $0x108] sm:$0x7] %v2788_v0  ;;  %235 = vst [vmem:[#allocation2 + $0x120] sm:$0x7] %v2788_v0 }
  0x63   : > { %236 = vst [vmem:[#allocation2 + $0x138] sm:$0x7] %v2788_v0  ;;  %237 = vst [vmem:[#allocation2 + $0x150] sm:$0x7] %v2788_v0 }
  0x64   : > { %238 = vst [vmem:[#allocation2 + $0x168] sm:$0x7] %v2788_v0  ;;  %239 = vst [vmem:[#allocation2 + $0x180] sm:$0x7] %v2788_v0 }
  0x65   : > { %240 = vst [vmem:[#allocation2 + $0x198] sm:$0x7] %v2788_v0  ;;  %241 = vst [vmem:[#allocation2 + $0x1b0] sm:$0x7] %v2788_v0 }
  0x66   : > { %248 = vst [vmem:[#allocation2 + $0x5b] sm:$0x7] %v2788_v0  ;;  %249 = vst [vmem:[#allocation2 + $0x73] sm:$0x7] %v2788_v0 }
  0x67   : > { %250 = vst [vmem:[#allocation2 + $0x8b] sm:$0x7] %v2788_v0  ;;  %251 = vst [vmem:[#allocation2 + $0xa3] sm:$0x7] %v2788_v0 }
  0x68   : > { %252 = vst [vmem:[#allocation2 + $0xbb] sm:$0x7] %v2788_v0  ;;  %253 = vst [vmem:[#allocation2 + $0xd3] sm:$0x7] %v2788_v0 }
  0x69   : > { %254 = vst [vmem:[#allocation2 + $0xeb] sm:$0x7] %v2788_v0  ;;  %255 = vst [vmem:[#allocation2 + $0x103] sm:$0x7] %v2788_v0 }
  0x6a   : > { %256 = vst [vmem:[#allocation2 + $0x11b] sm:$0x7] %v2788_v0  ;;  %257 = vst [vmem:[#allocation2 + $0x133] sm:$0x7] %v2788_v0 }
  0x6b   : > { %258 = vst [vmem:[#allocation2 + $0x14b] sm:$0x7] %v2788_v0  ;;  %259 = vst [vmem:[#allocation2 + $0x163] sm:$0x7] %v2788_v0 }
  0x6c   : > { %260 = vst [vmem:[#allocation2 + $0x17b] sm:$0x7] %v2788_v0  ;;  %261 = vst [vmem:[#allocation2 + $0x193] sm:$0x7] %v2788_v0 }
  0x6d   : > { %262 = vst [vmem:[#allocation2 + $0x1ab] sm:$0x7] %v2788_v0  ;;  %263 = vst [vmem:[#allocation2 + $0x1c3] sm:$0x7] %v2788_v0 }
  0x6e   : > { %223 = vst [vmem:[#allocation2] sm:$0x7] %v2788_v0  ;;  %224 = vst [vmem:[#allocation2 + $0x18] sm:$0x7] %v2788_v0 }
  0x6f   : > { %225 = vst [vmem:[#allocation2 + $0x30] sm:$0x7] %v2788_v0  ;;  %242 = vst [vmem:[#allocation2 + $0x1c8] sm:$0x7] %v2788_v0 }
  0x70   : > { %243 = vst [vmem:[#allocation2 + $0x1e0] sm:$0x7] %v2788_v0  ;;  %244 = vst [vmem:[#allocation2 + $0x1f8] sm:$0x7] %v2788_v0 }
  0x71   : > { %245 = vst [vmem:[#allocation2 + $0x13] sm:$0x7] %v2788_v0  ;;  %246 = vst [vmem:[#allocation2 + $0x2b] sm:$0x7] %v2788_v0 }
  0x72   : > { %247 = vst [vmem:[#allocation2 + $0x43] sm:$0x7] %v2788_v0  ;;  %264 = vst [vmem:[#allocation2 + $0x1db] sm:$0x7] %v2788_v0 }
  0x73   : > { %265 = vst [vmem:[#allocation2 + $0x1f3] sm:$0x7] %v2788_v0  ;;  %266 = vst [vmem:[#allocation2 + $0x20b] sm:$0x7] %v2788_v0 }
  0x74   : > { %303 = dma.general %s273_s25, 4096, %s288_s24, %s2796_s5, %s2797_s29, [#allocation9], %s2480_s30, 0  }
  0x75   : > { %2730 = dma.done.wait [#allocation3], 4096 }
  0x76   : > { %2731 = vsyncadd [#allocation3], 4294963200  ;;  %v3059_v1 = vld [vmem:[%s2967_s15] sm:$0x7f]  ;;  %v3062_v2 = vld [vmem:[%s2967_s15 + $0x8] sm:$0x7f]  ;;  %s5267_s17 = scalar_lea.vmem %s5177_s2, %s2980_s7 }
  0x77   : > { %5260 = vst [vmem:[#allocation21_spill] sm:$0xff] %v3059_v1  ;;  %5261 = vst [vmem:[#allocation22_spill] sm:$0xff] %v3062_v2  ;;  %v3065_v3 = vld [vmem:[%s2967_s15 + $0x10] sm:$0x7f]  ;;  %v3068_v4 = vld [vmem:[%s2967_s15 + $0x18] sm:$0x7f] }
  0x78   : > { %5262 = vst [vmem:[#allocation23_spill] sm:$0xff] %v3065_v3  ;;  %5263 = vst [vmem:[#allocation24_spill] sm:$0xff] %v3068_v4  ;;  %v3071_v5 = vld [vmem:[%s2967_s15 + $0x20] sm:$0x7f]  ;;  %v3074_v6 = vld [vmem:[%s2967_s15 + $0x28] sm:$0x7f] }
  0x79   : > { %5264 = vst [vmem:[#allocation25_spill] sm:$0xff] %v3071_v5  ;;  %5265 = vst [vmem:[#allocation26_spill] sm:$0xff] %v3074_v6  ;;  %v3077_v7 = vld [vmem:[%s2967_s15 + $0x30] sm:$0x7f]  ;;  %s3086_s20 = smov 0  }
  0x7a   : > { %5266 = vst [vmem:[#allocation27_spill] sm:$0xff] %v3077_v7  ;;  %v3084_v8 = vld [vmem:[%s5267_s17] ss:$0 sm:$0xff] }
  0x7b   : > { %5268 = vst [vmem:[#allocation28_spill] sm:$0xff] %v3084_v8 }
  0x7c LB: >> { %v357_v9 = vlaneseq  ;;  %s2482_s30 = smul.u32 192, %s2782_s20  ;;  %s2491_s15 = sshll.u32 %s2782_s20, 7  ;;  %s2782_s20 = sphi %s3086_s20, %s324_s20  }
  0x7d   : >> { %s5402_s28 = scalar_lea.vmem [#allocation7], %s2977_s6  ;;  %s324_s20 = sadd.s32 1, %s2782_s20  }
  0x7e   : >> { %v5269_v1 = vld [vmem:[#allocation21_spill] sm:$0xff]  ;;  %v3092_v10 = vshrl.u32 %v357_v9, 7  ;;  %s3098_s8 = scalar_lea.vmem [#allocation2], %s2482_s30  ;;  %v5273_v2 = vld [vmem:[#allocation22_spill] sm:$0xff]  ;;  %s5063_s7 = scalar_lea.vmem %s5402_s28, %s2491_s15 [#allocation7] }
  0x7f   : >> { %v329_v13 = vld [vmem:[%s3098_s8] sm:$0xff]  ;;  %v330_v14 = vld [vmem:[%s3098_s8 + $0x8] sm:$0xff]  ;;  %v331_v15 = vld [vmem:[%s3098_s8 + $0x18] sm:$0xff]  ;;  %p321_p8 = scmp.ge.s32.totalorder %s324_s20, 2  }
  0x80   : >> { %5270 = vst [vmem:[#allocation29_spill] sm:$0xff] %v3092_v10  ;;  %v359_v11 = vsub.s32 0, %v3092_v10  ;;  %v3096_v12 = vsub.s32 1, %v3092_v10  ;;  %v332_v16 = vld [vmem:[%s3098_s8 + $0x20] sm:$0xff]  ;;  %v3105_v17 = vld [vmem:[%s3098_s8 + $0x30] sm:$0xff]  ;;  %v3108_v18 = vld [vmem:[%s3098_s8 + $0x38] sm:$0xff]  ;;  %s2344_s21 = sadd.s32 (%p321_p8), %s2762_s18, %s2477_s26 }
  0x81   : >> { %v3112_v20 = vsub.s32 2, %v3092_v10  ;;  %v3115_v21 = vld [vmem:[%s3098_s8 + $0x48] sm:$0xff]  ;;  %v3118_v22 = vld [vmem:[%s3098_s8 + $0x50] sm:$0xff]  ;;  %v3121_v23 = vld [vmem:[%s3098_s8 + $0x60] sm:$0xff]  ;;  %s2487_s25 = sshll.u32 (%p321_p8), %s2344_s21, 7  ;;  %s5404_s23 = scalar_lea.vmem (%p321_p8), [#allocation7], %s2977_s6 }
  0x82   : >> { %5271 = vst [vmem:[#allocation30_spill] sm:$0xff] %v3096_v12  ;;  %v360_v19 = vrot.slane %v5269_v1, %v359_v11  ;;  %v396_v24 = vrot.slane %v5273_v2, %v359_v11  ;;  %v5274_v3 = vld [vmem:[#allocation23_spill] sm:$0xff]  ;;  %v5275_v4 = vld [vmem:[#allocation24_spill] sm:$0xff]  ;;  %v5277_v5 = vld [vmem:[#allocation25_spill] sm:$0xff]  ;;  %v3150_v34 = vrot.slane %v5269_v1, %v3096_v12  ;;  %s2347_s11 = sshll.u32 (%p321_p8), %s5404_s23, 4  ;;  %s5108_s27 = scalar_lea.hbm (%p321_p8), %s5178_s3, %s2487_s25  ;;  %s5110_s11 = int_to_ptr.vmem [resolvable:$true] %s2347_s11 }
  0x83   : >> { %5272 = vst [vmem:[#allocation31_spill] sm:$0xff] %v3112_v20  ;;  %v3125_v25 = vrot.slane %v5274_v3, %v359_v11  ;;  %v3128_v26 = vrot.slane %v5275_v4, %v359_v11  ;;  %v3131_v27 = vrot.slane %v5277_v5, %v359_v11  ;;  %v3134_v28 = vld [vmem:[%s3098_s8 + $0x68] sm:$0xff]  ;;  %v3137_v29 = vld [vmem:[%s3098_s8 + $0x78] sm:$0xff]  ;;  %v3140_v30 = vld [vmem:[%s3098_s8 + $0x80] sm:$0xff]  ;;  %s5405_s5 = sand.u32 (%p321_p8), 1, %s2742_s13   ;;  %s2650_s29 = scalar_lea.vmem (%p321_p8), %s5110_s11, 4096 }
  0x84   : >> { %v361_v31 = vmul.f32 %v360_v19, %v329_v13  ;;  %v5279_v6 = vld [vmem:[#allocation26_spill] sm:$0xff]  ;;  %v5281_v7 = vld [vmem:[#allocation27_spill] sm:$0xff]  ;;  %5283 = vst [vmem:[#allocation36_spill] sm:$0xff] %v3150_v34  ;;  %v3156_v36 = vld [vmem:[%s3098_s8 + $0x98] sm:$0xff]  ;;  %v362_v38 = vmul.f32 %v360_v19, %v330_v14  ;;  %v363_v39 = vmul.f32 %v360_v19, %v331_v15  ;;  %v364_v40 = vmul.f32 %v360_v19, %v332_v16  ;;  %s5114_s19 = scalar_lea.sflag (%p321_p8), [#allocation6], %s5405_s5  ;;  %p2651_p2 = scmp.ne.s32.totalorder (%p321_p8), %s5110_s11, %s2650_s29 }
  0x85   : >> { %5276 = vst [vmem:[#allocation32_spill] sm:$0xff] %v3128_v26  ;;  %5278 = vst [vmem:[#allocation33_spill] sm:$0xff] %v3131_v27  ;;  %v3143_v32 = vrot.slane %v5279_v6, %v359_v11  ;;  %v3146_v33 = vrot.slane %v5281_v7, %v359_v11  ;;  %v3153_v35 = vld [vmem:[%s3098_s8 + $0x90] sm:$0xff]  ;;  %v3159_v37 = vld [vmem:[%s3098_s8 + $0xa8] sm:$0xff]  ;;  %v365_v41 = vmul.f32 %v360_v19, %v3105_v17  ;;  %p5406_p4 = scmp.ne.s32.totalorder (%p321_p8), %s5256_s9, 0  ;;  %s2798_s18 = smov (%p321_p8), [#allocation7]  }
  0x86   : >> { %v3163_v42 = vld [vmem:[%s3098_s8 + $0xb0] sm:$0xff]  ;;  %v366_v43 = vmul.f32 %v360_v19, %v3108_v18  ;;  %v367_v44 = vmul.f32 %v360_v19, %v3115_v21  ;;  %v368_v45 = vmul.f32 %v360_v19, %v3118_v22  ;;  %v369_v46 = vmul.f32 %v360_v19, %v3121_v23  ;;  %v3177_v55 = vld [vmem:[%s3098_s8 + $0xc0] sm:$0xff]  ;;  %v3180_v56 = vld [vmem:[%s3098_s8 + $0xc8] sm:$0xff]  ;;  %s2654_s6 = sshll.u32 (%p321_p8), %s2798_s18, 4  ;;  %s2655_s6 = int_to_ptr.vmem [resolvable:$false] %s2654_s6 }
  0x87   : >> { %5280 = vst [vmem:[#allocation34_spill] sm:$0xff] %v3143_v32  ;;  %5282 = vst [vmem:[#allocation35_spill] sm:$0xff] %v3146_v33  ;;  %v370_v47 = vmul.f32 %v360_v19, %v3134_v28  ;;  %v371_v48 = vmul.f32 %v360_v19, %v3137_v29  ;;  %v372_v49 = vmul.f32 %v360_v19, %v3140_v30  ;;  %p2652_p0 = pnand (%p321_p8), %p2651_p2, %p5406_p4  ;;  %s2656_s26 = scalar_lea.vmem (%p321_p8), %s2655_s6, 8192 }
  0x88   : >> { %v373_v50 = vmul.f32 %v360_v19, %v3153_v35  ;;  %v374_v51 = vmul.f32 %v360_v19, %v3156_v36  ;;  %v375_v52 = vmul.f32 %v360_v19, %v3159_v37  ;;  %v376_v53 = vmul.f32 %v360_v19, %v3163_v42  ;;  %p2657_p3 = scmp.lt.s32.totalorder (%p321_p8), %s5110_s11, %s2655_s6  ;;  %p2658_p6 = scmp.lt.s32.totalorder (%p321_p8), %s2656_s26, %s2650_s29 }
  0x89   : >> { %v397_v54 = vmul.f32 %v396_v24, %v331_v15  ;;  %v398_v57 = vmul.f32 %v396_v24, %v332_v16  ;;  %v399_v58 = vmul.f32 %v396_v24, %v3105_v17  ;;  %v400_v59 = vmul.f32 %v396_v24, %v3108_v18  ;;  %p2653_p1 = pneg (%p321_p8), %p2652_p0 }
  0x8a   : >> { %v401_v60 = vmul.f32 %v396_v24, %v3115_v21  ;;  %v402_v61 = vmul.f32 %v396_v24, %v3118_v22  ;;  %v403_v62 = vmul.f32 %v396_v24, %v3121_v23  ;;  %v404_v63 = vmul.f32 %v396_v24, %v3134_v28  ;;  %p2659_p9 = por (%p321_p8), %p2658_p6, %p2657_p3 }
  0x8b   : >> { %v405_v0 = vmul.f32 %v396_v24, %v3137_v29  ;;  %v406_v9 = vmul.f32 %v396_v24, %v3140_v30  ;;  %v407_v11 = vmul.f32 %v396_v24, %v3153_v35  ;;  %v408_v13 = vmul.f32 %v396_v24, %v3156_v36 }
  0x8c   : >> { %v409_v14 = vmul.f32 %v396_v24, %v3159_v37  ;;  %v410_v15 = vmul.f32 %v396_v24, %v3163_v42  ;;  %v411_v16 = vmul.f32 %v396_v24, %v3177_v55  ;;  %v412_v19 = vmul.f32 %v396_v24, %v3180_v56  ;;  %p2660_p10 = pnand (%p321_p8), %p2659_p9, %p2653_p1 }
  0x8d   : >> { %v413_v8 = vadd.f32 %v397_v54, %v361_v31  ;;  %v414_v10 = vadd.f32 %v398_v57, %v362_v38  ;;  %v415_v1 = vadd.f32 %v399_v58, %v363_v39  ;;  %v416_v20 = vadd.f32 %v400_v59, %v364_v40  ;;  %v3199_v31 = vld [vmem:[%s3098_s8 + $0xd8] sm:$0xff]  ;;  %v3202_v38 = vld [vmem:[%s3098_s8 + $0xe0] sm:$0xff] }
  0x8e   : >> { %v417_v7 = vadd.f32 %v401_v60, %v365_v41  ;;  %v418_v6 = vadd.f32 %v402_v61, %v366_v43  ;;  %v419_v5 = vadd.f32 %v403_v62, %v367_v44  ;;  %v420_v4 = vadd.f32 %v404_v63, %v368_v45 }
  0x8f   : >> { %v421_v3 = vadd.f32 %v405_v0, %v369_v46  ;;  %v422_v2 = vadd.f32 %v406_v9, %v370_v47  ;;  %v423_v12 = vadd.f32 %v407_v11, %v371_v48  ;;  %v424_v34 = vadd.f32 %v408_v13, %v372_v49 }
  0x90   : >> { %v425_v33 = vadd.f32 %v409_v14, %v373_v50  ;;  %v426_v32 = vadd.f32 %v410_v15, %v374_v51  ;;  %v427_v27 = vadd.f32 %v411_v16, %v375_v52  ;;  %v428_v26 = vadd.f32 %v412_v19, %v376_v53 }
  0x91   : >> { %v433_v24 = vmul.f32 %v3125_v25, %v3105_v17  ;;  %v434_v39 = vmul.f32 %v3125_v25, %v3108_v18  ;;  %v435_v40 = vmul.f32 %v3125_v25, %v3115_v21  ;;  %v436_v41 = vmul.f32 %v3125_v25, %v3118_v22 }
  0x92   : >> { %v437_v43 = vmul.f32 %v3125_v25, %v3121_v23  ;;  %v438_v44 = vmul.f32 %v3125_v25, %v3134_v28  ;;  %v439_v17 = vmul.f32 %v3125_v25, %v3137_v29  ;;  %v440_v45 = vmul.f32 %v3125_v25, %v3140_v30 }
  0x93   : >> { %v441_v18 = vmul.f32 %v3125_v25, %v3153_v35  ;;  %v442_v46 = vmul.f32 %v3125_v25, %v3156_v36  ;;  %v443_v47 = vmul.f32 %v3125_v25, %v3159_v37  ;;  %v444_v48 = vmul.f32 %v3125_v25, %v3163_v42 }
  0x94   : >> { %v445_v49 = vmul.f32 %v3125_v25, %v3177_v55  ;;  %v446_v50 = vmul.f32 %v3125_v25, %v3180_v56  ;;  %v447_v51 = vmul.f32 %v3125_v25, %v3199_v31  ;;  %v448_v52 = vmul.f32 %v3125_v25, %v3202_v38  ;;  %v5284_v25 = vld [vmem:[#allocation32_spill] sm:$0xff] }
  0x95   : >> { %v449_v53 = vadd.f32 %v433_v24, %v413_v8  ;;  %v450_v54 = vadd.f32 %v434_v39, %v414_v10  ;;  %v451_v57 = vadd.f32 %v435_v40, %v415_v1  ;;  %v452_v58 = vadd.f32 %v436_v41, %v416_v20  ;;  %v3237_v10 = vld [vmem:[%s3098_s8 + $0xf0] sm:$0xff]  ;;  %v3240_v1 = vld [vmem:[%s3098_s8 + $0xf8] sm:$0xff] }
  0x96   : >> { %v453_v59 = vadd.f32 %v437_v43, %v417_v7  ;;  %v454_v60 = vadd.f32 %v438_v44, %v418_v6  ;;  %v455_v61 = vadd.f32 %v439_v17, %v419_v5  ;;  %v456_v62 = vadd.f32 %v440_v45, %v420_v4 }
  0x97   : >> { %v457_v63 = vadd.f32 %v441_v18, %v421_v3  ;;  %v458_v0 = vadd.f32 %v442_v46, %v422_v2  ;;  %v459_v9 = vadd.f32 %v443_v47, %v423_v12  ;;  %v460_v11 = vadd.f32 %v444_v48, %v424_v34 }
  0x98   : >> { %v461_v13 = vadd.f32 %v445_v49, %v425_v33  ;;  %v462_v14 = vadd.f32 %v446_v50, %v426_v32  ;;  %v463_v15 = vadd.f32 %v447_v51, %v427_v27  ;;  %v464_v16 = vadd.f32 %v448_v52, %v428_v26  ;;  %v5285_v52 = vld [vmem:[#allocation33_spill] sm:$0xff] }
  0x99   : >> { %v469_v8 = vmul.f32 %v5284_v25, %v3115_v21  ;;  %v470_v6 = vmul.f32 %v5284_v25, %v3118_v22  ;;  %v471_v3 = vmul.f32 %v5284_v25, %v3121_v23  ;;  %v472_v2 = vmul.f32 %v5284_v25, %v3134_v28 }
  0x9a   : >> { %v473_v4 = vmul.f32 %v5284_v25, %v3137_v29  ;;  %v474_v5 = vmul.f32 %v5284_v25, %v3140_v30  ;;  %v475_v7 = vmul.f32 %v5284_v25, %v3153_v35  ;;  %v476_v12 = vmul.f32 %v5284_v25, %v3156_v36 }
  0x9b   : >> { %v477_v20 = vmul.f32 %v5284_v25, %v3159_v37  ;;  %v478_v21 = vmul.f32 %v5284_v25, %v3163_v42  ;;  %v479_v22 = vmul.f32 %v5284_v25, %v3177_v55  ;;  %v480_v26 = vmul.f32 %v5284_v25, %v3180_v56 }
  0x9c   : >> { %v481_v27 = vmul.f32 %v5284_v25, %v3199_v31  ;;  %v482_v32 = vmul.f32 %v5284_v25, %v3202_v38  ;;  %v483_v33 = vmul.f32 %v5284_v25, %v3237_v10  ;;  %v484_v34 = vmul.f32 %v5284_v25, %v3240_v1 }
  0x9d   : >> { %v485_v19 = vadd.f32 %v469_v8, %v449_v53  ;;  %v486_v24 = vadd.f32 %v470_v6, %v450_v54  ;;  %v487_v39 = vadd.f32 %v471_v3, %v451_v57  ;;  %v488_v40 = vadd.f32 %v472_v2, %v452_v58  ;;  %v3275_v54 = vld [vmem:[%s3098_s8 + $0x108] sm:$0xff]  ;;  %v3278_v57 = vld [vmem:[%s3098_s8 + $0x110] sm:$0xff] }
  0x9e   : >> { %v489_v41 = vadd.f32 %v473_v4, %v453_v59  ;;  %v490_v43 = vadd.f32 %v474_v5, %v454_v60  ;;  %v491_v44 = vadd.f32 %v475_v7, %v455_v61  ;;  %v492_v17 = vadd.f32 %v476_v12, %v456_v62 }
  0x9f   : >> { %v493_v45 = vadd.f32 %v477_v20, %v457_v63  ;;  %v494_v18 = vadd.f32 %v478_v21, %v458_v0  ;;  %v495_v46 = vadd.f32 %v479_v22, %v459_v9  ;;  %v496_v47 = vadd.f32 %v480_v26, %v460_v11 }
  0xa0   : >> { %v497_v48 = vadd.f32 %v481_v27, %v461_v13  ;;  %v498_v49 = vadd.f32 %v482_v32, %v462_v14  ;;  %v499_v50 = vadd.f32 %v483_v33, %v463_v15  ;;  %v500_v51 = vadd.f32 %v484_v34, %v464_v16  ;;  %v5286_v34 = vld [vmem:[#allocation34_spill] sm:$0xff] }
  0xa1   : >> { %v505_v53 = vmul.f32 %v5285_v52, %v3121_v23  ;;  %v506_v58 = vmul.f32 %v5285_v52, %v3134_v28  ;;  %v507_v59 = vmul.f32 %v5285_v52, %v3137_v29  ;;  %v508_v60 = vmul.f32 %v5285_v52, %v3140_v30 }
  0xa2   : >> { %v509_v61 = vmul.f32 %v5285_v52, %v3153_v35  ;;  %v510_v62 = vmul.f32 %v5285_v52, %v3156_v36  ;;  %v511_v23 = vmul.f32 %v5285_v52, %v3159_v37  ;;  %v512_v63 = vmul.f32 %v5285_v52, %v3163_v42 }
  0xa3   : >> { %v513_v28 = vmul.f32 %v5285_v52, %v3177_v55  ;;  %v514_v0 = vmul.f32 %v5285_v52, %v3180_v56  ;;  %v515_v9 = vmul.f32 %v5285_v52, %v3199_v31  ;;  %v516_v11 = vmul.f32 %v5285_v52, %v3202_v38 }
  0xa4   : >> { %v517_v13 = vmul.f32 %v5285_v52, %v3237_v10  ;;  %v518_v14 = vmul.f32 %v5285_v52, %v3240_v1  ;;  %v519_v15 = vmul.f32 %v5285_v52, %v3275_v54  ;;  %v520_v16 = vmul.f32 %v5285_v52, %v3278_v57  ;;  %v354_v52 = vld [vmem:[%s3098_s8 + $0x128] sm:$0xff] }
  0xa5   : >> { %v521_v25 = vadd.f32 %v505_v53, %v485_v19  ;;  %v522_v8 = vadd.f32 %v506_v58, %v486_v24  ;;  %v523_v6 = vadd.f32 %v507_v59, %v487_v39  ;;  %v524_v3 = vadd.f32 %v508_v60, %v488_v40  ;;  %v353_v24 = vld [vmem:[%s3098_s8 + $0x120] sm:$0xff] }
  0xa6   : >> { %v525_v2 = vadd.f32 %v509_v61, %v489_v41  ;;  %v526_v4 = vadd.f32 %v510_v62, %v490_v43  ;;  %v527_v5 = vadd.f32 %v511_v23, %v491_v44  ;;  %v528_v7 = vadd.f32 %v512_v63, %v492_v17 }
  0xa7   : >> { %v529_v12 = vadd.f32 %v513_v28, %v493_v45  ;;  %v530_v20 = vadd.f32 %v514_v0, %v494_v18  ;;  %v531_v21 = vadd.f32 %v515_v9, %v495_v46  ;;  %v532_v22 = vadd.f32 %v516_v11, %v496_v47 }
  0xa8   : >> { %v533_v26 = vadd.f32 %v517_v13, %v497_v48  ;;  %v534_v27 = vadd.f32 %v518_v14, %v498_v49  ;;  %v535_v32 = vadd.f32 %v519_v15, %v499_v50  ;;  %v536_v33 = vadd.f32 %v520_v16, %v500_v51  ;;  %v5287_v16 = vld [vmem:[#allocation35_spill] sm:$0xff] }
  0xa9   : >> { %v541_v19 = vmul.f32 %v5286_v34, %v3137_v29  ;;  %v542_v39 = vmul.f32 %v5286_v34, %v3140_v30  ;;  %v543_v40 = vmul.f32 %v5286_v34, %v3153_v35  ;;  %v544_v41 = vmul.f32 %v5286_v34, %v3156_v36 }
  0xaa   : >> { %v545_v43 = vmul.f32 %v5286_v34, %v3159_v37  ;;  %v546_v44 = vmul.f32 %v5286_v34, %v3163_v42  ;;  %v547_v29 = vmul.f32 %v5286_v34, %v3177_v55  ;;  %v548_v17 = vmul.f32 %v5286_v34, %v3180_v56 }
  0xab   : >> { %v549_v30 = vmul.f32 %v5286_v34, %v3199_v31  ;;  %v550_v45 = vmul.f32 %v5286_v34, %v3202_v38  ;;  %v551_v18 = vmul.f32 %v5286_v34, %v3237_v10  ;;  %v552_v46 = vmul.f32 %v5286_v34, %v3240_v1 }
  0xac   : >> { %v553_v47 = vmul.f32 %v5286_v34, %v3275_v54  ;;  %v554_v48 = vmul.f32 %v5286_v34, %v3278_v57  ;;  %v555_v49 = vmul.f32 %v5286_v34, %v353_v24  ;;  %v556_v50 = vmul.f32 %v5286_v34, %v354_v52  ;;  %v356_v34 = vld [vmem:[%s3098_s8 + $0x140] sm:$0xff] }
  0xad   : >> { %v557_v51 = vadd.f32 %v541_v19, %v521_v25  ;;  %v558_v53 = vadd.f32 %v542_v39, %v522_v8  ;;  %v559_v58 = vadd.f32 %v543_v40, %v523_v6  ;;  %v560_v59 = vadd.f32 %v544_v41, %v524_v3  ;;  %v355_v8 = vld [vmem:[%s3098_s8 + $0x138] sm:$0xff]  ;;  %v3385_v40 = vld [vmem:[%s3098_s8 + $0x49] sm:$0xff] }
  0xae   : >> { %v561_v60 = vadd.f32 %v545_v43, %v525_v2  ;;  %v562_v61 = vadd.f32 %v546_v44, %v526_v4  ;;  %v563_v62 = vadd.f32 %v547_v29, %v527_v5  ;;  %v564_v23 = vadd.f32 %v548_v17, %v528_v7  ;;  %v3382_v39 = vld [vmem:[%s3098_s8 + $0x39] sm:$0xff]  ;;  %v3388_v17 = vld [vmem:[%s3098_s8 + $0x51] sm:$0xff] }
  0xaf   : >> { %v565_v63 = vadd.f32 %v549_v30, %v529_v12  ;;  %v566_v28 = vadd.f32 %v550_v45, %v530_v20  ;;  %v567_v0 = vadd.f32 %v551_v18, %v531_v21  ;;  %v568_v9 = vadd.f32 %v552_v46, %v532_v22  ;;  %v609_v20 = vld [vmem:[%s3098_s8 + $0x1] sm:$0xff]  ;;  %v3394_v45 = vld [vmem:[%s3098_s8 + $0x69] sm:$0xff] }
  0xb0   : >> { %v569_v11 = vadd.f32 %v553_v47, %v533_v26  ;;  %v570_v13 = vadd.f32 %v554_v48, %v534_v27  ;;  %v571_v14 = vadd.f32 %v555_v49, %v535_v32  ;;  %v572_v15 = vadd.f32 %v556_v50, %v536_v33  ;;  %v611_v26 = vld [vmem:[%s3098_s8 + $0x19] sm:$0xff]  ;;  %v3376_v27 = vld [vmem:[%s3098_s8 + $0x21] sm:$0xff]  ;;  %v3403_v50 = vld [vmem:[%s3098_s8 + $0x91] sm:$0xff] }
  0xb1   : >> { %v577_v25 = vmul.f32 %v5287_v16, %v3153_v35  ;;  %v578_v6 = vmul.f32 %v5287_v16, %v3156_v36  ;;  %v579_v3 = vmul.f32 %v5287_v16, %v3159_v37  ;;  %v580_v2 = vmul.f32 %v5287_v16, %v3163_v42  ;;  %v3391_v30 = vld [vmem:[%s3098_s8 + $0x61] sm:$0xff]  ;;  %v3397_v48 = vld [vmem:[%s3098_s8 + $0x79] sm:$0xff] }
  0xb2   : >> { %v581_v4 = vmul.f32 %v5287_v16, %v3177_v55  ;;  %v582_v5 = vmul.f32 %v5287_v16, %v3180_v56  ;;  %v583_v35 = vmul.f32 %v5287_v16, %v3199_v31  ;;  %v584_v36 = vmul.f32 %v5287_v16, %v3202_v38  ;;  %v3400_v49 = vld [vmem:[%s3098_s8 + $0x81] sm:$0xff] }
  0xb3   : >> { %v585_v37 = vmul.f32 %v5287_v16, %v3237_v10  ;;  %v586_v42 = vmul.f32 %v5287_v16, %v3240_v1  ;;  %v587_v55 = vmul.f32 %v5287_v16, %v3275_v54  ;;  %v588_v56 = vmul.f32 %v5287_v16, %v3278_v57  ;;  %v610_v57 = vld [vmem:[%s3098_s8 + $0x9] sm:$0xff] }
  0xb4   : >> { %v589_v31 = vmul.f32 %v5287_v16, %v353_v24  ;;  %v590_v7 = vmul.f32 %v5287_v16, %v354_v52  ;;  %v591_v38 = vmul.f32 %v5287_v16, %v355_v8  ;;  %v592_v10 = vmul.f32 %v5287_v16, %v356_v34  ;;  %v3379_v52 = vld [vmem:[%s3098_s8 + $0x31] sm:$0xff] }
  0xb5   : >> { %v593_v12 = vadd.f32 %v577_v25, %v557_v51  ;;  %v594_v1 = vadd.f32 %v578_v6, %v558_v53  ;;  %v595_v21 = vadd.f32 %v579_v3, %v559_v58  ;;  %v596_v22 = vadd.f32 %v580_v2, %v560_v59  ;;  %v5288_v51 = vld [vmem:[#allocation36_spill] sm:$0xff]  ;;  %v3410_v59 = vld [vmem:[%s3098_s8 + $0xa9] sm:$0xff] }
  0xb6   : >> { %v597_v54 = vadd.f32 %v581_v4, %v561_v60  ;;  %v598_v32 = vadd.f32 %v582_v5, %v562_v61  ;;  %v599_v33 = vadd.f32 %v583_v35, %v563_v62  ;;  %v600_v19 = vadd.f32 %v584_v36, %v564_v23  ;;  %v3407_v58 = vld [vmem:[%s3098_s8 + $0x99] sm:$0xff]  ;;  %v3413_v60 = vld [vmem:[%s3098_s8 + $0xb1] sm:$0xff] }
  0xb7   : >> { %v601_v24 = vadd.f32 %v585_v37, %v565_v63  ;;  %v602_v41 = vadd.f32 %v586_v42, %v566_v28  ;;  %v603_v43 = vadd.f32 %v587_v55, %v567_v0  ;;  %v604_v44 = vadd.f32 %v588_v56, %v568_v9 }
  0xb8   : >> { %v605_v29 = vadd.f32 %v589_v31, %v569_v11  ;;  %v606_v18 = vadd.f32 %v590_v7, %v570_v13  ;;  %v607_v46 = vadd.f32 %v591_v38, %v571_v14  ;;  %v608_v47 = vadd.f32 %v592_v10, %v572_v15 }
  0xb9   : >> { %v641_v53 = vmul.f32 %v5288_v51, %v609_v20  ;;  %v642_v61 = vmul.f32 %v5288_v51, %v610_v57  ;;  %v643_v62 = vmul.f32 %v5288_v51, %v611_v26  ;;  %v644_v23 = vmul.f32 %v5288_v51, %v3376_v27  ;;  %v5289_v57 = vld [vmem:[#allocation30_spill] sm:$0xff] }
  0xba   : >> { %v645_v63 = vmul.f32 %v5288_v51, %v3379_v52  ;;  %v646_v28 = vmul.f32 %v5288_v51, %v3382_v39  ;;  %v647_v0 = vmul.f32 %v5288_v51, %v3385_v40  ;;  %v648_v9 = vmul.f32 %v5288_v51, %v3388_v17 }
  0xbb   : >> { %v649_v11 = vmul.f32 %v5288_v51, %v3391_v30  ;;  %v650_v13 = vmul.f32 %v5288_v51, %v3394_v45  ;;  %v651_v14 = vmul.f32 %v5288_v51, %v3397_v48  ;;  %v652_v15 = vmul.f32 %v5288_v51, %v3400_v49 }
  0xbc   : >> { %v653_v16 = vmul.f32 %v5288_v51, %v3403_v50  ;;  %v654_v25 = vmul.f32 %v5288_v51, %v3407_v58  ;;  %v655_v8 = vmul.f32 %v5288_v51, %v3410_v59  ;;  %v656_v34 = vmul.f32 %v5288_v51, %v3413_v60  ;;  %v5290_v51 = vld [vmem:[#allocation22_spill] sm:$0xff] }
  0xbd   : >> { %v657_v6 = vadd.f32 %v641_v53, %v593_v12  ;;  %v658_v3 = vadd.f32 %v642_v61, %v594_v1  ;;  %v659_v2 = vadd.f32 %v643_v62, %v595_v21  ;;  %v660_v4 = vadd.f32 %v644_v23, %v596_v22  ;;  %v5291_v1 = vld [vmem:[#allocation23_spill] sm:$0xff]  ;;  %v5292_v22 = vld [vmem:[#allocation24_spill] sm:$0xff]  ;;  %v3472_v53 = vld [vmem:[%s3098_s8 + $0xc1] sm:$0xff] }
  0xbe   : >> { %v661_v5 = vadd.f32 %v645_v63, %v597_v54  ;;  %v662_v35 = vadd.f32 %v646_v28, %v598_v32  ;;  %v663_v36 = vadd.f32 %v647_v0, %v599_v33  ;;  %v664_v37 = vadd.f32 %v648_v9, %v600_v19  ;;  %v5294_v32 = vld [vmem:[#allocation25_spill] sm:$0xff]  ;;  %v5296_v19 = vld [vmem:[#allocation26_spill] sm:$0xff] }
  0xbf   : >> { %v665_v42 = vadd.f32 %v649_v11, %v601_v24  ;;  %v666_v55 = vadd.f32 %v650_v13, %v602_v41  ;;  %v667_v56 = vadd.f32 %v651_v14, %v603_v43  ;;  %v668_v31 = vadd.f32 %v652_v15, %v604_v44  ;;  %v5298_v43 = vld [vmem:[#allocation27_spill] sm:$0xff] }
  0xc0   : >> { %v669_v7 = vadd.f32 %v653_v16, %v605_v29  ;;  %v670_v38 = vadd.f32 %v654_v25, %v606_v18  ;;  %v671_v10 = vadd.f32 %v655_v8, %v607_v46  ;;  %v672_v20 = vadd.f32 %v656_v34, %v608_v47  ;;  %v5300_v29 = vld [vmem:[#allocation31_spill] sm:$0xff]  ;;  %v5301_v18 = vld [vmem:[#allocation21_spill] sm:$0xff] }
  0xc1   : >> { %v676_v12 = vrot.slane %v5290_v51, %v5289_v57  ;;  %v712_v21 = vrot.slane %v5291_v1, %v5289_v57  ;;  %v3449_v54 = vrot.slane %v5292_v22, %v5289_v57  ;;  %v3453_v33 = vrot.slane %v5294_v32, %v5289_v57  ;;  %v3475_v61 = vld [vmem:[%s3098_s8 + $0xc9] sm:$0xff] }
  0xc2   : >> { %v3457_v24 = vrot.slane %v5296_v19, %v5289_v57  ;;  %v3461_v44 = vrot.slane %v5298_v43, %v5289_v57  ;;  %v3465_v46 = vrot.slane %v5301_v18, %v5300_v29  ;;  %v3469_v47 = vrot.slane %v5290_v51, %v5300_v29 }
  0xc3   : >> { %5293 = vst [vmem:[#allocation32_spill] sm:$0xff] %v3449_v54  ;;  %5295 = vst [vmem:[#allocation33_spill] sm:$0xff] %v3453_v33  ;;  %v677_v41 = vmul.f32 %v676_v12, %v611_v26  ;;  %v678_v62 = vmul.f32 %v676_v12, %v3376_v27  ;;  %v679_v26 = vmul.f32 %v676_v12, %v3379_v52 }
  0xc4   : >> { %5297 = vst [vmem:[#allocation34_spill] sm:$0xff] %v3457_v24  ;;  %5299 = vst [vmem:[#allocation35_spill] sm:$0xff] %v3461_v44  ;;  %v680_v23 = vmul.f32 %v676_v12, %v3382_v39  ;;  %v681_v63 = vmul.f32 %v676_v12, %v3385_v40  ;;  %v682_v28 = vmul.f32 %v676_v12, %v3388_v17 }
  0xc5   : >> { %5302 = vst [vmem:[#allocation36_spill] sm:$0xff] %v3465_v46  ;;  %5303 = vst [vmem:[#allocation30_spill] sm:$0xff] %v3469_v47  ;;  %v683_v0 = vmul.f32 %v676_v12, %v3391_v30  ;;  %v684_v9 = vmul.f32 %v676_v12, %v3394_v45  ;;  %v685_v11 = vmul.f32 %v676_v12, %v3397_v48 }
  0xc6   : >> { %v686_v13 = vmul.f32 %v676_v12, %v3400_v49  ;;  %v687_v14 = vmul.f32 %v676_v12, %v3403_v50  ;;  %v688_v27 = vmul.f32 %v676_v12, %v3407_v58  ;;  %v689_v15 = vmul.f32 %v676_v12, %v3410_v59 }
  0xc7   : >> { %v690_v16 = vmul.f32 %v676_v12, %v3413_v60  ;;  %v691_v25 = vmul.f32 %v676_v12, %v3472_v53  ;;  %v692_v8 = vmul.f32 %v676_v12, %v3475_v61  ;;  %v693_v34 = vadd.f32 %v677_v41, %v657_v6  ;;  %v3494_v6 = vld [vmem:[%s3098_s8 + $0xd9] sm:$0xff] }
  0xc8   : >> { %v694_v57 = vadd.f32 %v678_v62, %v658_v3  ;;  %v695_v51 = vadd.f32 %v679_v26, %v659_v2  ;;  %v696_v18 = vadd.f32 %v680_v23, %v660_v4  ;;  %v697_v43 = vadd.f32 %v681_v63, %v661_v5  ;;  %v3497_v3 = vld [vmem:[%s3098_s8 + $0xe1] sm:$0xff] }
  0xc9   : >> { %v698_v19 = vadd.f32 %v682_v28, %v662_v35  ;;  %v699_v32 = vadd.f32 %v683_v0, %v663_v36  ;;  %v700_v22 = vadd.f32 %v684_v9, %v664_v37  ;;  %v701_v1 = vadd.f32 %v685_v11, %v665_v42 }
  0xca   : >> { %v702_v29 = vadd.f32 %v686_v13, %v666_v55  ;;  %v703_v47 = vadd.f32 %v687_v14, %v667_v56  ;;  %v704_v46 = vadd.f32 %v688_v27, %v668_v31  ;;  %v705_v44 = vadd.f32 %v689_v15, %v669_v7 }
  0xcb   : >> { %v706_v24 = vadd.f32 %v690_v16, %v670_v38  ;;  %v707_v33 = vadd.f32 %v691_v25, %v671_v10  ;;  %v708_v54 = vadd.f32 %v692_v8, %v672_v20  ;;  %v713_v12 = vmul.f32 %v712_v21, %v3379_v52 }
  0xcc   : >> { %v714_v2 = vmul.f32 %v712_v21, %v3382_v39  ;;  %v715_v4 = vmul.f32 %v712_v21, %v3385_v40  ;;  %v716_v5 = vmul.f32 %v712_v21, %v3388_v17  ;;  %v717_v35 = vmul.f32 %v712_v21, %v3391_v30 }
  0xcd   : >> { %v718_v36 = vmul.f32 %v712_v21, %v3394_v45  ;;  %v719_v37 = vmul.f32 %v712_v21, %v3397_v48  ;;  %v720_v42 = vmul.f32 %v712_v21, %v3400_v49  ;;  %v721_v52 = vmul.f32 %v712_v21, %v3403_v50 }
  0xce   : >> { %v722_v55 = vmul.f32 %v712_v21, %v3407_v58  ;;  %v723_v56 = vmul.f32 %v712_v21, %v3410_v59  ;;  %v724_v39 = vmul.f32 %v712_v21, %v3413_v60  ;;  %v725_v31 = vmul.f32 %v712_v21, %v3472_v53 }
  0xcf   : >> { %v726_v7 = vmul.f32 %v712_v21, %v3475_v61  ;;  %v727_v38 = vmul.f32 %v712_v21, %v3494_v6  ;;  %v728_v10 = vmul.f32 %v712_v21, %v3497_v3  ;;  %v729_v20 = vadd.f32 %v713_v12, %v693_v34  ;;  %v5304_v21 = vld [vmem:[#allocation32_spill] sm:$0xff] }
  0xd0   : >> { %v730_v41 = vadd.f32 %v714_v2, %v694_v57  ;;  %v731_v62 = vadd.f32 %v715_v4, %v695_v51  ;;  %v732_v26 = vadd.f32 %v716_v5, %v696_v18  ;;  %v733_v23 = vadd.f32 %v717_v35, %v697_v43  ;;  %v3517_v34 = vld [vmem:[%s3098_s8 + $0xf1] sm:$0xff]  ;;  %v3520_v51 = vld [vmem:[%s3098_s8 + $0xf9] sm:$0xff] }
  0xd1   : >> { %v734_v63 = vadd.f32 %v718_v36, %v698_v19  ;;  %v735_v28 = vadd.f32 %v719_v37, %v699_v32  ;;  %v736_v0 = vadd.f32 %v720_v42, %v700_v22  ;;  %v737_v9 = vadd.f32 %v721_v52, %v701_v1 }
  0xd2   : >> { %v738_v11 = vadd.f32 %v722_v55, %v702_v29  ;;  %v739_v13 = vadd.f32 %v723_v56, %v703_v47  ;;  %v740_v14 = vadd.f32 %v724_v39, %v704_v46  ;;  %v741_v27 = vadd.f32 %v725_v31, %v705_v44 }
  0xd3   : >> { %v742_v15 = vadd.f32 %v726_v7, %v706_v24  ;;  %v743_v16 = vadd.f32 %v727_v38, %v707_v33  ;;  %v744_v25 = vadd.f32 %v728_v10, %v708_v54  ;;  %v749_v8 = vmul.f32 %v5304_v21, %v3385_v40  ;;  %v5305_v10 = vld [vmem:[#allocation33_spill] sm:$0xff] }
  0xd4   : >> { %v750_v19 = vmul.f32 %v5304_v21, %v3388_v17  ;;  %v751_v1 = vmul.f32 %v5304_v21, %v3391_v30  ;;  %v752_v22 = vmul.f32 %v5304_v21, %v3394_v45  ;;  %v753_v32 = vmul.f32 %v5304_v21, %v3397_v48 }
  0xd5   : >> { %v754_v54 = vmul.f32 %v5304_v21, %v3400_v49  ;;  %v755_v40 = vmul.f32 %v5304_v21, %v3403_v50  ;;  %v756_v33 = vmul.f32 %v5304_v21, %v3407_v58  ;;  %v757_v17 = vmul.f32 %v5304_v21, %v3410_v59 }
  0xd6   : >> { %v758_v24 = vmul.f32 %v5304_v21, %v3413_v60  ;;  %v759_v43 = vmul.f32 %v5304_v21, %v3472_v53  ;;  %v760_v44 = vmul.f32 %v5304_v21, %v3475_v61  ;;  %v761_v29 = vmul.f32 %v5304_v21, %v3494_v6 }
  0xd7   : >> { %v762_v18 = vmul.f32 %v5304_v21, %v3497_v3  ;;  %v763_v46 = vmul.f32 %v5304_v21, %v3517_v34  ;;  %v764_v47 = vmul.f32 %v5304_v21, %v3520_v51  ;;  %v765_v57 = vadd.f32 %v749_v8, %v729_v20 }
  0xd8   : >> { %v766_v12 = vadd.f32 %v750_v19, %v730_v41  ;;  %v767_v2 = vadd.f32 %v751_v1, %v731_v62  ;;  %v768_v4 = vadd.f32 %v752_v22, %v732_v26  ;;  %v769_v5 = vadd.f32 %v753_v32, %v733_v23  ;;  %v3555_v41 = vld [vmem:[%s3098_s8 + $0x109] sm:$0xff]  ;;  %v3558_v62 = vld [vmem:[%s3098_s8 + $0x111] sm:$0xff] }
  0xd9   : >> { %v770_v35 = vadd.f32 %v754_v54, %v734_v63  ;;  %v771_v36 = vadd.f32 %v755_v40, %v735_v28  ;;  %v772_v37 = vadd.f32 %v756_v33, %v736_v0  ;;  %v773_v42 = vadd.f32 %v757_v17, %v737_v9 }
  0xda   : >> { %v774_v52 = vadd.f32 %v758_v24, %v738_v11  ;;  %v775_v55 = vadd.f32 %v759_v43, %v739_v13  ;;  %v776_v56 = vadd.f32 %v760_v44, %v740_v14  ;;  %v777_v39 = vadd.f32 %v761_v29, %v741_v27 }
  0xdb   : >> { %v778_v31 = vadd.f32 %v762_v18, %v742_v15  ;;  %v779_v7 = vadd.f32 %v763_v46, %v743_v16  ;;  %v780_v38 = vadd.f32 %v764_v47, %v744_v25  ;;  %v785_v20 = vmul.f32 %v5305_v10, %v3391_v30  ;;  %v5306_v47 = vld [vmem:[#allocation34_spill] sm:$0xff] }
  0xdc   : >> { %v786_v26 = vmul.f32 %v5305_v10, %v3394_v45  ;;  %v787_v23 = vmul.f32 %v5305_v10, %v3397_v48  ;;  %v788_v63 = vmul.f32 %v5305_v10, %v3400_v49  ;;  %v789_v28 = vmul.f32 %v5305_v10, %v3403_v50 }
  0xdd   : >> { %v790_v0 = vmul.f32 %v5305_v10, %v3407_v58  ;;  %v791_v30 = vmul.f32 %v5305_v10, %v3410_v59  ;;  %v792_v9 = vmul.f32 %v5305_v10, %v3413_v60  ;;  %v793_v45 = vmul.f32 %v5305_v10, %v3472_v53 }
  0xde   : >> { %v794_v11 = vmul.f32 %v5305_v10, %v3475_v61  ;;  %v795_v13 = vmul.f32 %v5305_v10, %v3494_v6  ;;  %v796_v14 = vmul.f32 %v5305_v10, %v3497_v3  ;;  %v797_v27 = vmul.f32 %v5305_v10, %v3517_v34 }
  0xdf   : >> { %v798_v15 = vmul.f32 %v5305_v10, %v3520_v51  ;;  %v799_v16 = vmul.f32 %v5305_v10, %v3555_v41  ;;  %v800_v25 = vmul.f32 %v5305_v10, %v3558_v62  ;;  %v801_v21 = vadd.f32 %v785_v20, %v765_v57  ;;  %v634_v10 = vld [vmem:[%s3098_s8 + $0x129] sm:$0xff] }
  0xe0   : >> { %v802_v8 = vadd.f32 %v786_v26, %v766_v12  ;;  %v803_v19 = vadd.f32 %v787_v23, %v767_v2  ;;  %v804_v1 = vadd.f32 %v788_v63, %v768_v4  ;;  %v805_v22 = vadd.f32 %v789_v28, %v769_v5  ;;  %v633_v12 = vld [vmem:[%s3098_s8 + $0x121] sm:$0xff] }
  0xe1   : >> { %v806_v32 = vadd.f32 %v790_v0, %v770_v35  ;;  %v807_v54 = vadd.f32 %v791_v30, %v771_v36  ;;  %v808_v40 = vadd.f32 %v792_v9, %v772_v37  ;;  %v809_v33 = vadd.f32 %v793_v45, %v773_v42 }
  0xe2   : >> { %v810_v17 = vadd.f32 %v794_v11, %v774_v52  ;;  %v811_v24 = vadd.f32 %v795_v13, %v775_v55  ;;  %v812_v43 = vadd.f32 %v796_v14, %v776_v56  ;;  %v813_v44 = vadd.f32 %v797_v27, %v777_v39 }
  0xe3   : >> { %v814_v29 = vadd.f32 %v798_v15, %v778_v31  ;;  %v815_v18 = vadd.f32 %v799_v16, %v779_v7  ;;  %v816_v46 = vadd.f32 %v800_v25, %v780_v38  ;;  %v821_v57 = vmul.f32 %v5306_v47, %v3397_v48  ;;  %v5307_v25 = vld [vmem:[#allocation35_spill] sm:$0xff] }
  0xe4   : >> { %v822_v2 = vmul.f32 %v5306_v47, %v3400_v49  ;;  %v823_v4 = vmul.f32 %v5306_v47, %v3403_v50  ;;  %v824_v5 = vmul.f32 %v5306_v47, %v3407_v58  ;;  %v825_v35 = vmul.f32 %v5306_v47, %v3410_v59 }
  0xe5   : >> { %v826_v36 = vmul.f32 %v5306_v47, %v3413_v60  ;;  %v827_v48 = vmul.f32 %v5306_v47, %v3472_v53  ;;  %v828_v37 = vmul.f32 %v5306_v47, %v3475_v61  ;;  %v829_v49 = vmul.f32 %v5306_v47, %v3494_v6 }
  0xe6   : >> { %v830_v42 = vmul.f32 %v5306_v47, %v3497_v3  ;;  %v831_v52 = vmul.f32 %v5306_v47, %v3517_v34  ;;  %v832_v55 = vmul.f32 %v5306_v47, %v3520_v51  ;;  %v833_v56 = vmul.f32 %v5306_v47, %v3555_v41 }
  0xe7   : >> { %v834_v39 = vmul.f32 %v5306_v47, %v3558_v62  ;;  %v835_v31 = vmul.f32 %v5306_v47, %v633_v12  ;;  %v836_v7 = vmul.f32 %v5306_v47, %v634_v10  ;;  %v837_v38 = vadd.f32 %v821_v57, %v801_v21  ;;  %v636_v47 = vld [vmem:[%s3098_s8 + $0x141] sm:$0xff] }
  0xe8   : >> { %v838_v20 = vadd.f32 %v822_v2, %v802_v8  ;;  %v839_v26 = vadd.f32 %v823_v4, %v803_v19  ;;  %v840_v23 = vadd.f32 %v824_v5, %v804_v1  ;;  %v841_v63 = vadd.f32 %v825_v35, %v805_v22  ;;  %v635_v8 = vld [vmem:[%s3098_s8 + $0x139] sm:$0xff]  ;;  %v3663_v4 = vld [vmem:[%s3098_s8 + $0x4a] sm:$0xff] }
  0xe9   : >> { %v842_v28 = vadd.f32 %v826_v36, %v806_v32  ;;  %v843_v0 = vadd.f32 %v827_v48, %v807_v54  ;;  %v844_v30 = vadd.f32 %v828_v37, %v808_v40  ;;  %v845_v9 = vadd.f32 %v829_v49, %v809_v33  ;;  %v3660_v2 = vld [vmem:[%s3098_s8 + $0x3a] sm:$0xff]  ;;  %v3666_v37 = vld [vmem:[%s3098_s8 + $0x52] sm:$0xff]  ;;  %v3669_v49 = vld [vmem:[%s3098_s8 + $0x62] sm:$0xff] }
  0xea   : >> { %v846_v45 = vadd.f32 %v830_v42, %v810_v17  ;;  %v847_v11 = vadd.f32 %v831_v52, %v811_v24  ;;  %v848_v13 = vadd.f32 %v832_v55, %v812_v43  ;;  %v849_v14 = vadd.f32 %v833_v56, %v813_v44  ;;  %v889_v17 = vld [vmem:[%s3098_s8 + $0x2] sm:$0xff]  ;;  %v891_v44 = vld [vmem:[%s3098_s8 + $0x1a] sm:$0xff]  ;;  %v3672_v42 = vld [vmem:[%s3098_s8 + $0x6a] sm:$0xff] }
  0xeb   : >> { %v850_v27 = vadd.f32 %v834_v39, %v814_v29  ;;  %v851_v15 = vadd.f32 %v835_v31, %v815_v18  ;;  %v852_v16 = vadd.f32 %v836_v7, %v816_v46  ;;  %v857_v21 = vmul.f32 %v5307_v25, %v3403_v50  ;;  %v892_v29 = vld [vmem:[%s3098_s8 + $0x22] sm:$0xff]  ;;  %v3675_v39 = vld [vmem:[%s3098_s8 + $0x7a] sm:$0xff]  ;;  %v3681_v7 = vld [vmem:[%s3098_s8 + $0x92] sm:$0xff] }
  0xec   : >> { %v858_v19 = vmul.f32 %v5307_v25, %v3407_v58  ;;  %v859_v1 = vmul.f32 %v5307_v25, %v3410_v59  ;;  %v860_v22 = vmul.f32 %v5307_v25, %v3413_v60  ;;  %v861_v32 = vmul.f32 %v5307_v25, %v3472_v53  ;;  %v3678_v31 = vld [vmem:[%s3098_s8 + $0x82] sm:$0xff] }
  0xed   : >> { %v862_v54 = vmul.f32 %v5307_v25, %v3475_v61  ;;  %v863_v50 = vmul.f32 %v5307_v25, %v3494_v6  ;;  %v864_v58 = vmul.f32 %v5307_v25, %v3497_v3  ;;  %v865_v59 = vmul.f32 %v5307_v25, %v3517_v34 }
  0xee   : >> { %v866_v60 = vmul.f32 %v5307_v25, %v3520_v51  ;;  %v867_v53 = vmul.f32 %v5307_v25, %v3555_v41  ;;  %v868_v61 = vmul.f32 %v5307_v25, %v3558_v62  ;;  %v869_v6 = vmul.f32 %v5307_v25, %v633_v12  ;;  %v890_v62 = vld [vmem:[%s3098_s8 + $0xa] sm:$0xff] }
  0xef   : >> { %v870_v40 = vmul.f32 %v5307_v25, %v634_v10  ;;  %v871_v3 = vmul.f32 %v5307_v25, %v635_v8  ;;  %v872_v34 = vmul.f32 %v5307_v25, %v636_v47  ;;  %v873_v33 = vadd.f32 %v857_v21, %v837_v38  ;;  %v3657_v10 = vld [vmem:[%s3098_s8 + $0x32] sm:$0xff] }
  0xf0   : >> { %v874_v51 = vadd.f32 %v858_v19, %v838_v20  ;;  %v875_v24 = vadd.f32 %v859_v1, %v839_v26  ;;  %v876_v43 = vadd.f32 %v860_v22, %v840_v23  ;;  %v877_v41 = vadd.f32 %v861_v32, %v841_v63  ;;  %v5308_v38 = vld [vmem:[#allocation36_spill] sm:$0xff]  ;;  %v3688_v23 = vld [vmem:[%s3098_s8 + $0xaa] sm:$0xff] }
  0xf1   : >> { %v878_v18 = vadd.f32 %v862_v54, %v842_v28  ;;  %v879_v46 = vadd.f32 %v863_v50, %v843_v0  ;;  %v880_v57 = vadd.f32 %v864_v58, %v844_v30  ;;  %v881_v12 = vadd.f32 %v865_v59, %v845_v9  ;;  %v3685_v26 = vld [vmem:[%s3098_s8 + $0x9a] sm:$0xff]  ;;  %v3691_v63 = vld [vmem:[%s3098_s8 + $0xb2] sm:$0xff] }
  0xf2   : >> { %v882_v5 = vadd.f32 %v866_v60, %v846_v45  ;;  %v883_v35 = vadd.f32 %v867_v53, %v847_v11  ;;  %v884_v36 = vadd.f32 %v868_v61, %v848_v13  ;;  %v885_v48 = vadd.f32 %v869_v6, %v849_v14 }
  0xf3   : >> { %v886_v52 = vadd.f32 %v870_v40, %v850_v27  ;;  %v887_v55 = vadd.f32 %v871_v3, %v851_v15  ;;  %v888_v56 = vadd.f32 %v872_v34, %v852_v16  ;;  %v921_v20 = vmul.f32 %v5308_v38, %v889_v17 }
  0xf4   : >> { %v922_v28 = vmul.f32 %v5308_v38, %v890_v62  ;;  %v923_v0 = vmul.f32 %v5308_v38, %v891_v44  ;;  %v924_v30 = vmul.f32 %v5308_v38, %v892_v29  ;;  %v925_v9 = vmul.f32 %v5308_v38, %v3657_v10  ;;  %v5309_v62 = vld [vmem:[#allocation30_spill] sm:$0xff] }
  0xf5   : >> { %v926_v45 = vmul.f32 %v5308_v38, %v3660_v2  ;;  %v927_v11 = vmul.f32 %v5308_v38, %v3663_v4  ;;  %v928_v13 = vmul.f32 %v5308_v38, %v3666_v37  ;;  %v929_v14 = vmul.f32 %v5308_v38, %v3669_v49 }
  0xf6   : >> { %v930_v27 = vmul.f32 %v5308_v38, %v3672_v42  ;;  %v931_v15 = vmul.f32 %v5308_v38, %v3675_v39  ;;  %v932_v16 = vmul.f32 %v5308_v38, %v3678_v31  ;;  %v933_v25 = vmul.f32 %v5308_v38, %v3681_v7 }
  0xf7   : >> { %v934_v21 = vmul.f32 %v5308_v38, %v3685_v26  ;;  %v935_v8 = vmul.f32 %v5308_v38, %v3688_v23  ;;  %v936_v47 = vmul.f32 %v5308_v38, %v3691_v63  ;;  %v937_v19 = vadd.f32 %v921_v20, %v873_v33  ;;  %v3722_v33 = vld [vmem:[%s3098_s8 + $0xc2] sm:$0xff] }
  0xf8   : >> { %v938_v1 = vadd.f32 %v922_v28, %v874_v51  ;;  %v939_v22 = vadd.f32 %v923_v0, %v875_v24  ;;  %v940_v32 = vadd.f32 %v924_v30, %v876_v43  ;;  %v941_v54 = vadd.f32 %v925_v9, %v877_v41  ;;  %v3725_v51 = vld [vmem:[%s3098_s8 + $0xca] sm:$0xff] }
  0xf9   : >> { %v942_v50 = vadd.f32 %v926_v45, %v878_v18  ;;  %v943_v58 = vadd.f32 %v927_v11, %v879_v46  ;;  %v944_v59 = vadd.f32 %v928_v13, %v880_v57  ;;  %v945_v60 = vadd.f32 %v929_v14, %v881_v12 }
  0xfa   : >> { %v946_v53 = vadd.f32 %v930_v27, %v882_v5  ;;  %v947_v61 = vadd.f32 %v931_v15, %v883_v35  ;;  %v948_v6 = vadd.f32 %v932_v16, %v884_v36  ;;  %v949_v40 = vadd.f32 %v933_v25, %v885_v48 }
  0xfb   : >> { %v950_v3 = vadd.f32 %v934_v21, %v886_v52  ;;  %v951_v34 = vadd.f32 %v935_v8, %v887_v55  ;;  %v952_v17 = vadd.f32 %v936_v47, %v888_v56  ;;  %v957_v38 = vmul.f32 %v5309_v62, %v891_v44  ;;  %v5310_v47 = vld [vmem:[#allocation31_spill] sm:$0xff] }
  0xfc   : >> { %v958_v24 = vmul.f32 %v5309_v62, %v892_v29  ;;  %v959_v43 = vmul.f32 %v5309_v62, %v3657_v10  ;;  %v960_v41 = vmul.f32 %v5309_v62, %v3660_v2  ;;  %v961_v18 = vmul.f32 %v5309_v62, %v3663_v4 }
  0xfd   : >> { %v962_v46 = vmul.f32 %v5309_v62, %v3666_v37  ;;  %v963_v44 = vmul.f32 %v5309_v62, %v3669_v49  ;;  %v964_v57 = vmul.f32 %v5309_v62, %v3672_v42  ;;  %v965_v29 = vmul.f32 %v5309_v62, %v3675_v39 }
  0xfe   : >> { %v966_v12 = vmul.f32 %v5309_v62, %v3678_v31  ;;  %v967_v5 = vmul.f32 %v5309_v62, %v3681_v7  ;;  %v968_v35 = vmul.f32 %v5309_v62, %v3685_v26  ;;  %v969_v36 = vmul.f32 %v5309_v62, %v3688_v23 }
  0xff   : >> { %v970_v48 = vmul.f32 %v5309_v62, %v3691_v63  ;;  %v971_v52 = vmul.f32 %v5309_v62, %v3722_v33  ;;  %v972_v55 = vmul.f32 %v5309_v62, %v3725_v51  ;;  %v973_v56 = vadd.f32 %v957_v38, %v937_v19  ;;  %v5311_v62 = vld [vmem:[#allocation23_spill] sm:$0xff] }
 0x100   : >> { %v974_v20 = vadd.f32 %v958_v24, %v938_v1  ;;  %v975_v28 = vadd.f32 %v959_v43, %v939_v22  ;;  %v976_v0 = vadd.f32 %v960_v41, %v940_v32  ;;  %v977_v30 = vadd.f32 %v961_v18, %v941_v54  ;;  %v5312_v1 = vld [vmem:[#allocation24_spill] sm:$0xff]  ;;  %v5313_v32 = vld [vmem:[#allocation25_spill] sm:$0xff] }
 0x101   : >> { %v978_v9 = vadd.f32 %v962_v46, %v942_v50  ;;  %v979_v45 = vadd.f32 %v963_v44, %v943_v58  ;;  %v980_v11 = vadd.f32 %v964_v57, %v944_v59  ;;  %v981_v13 = vadd.f32 %v965_v29, %v945_v60  ;;  %v5315_v50 = vld [vmem:[#allocation26_spill] sm:$0xff]  ;;  %v5317_v59 = vld [vmem:[#allocation27_spill] sm:$0xff] }
 0x102   : >> { %v982_v14 = vadd.f32 %v966_v12, %v946_v53  ;;  %v983_v27 = vadd.f32 %v967_v5, %v947_v61  ;;  %v984_v15 = vadd.f32 %v968_v35, %v948_v6  ;;  %v985_v16 = vadd.f32 %v969_v36, %v949_v40  ;;  %v5319_v6 = vld [vmem:[#allocation29_spill] sm:$0xff] }
 0x103   : >> { %v986_v25 = vadd.f32 %v970_v48, %v950_v3  ;;  %v987_v21 = vadd.f32 %v971_v52, %v951_v34  ;;  %v988_v8 = vadd.f32 %v972_v55, %v952_v17  ;;  %v992_v19 = vrot.slane %v5311_v62, %v5310_v47  ;;  %v3781_v34 = vld [vmem:[%s3098_s8 + $0xda] sm:$0xff]  ;;  %v3784_v17 = vld [vmem:[%s3098_s8 + $0xe2] sm:$0xff] }
 0x104   : >> { %v1028_v22 = vrot.slane %v5312_v1, %v5310_v47  ;;  %v3762_v54 = vrot.slane %v5313_v32, %v5310_v47  ;;  %v3766_v58 = vrot.slane %v5315_v50, %v5310_v47  ;;  %v3770_v60 = vrot.slane %v5317_v59, %v5310_v47 }
 0x105   : >> { %v993_v53 = vmul.f32 %v992_v19, %v3657_v10  ;;  %v994_v61 = vmul.f32 %v992_v19, %v3660_v2  ;;  %v3775_v40 = vsub.s32 3, %v5319_v6  ;;  %v3778_v3 = vsub.s32 4, %v5319_v6 }
 0x106   : >> { %5314 = vst [vmem:[#allocation32_spill] sm:$0xff] %v3762_v54  ;;  %5316 = vst [vmem:[#allocation33_spill] sm:$0xff] %v3766_v58  ;;  %v995_v38 = vmul.f32 %v992_v19, %v3663_v4  ;;  %v996_v24 = vmul.f32 %v992_v19, %v3666_v37  ;;  %v997_v43 = vmul.f32 %v992_v19, %v3669_v49 }
 0x107   : >> { %5318 = vst [vmem:[#allocation34_spill] sm:$0xff] %v3770_v60  ;;  %5320 = vst [vmem:[#allocation35_spill] sm:$0xff] %v3775_v40  ;;  %v998_v10 = vmul.f32 %v992_v19, %v3672_v42  ;;  %v999_v2 = vmul.f32 %v992_v19, %v3675_v39  ;;  %v1000_v41 = vmul.f32 %v992_v19, %v3678_v31 }
 0x108   : >> { %5321 = vst [vmem:[#allocation36_spill] sm:$0xff] %v3778_v3  ;;  %v1001_v18 = vmul.f32 %v992_v19, %v3681_v7  ;;  %v1002_v46 = vmul.f32 %v992_v19, %v3685_v26  ;;  %v1003_v44 = vmul.f32 %v992_v19, %v3688_v23  ;;  %v1004_v57 = vmul.f32 %v992_v19, %v3691_v63 }
 0x109   : >> { %v1005_v29 = vmul.f32 %v992_v19, %v3722_v33  ;;  %v1006_v12 = vmul.f32 %v992_v19, %v3725_v51  ;;  %v1007_v5 = vmul.f32 %v992_v19, %v3781_v34  ;;  %v1008_v35 = vmul.f32 %v992_v19, %v3784_v17 }
 0x10a   : >> { %v1009_v36 = vadd.f32 %v993_v53, %v973_v56  ;;  %v1010_v48 = vadd.f32 %v994_v61, %v974_v20  ;;  %v1011_v52 = vadd.f32 %v995_v38, %v975_v28  ;;  %v1012_v55 = vadd.f32 %v996_v24, %v976_v0  ;;  %v3803_v20 = vld [vmem:[%s3098_s8 + $0xf2] sm:$0xff]  ;;  %v3806_v28 = vld [vmem:[%s3098_s8 + $0xfa] sm:$0xff] }
 0x10b   : >> { %v1013_v47 = vadd.f32 %v997_v43, %v977_v30  ;;  %v1014_v6 = vadd.f32 %v998_v10, %v978_v9  ;;  %v1015_v3 = vadd.f32 %v999_v2, %v979_v45  ;;  %v1016_v59 = vadd.f32 %v1000_v41, %v980_v11 }
 0x10c   : >> { %v1017_v50 = vadd.f32 %v1001_v18, %v981_v13  ;;  %v1018_v32 = vadd.f32 %v1002_v46, %v982_v14  ;;  %v1019_v1 = vadd.f32 %v1003_v44, %v983_v27  ;;  %v1020_v62 = vadd.f32 %v1004_v57, %v984_v15 }
 0x10d   : >> { %v1021_v40 = vadd.f32 %v1005_v29, %v985_v16  ;;  %v1022_v60 = vadd.f32 %v1006_v12, %v986_v25  ;;  %v1023_v58 = vadd.f32 %v1007_v5, %v987_v21  ;;  %v1024_v54 = vadd.f32 %v1008_v35, %v988_v8 }
 0x10e   : >> { %v1029_v19 = vmul.f32 %v1028_v22, %v3663_v4  ;;  %v1030_v56 = vmul.f32 %v1028_v22, %v3666_v37  ;;  %v1031_v0 = vmul.f32 %v1028_v22, %v3669_v49  ;;  %v1032_v30 = vmul.f32 %v1028_v22, %v3672_v42 }
 0x10f   : >> { %v1033_v9 = vmul.f32 %v1028_v22, %v3675_v39  ;;  %v1034_v45 = vmul.f32 %v1028_v22, %v3678_v31  ;;  %v1035_v11 = vmul.f32 %v1028_v22, %v3681_v7  ;;  %v1036_v13 = vmul.f32 %v1028_v22, %v3685_v26 }
 0x110   : >> { %v1037_v4 = vmul.f32 %v1028_v22, %v3688_v23  ;;  %v1038_v37 = vmul.f32 %v1028_v22, %v3691_v63  ;;  %v1039_v14 = vmul.f32 %v1028_v22, %v3722_v33  ;;  %v1040_v27 = vmul.f32 %v1028_v22, %v3725_v51 }
 0x111   : >> { %v1041_v15 = vmul.f32 %v1028_v22, %v3781_v34  ;;  %v1042_v16 = vmul.f32 %v1028_v22, %v3784_v17  ;;  %v1043_v25 = vmul.f32 %v1028_v22, %v3803_v20  ;;  %v1044_v21 = vmul.f32 %v1028_v22, %v3806_v28  ;;  %v5322_v22 = vld [vmem:[#allocation32_spill] sm:$0xff] }
 0x112   : >> { %v1045_v8 = vadd.f32 %v1029_v19, %v1009_v36  ;;  %v1046_v53 = vadd.f32 %v1030_v56, %v1010_v48  ;;  %v1047_v61 = vadd.f32 %v1031_v0, %v1011_v52  ;;  %v1048_v38 = vadd.f32 %v1032_v30, %v1012_v55  ;;  %v3827_v48 = vld [vmem:[%s3098_s8 + $0x10a] sm:$0xff]  ;;  %v3830_v52 = vld [vmem:[%s3098_s8 + $0x112] sm:$0xff] }
 0x113   : >> { %v1049_v24 = vadd.f32 %v1033_v9, %v1013_v47  ;;  %v1050_v43 = vadd.f32 %v1034_v45, %v1014_v6  ;;  %v1051_v10 = vadd.f32 %v1035_v11, %v1015_v3  ;;  %v1052_v2 = vadd.f32 %v1036_v13, %v1016_v59 }
 0x114   : >> { %v1053_v41 = vadd.f32 %v1037_v4, %v1017_v50  ;;  %v1054_v18 = vadd.f32 %v1038_v37, %v1018_v32  ;;  %v1055_v46 = vadd.f32 %v1039_v14, %v1019_v1  ;;  %v1056_v44 = vadd.f32 %v1040_v27, %v1020_v62 }
 0x115   : >> { %v1057_v57 = vadd.f32 %v1041_v15, %v1021_v40  ;;  %v1058_v29 = vadd.f32 %v1042_v16, %v1022_v60  ;;  %v1059_v12 = vadd.f32 %v1043_v25, %v1023_v58  ;;  %v1060_v5 = vadd.f32 %v1044_v21, %v1024_v54  ;;  %v5323_v21 = vld [vmem:[#allocation33_spill] sm:$0xff] }
 0x116   : >> { %v1065_v35 = vmul.f32 %v5322_v22, %v3669_v49  ;;  %v1066_v36 = vmul.f32 %v5322_v22, %v3672_v42  ;;  %v1067_v50 = vmul.f32 %v5322_v22, %v3675_v39  ;;  %v1068_v62 = vmul.f32 %v5322_v22, %v3678_v31 }
 0x117   : >> { %v1069_v1 = vmul.f32 %v5322_v22, %v3681_v7  ;;  %v1070_v32 = vmul.f32 %v5322_v22, %v3685_v26  ;;  %v1071_v49 = vmul.f32 %v5322_v22, %v3688_v23  ;;  %v1072_v42 = vmul.f32 %v5322_v22, %v3691_v63 }
 0x118   : >> { %v1073_v54 = vmul.f32 %v5322_v22, %v3722_v33  ;;  %v1074_v58 = vmul.f32 %v5322_v22, %v3725_v51  ;;  %v1075_v59 = vmul.f32 %v5322_v22, %v3781_v34  ;;  %v1076_v60 = vmul.f32 %v5322_v22, %v3784_v17 }
 0x119   : >> { %v1077_v6 = vmul.f32 %v5322_v22, %v3803_v20  ;;  %v1078_v40 = vmul.f32 %v5322_v22, %v3806_v28  ;;  %v1079_v3 = vmul.f32 %v5322_v22, %v3827_v48  ;;  %v1080_v55 = vmul.f32 %v5322_v22, %v3830_v52 }
 0x11a   : >> { %v1081_v47 = vadd.f32 %v1065_v35, %v1045_v8  ;;  %v1082_v19 = vadd.f32 %v1066_v36, %v1046_v53  ;;  %v1083_v56 = vadd.f32 %v1067_v50, %v1047_v61  ;;  %v1084_v0 = vadd.f32 %v1068_v62, %v1048_v38  ;;  %v913_v61 = vld [vmem:[%s3098_s8 + $0x122] sm:$0xff]  ;;  %v914_v38 = vld [vmem:[%s3098_s8 + $0x12a] sm:$0xff] }
 0x11b   : >> { %v1085_v30 = vadd.f32 %v1069_v1, %v1049_v24  ;;  %v1086_v9 = vadd.f32 %v1070_v32, %v1050_v43  ;;  %v1087_v45 = vadd.f32 %v1071_v49, %v1051_v10  ;;  %v1088_v11 = vadd.f32 %v1072_v42, %v1052_v2 }
 0x11c   : >> { %v1089_v13 = vadd.f32 %v1073_v54, %v1053_v41  ;;  %v1090_v4 = vadd.f32 %v1074_v58, %v1054_v18  ;;  %v1091_v37 = vadd.f32 %v1075_v59, %v1055_v46  ;;  %v1092_v14 = vadd.f32 %v1076_v60, %v1056_v44 }
 0x11d   : >> { %v1093_v27 = vadd.f32 %v1077_v6, %v1057_v57  ;;  %v1094_v15 = vadd.f32 %v1078_v40, %v1058_v29  ;;  %v1095_v16 = vadd.f32 %v1079_v3, %v1059_v12  ;;  %v1096_v25 = vadd.f32 %v1080_v55, %v1060_v5  ;;  %v5324_v55 = vld [vmem:[#allocation34_spill] sm:$0xff] }
 0x11e   : >> { %v1101_v8 = vmul.f32 %v5323_v21, %v3675_v39  ;;  %v1102_v53 = vmul.f32 %v5323_v21, %v3678_v31  ;;  %v1103_v24 = vmul.f32 %v5323_v21, %v3681_v7  ;;  %v1104_v43 = vmul.f32 %v5323_v21, %v3685_v26 }
 0x11f   : >> { %v1105_v10 = vmul.f32 %v5323_v21, %v3688_v23  ;;  %v1106_v2 = vmul.f32 %v5323_v21, %v3691_v63  ;;  %v1107_v39 = vmul.f32 %v5323_v21, %v3722_v33  ;;  %v1108_v31 = vmul.f32 %v5323_v21, %v3725_v51 }
 0x120   : >> { %v1109_v41 = vmul.f32 %v5323_v21, %v3781_v34  ;;  %v1110_v18 = vmul.f32 %v5323_v21, %v3784_v17  ;;  %v1111_v46 = vmul.f32 %v5323_v21, %v3803_v20  ;;  %v1112_v44 = vmul.f32 %v5323_v21, %v3806_v28 }
 0x121   : >> { %v1113_v57 = vmul.f32 %v5323_v21, %v3827_v48  ;;  %v1114_v29 = vmul.f32 %v5323_v21, %v3830_v52  ;;  %v1115_v12 = vmul.f32 %v5323_v21, %v913_v61  ;;  %v1116_v5 = vmul.f32 %v5323_v21, %v914_v38  ;;  %v1169_v21 = vld [vmem:[%s3098_s8 + $0x3] sm:$0xff] }
 0x122   : >> { %v1117_v22 = vadd.f32 %v1101_v8, %v1081_v47  ;;  %v1118_v35 = vadd.f32 %v1102_v53, %v1082_v19  ;;  %v1119_v36 = vadd.f32 %v1103_v24, %v1083_v56  ;;  %v1120_v50 = vadd.f32 %v1104_v43, %v1084_v0  ;;  %v915_v56 = vld [vmem:[%s3098_s8 + $0x13a] sm:$0xff]  ;;  %v916_v0 = vld [vmem:[%s3098_s8 + $0x142] sm:$0xff]  ;;  %v1170_v8 = vld [vmem:[%s3098_s8 + $0xb] sm:$0xff] }
 0x123   : >> { %v1121_v62 = vadd.f32 %v1105_v10, %v1085_v30  ;;  %v1122_v1 = vadd.f32 %v1106_v2, %v1086_v9  ;;  %v1123_v32 = vadd.f32 %v1107_v39, %v1087_v45  ;;  %v1124_v49 = vadd.f32 %v1108_v31, %v1088_v11  ;;  %v1171_v43 = vld [vmem:[%s3098_s8 + $0x1b] sm:$0xff]  ;;  %v1172_v10 = vld [vmem:[%s3098_s8 + $0x23] sm:$0xff]  ;;  %v3927_v2 = vld [vmem:[%s3098_s8 + $0x33] sm:$0xff] }
 0x124   : >> { %v1125_v42 = vadd.f32 %v1109_v41, %v1089_v13  ;;  %v1126_v54 = vadd.f32 %v1110_v18, %v1090_v4  ;;  %v1127_v58 = vadd.f32 %v1111_v46, %v1091_v37  ;;  %v1128_v59 = vadd.f32 %v1112_v44, %v1092_v14  ;;  %v3930_v41 = vld [vmem:[%s3098_s8 + $0x3b] sm:$0xff]  ;;  %v3933_v18 = vld [vmem:[%s3098_s8 + $0x4b] sm:$0xff]  ;;  %v3936_v46 = vld [vmem:[%s3098_s8 + $0x53] sm:$0xff] }
 0x125   : >> { %v1129_v60 = vadd.f32 %v1113_v57, %v1093_v27  ;;  %v1130_v6 = vadd.f32 %v1114_v29, %v1094_v15  ;;  %v1131_v40 = vadd.f32 %v1115_v12, %v1095_v16  ;;  %v1132_v3 = vadd.f32 %v1116_v5, %v1096_v25  ;;  %v5325_v44 = vld [vmem:[#allocation35_spill] sm:$0xff]  ;;  %v5326_v57 = vld [vmem:[#allocation21_spill] sm:$0xff]  ;;  %v5327_v12 = vld [vmem:[#allocation22_spill] sm:$0xff] }
 0x126   : >> { %v1137_v47 = vmul.f32 %v5324_v55, %v3681_v7  ;;  %v1138_v19 = vmul.f32 %v5324_v55, %v3685_v26  ;;  %v1139_v30 = vmul.f32 %v5324_v55, %v3688_v23  ;;  %v1140_v9 = vmul.f32 %v5324_v55, %v3691_v63 }
 0x127   : >> { %v1141_v45 = vmul.f32 %v5324_v55, %v3722_v33  ;;  %v1142_v11 = vmul.f32 %v5324_v55, %v3725_v51  ;;  %v1143_v7 = vmul.f32 %v5324_v55, %v3781_v34  ;;  %v1144_v26 = vmul.f32 %v5324_v55, %v3784_v17 }
 0x128   : >> { %v1145_v13 = vmul.f32 %v5324_v55, %v3803_v20  ;;  %v1146_v23 = vmul.f32 %v5324_v55, %v3806_v28  ;;  %v1147_v63 = vmul.f32 %v5324_v55, %v3827_v48  ;;  %v1148_v33 = vmul.f32 %v5324_v55, %v3830_v52 }
 0x129   : >> { %v1149_v51 = vmul.f32 %v5324_v55, %v913_v61  ;;  %v1150_v34 = vmul.f32 %v5324_v55, %v914_v38  ;;  %v1151_v17 = vmul.f32 %v5324_v55, %v915_v56  ;;  %v1152_v4 = vmul.f32 %v5324_v55, %v916_v0  ;;  %v5336_v55 = vld [vmem:[#allocation27_spill] sm:$0xff] }
 0x12a   : >> { %v1153_v20 = vadd.f32 %v1137_v47, %v1117_v22  ;;  %v1154_v37 = vadd.f32 %v1138_v19, %v1118_v35  ;;  %v1155_v28 = vadd.f32 %v1139_v30, %v1119_v36  ;;  %v1156_v48 = vadd.f32 %v1140_v9, %v1120_v50  ;;  %v3945_v22 = vld [vmem:[%s3098_s8 + $0x63] sm:$0xff]  ;;  %v3948_v35 = vld [vmem:[%s3098_s8 + $0x6b] sm:$0xff]  ;;  %v3951_v36 = vld [vmem:[%s3098_s8 + $0x7b] sm:$0xff] }
 0x12b   : >> { %v1157_v14 = vadd.f32 %v1141_v45, %v1121_v62  ;;  %v1158_v27 = vadd.f32 %v1142_v11, %v1122_v1  ;;  %v1159_v52 = vadd.f32 %v1143_v7, %v1123_v32  ;;  %v1160_v15 = vadd.f32 %v1144_v26, %v1124_v49  ;;  %v5328_v50 = vld [vmem:[#allocation23_spill] sm:$0xff]  ;;  %v5330_v1 = vld [vmem:[#allocation24_spill] sm:$0xff]  ;;  %v5332_v49 = vld [vmem:[#allocation25_spill] sm:$0xff] }
 0x12c   : >> { %v1161_v16 = vadd.f32 %v1145_v13, %v1125_v42  ;;  %v1162_v25 = vadd.f32 %v1146_v23, %v1126_v54  ;;  %v1163_v53 = vadd.f32 %v1147_v63, %v1127_v58  ;;  %v1164_v61 = vadd.f32 %v1148_v33, %v1128_v59  ;;  %v5334_v54 = vld [vmem:[#allocation26_spill] sm:$0xff]  ;;  %v5338_v19 = vld [vmem:[#allocation36_spill] sm:$0xff] }
 0x12d   : >> { %v1165_v38 = vadd.f32 %v1149_v51, %v1129_v60  ;;  %v1166_v24 = vadd.f32 %v1150_v34, %v1130_v6  ;;  %v1167_v39 = vadd.f32 %v1151_v17, %v1131_v40  ;;  %v1168_v31 = vadd.f32 %v1152_v4, %v1132_v3  ;;  %v3970_v59 = vld [vmem:[%s3098_s8 + $0x83] sm:$0xff]  ;;  %v3973_v60 = vld [vmem:[%s3098_s8 + $0x93] sm:$0xff]  ;;  %v3976_v6 = vld [vmem:[%s3098_s8 + $0x9b] sm:$0xff] }
 0x12e   : >> { %v1200_v29 = vrot.slane %v5326_v57, %v5325_v44  ;;  %v3942_v5 = vrot.slane %v5327_v12, %v5325_v44  ;;  %v3955_v62 = vrot.slane %v5328_v50, %v5325_v44  ;;  %v3959_v32 = vrot.slane %v5330_v1, %v5325_v44  ;;  %v3987_v0 = vld [vmem:[%s3098_s8 + $0xab] sm:$0xff]  ;;  %v3990_v30 = vld [vmem:[%s3098_s8 + $0xb3] sm:$0xff] }
 0x12f   : >> { %v3963_v42 = vrot.slane %v5332_v49, %v5325_v44  ;;  %v3967_v58 = vrot.slane %v5334_v54, %v5325_v44  ;;  %v3980_v47 = vrot.slane %v5336_v55, %v5325_v44  ;;  %v3984_v56 = vrot.slane %v5326_v57, %v5338_v19 }
 0x130   : >> { %5329 = vst [vmem:[#allocation30_spill] sm:$0xff] %v3955_v62  ;;  %5331 = vst [vmem:[#allocation31_spill] sm:$0xff] %v3959_v32  ;;  %v1201_v40 = vmul.f32 %v1200_v29, %v1169_v21  ;;  %v1202_v3 = vmul.f32 %v1200_v29, %v1170_v8  ;;  %v1203_v9 = vmul.f32 %v1200_v29, %v1171_v43 }
 0x131   : >> { %5333 = vst [vmem:[#allocation32_spill] sm:$0xff] %v3963_v42  ;;  %5335 = vst [vmem:[#allocation33_spill] sm:$0xff] %v3967_v58  ;;  %v1204_v45 = vmul.f32 %v1200_v29, %v1172_v10  ;;  %v1205_v11 = vmul.f32 %v1200_v29, %v3927_v2  ;;  %v1206_v7 = vmul.f32 %v1200_v29, %v3930_v41 }
 0x132   : >> { %5337 = vst [vmem:[#allocation34_spill] sm:$0xff] %v3980_v47  ;;  %5339 = vst [vmem:[#allocation35_spill] sm:$0xff] %v3984_v56  ;;  %v1207_v26 = vmul.f32 %v1200_v29, %v3933_v18  ;;  %v1208_v13 = vmul.f32 %v1200_v29, %v3936_v46  ;;  %v1209_v23 = vmul.f32 %v1200_v29, %v3945_v22 }
 0x133   : >> { %v1210_v63 = vmul.f32 %v1200_v29, %v3948_v35  ;;  %v1211_v33 = vmul.f32 %v1200_v29, %v3951_v36  ;;  %v1212_v51 = vmul.f32 %v1200_v29, %v3970_v59  ;;  %v1213_v34 = vmul.f32 %v1200_v29, %v3973_v60 }
 0x134   : >> { %v1214_v17 = vmul.f32 %v1200_v29, %v3976_v6  ;;  %v1215_v4 = vmul.f32 %v1200_v29, %v3987_v0  ;;  %v1216_v21 = vmul.f32 %v1200_v29, %v3990_v30  ;;  %v1217_v8 = vadd.f32 %v1201_v40, %v1153_v20 }
 0x135   : >> { %v1218_v44 = vadd.f32 %v1202_v3, %v1154_v37  ;;  %v1219_v57 = vadd.f32 %v1203_v9, %v1155_v28  ;;  %v1220_v55 = vadd.f32 %v1204_v45, %v1156_v48  ;;  %v1221_v54 = vadd.f32 %v1205_v11, %v1157_v14  ;;  %v4007_v37 = vld [vmem:[%s3098_s8 + $0xc3] sm:$0xff]  ;;  %v4010_v28 = vld [vmem:[%s3098_s8 + $0xcb] sm:$0xff] }
 0x136   : >> { %v1222_v49 = vadd.f32 %v1206_v7, %v1158_v27  ;;  %v1223_v1 = vadd.f32 %v1207_v26, %v1159_v52  ;;  %v1224_v50 = vadd.f32 %v1208_v13, %v1160_v15  ;;  %v1225_v12 = vadd.f32 %v1209_v23, %v1161_v16 }
 0x137   : >> { %v1226_v19 = vadd.f32 %v1210_v63, %v1162_v25  ;;  %v1227_v56 = vadd.f32 %v1211_v33, %v1163_v53  ;;  %v1228_v47 = vadd.f32 %v1212_v51, %v1164_v61  ;;  %v1229_v58 = vadd.f32 %v1213_v34, %v1165_v38 }
 0x138   : >> { %v1230_v42 = vadd.f32 %v1214_v17, %v1166_v24  ;;  %v1231_v32 = vadd.f32 %v1215_v4, %v1167_v39  ;;  %v1232_v62 = vadd.f32 %v1216_v21, %v1168_v31  ;;  %v1237_v29 = vmul.f32 %v3942_v5, %v1171_v43 }
 0x139   : >> { %v1238_v20 = vmul.f32 %v3942_v5, %v1172_v10  ;;  %v1239_v48 = vmul.f32 %v3942_v5, %v3927_v2  ;;  %v1240_v14 = vmul.f32 %v3942_v5, %v3930_v41  ;;  %v1241_v27 = vmul.f32 %v3942_v5, %v3933_v18 }
 0x13a   : >> { %v1242_v52 = vmul.f32 %v3942_v5, %v3936_v46  ;;  %v1243_v15 = vmul.f32 %v3942_v5, %v3945_v22  ;;  %v1244_v16 = vmul.f32 %v3942_v5, %v3948_v35  ;;  %v1245_v25 = vmul.f32 %v3942_v5, %v3951_v36 }
 0x13b   : >> { %v1246_v53 = vmul.f32 %v3942_v5, %v3970_v59  ;;  %v1247_v61 = vmul.f32 %v3942_v5, %v3973_v60  ;;  %v1248_v38 = vmul.f32 %v3942_v5, %v3976_v6  ;;  %v1249_v24 = vmul.f32 %v3942_v5, %v3987_v0 }
 0x13c   : >> { %v1250_v43 = vmul.f32 %v3942_v5, %v3990_v30  ;;  %v1251_v10 = vmul.f32 %v3942_v5, %v4007_v37  ;;  %v1252_v39 = vmul.f32 %v3942_v5, %v4010_v28  ;;  %v1253_v31 = vadd.f32 %v1237_v29, %v1217_v8  ;;  %v5340_v5 = vld [vmem:[#allocation30_spill] sm:$0xff] }
 0x13d   : >> { %v1254_v40 = vadd.f32 %v1238_v20, %v1218_v44  ;;  %v1255_v3 = vadd.f32 %v1239_v48, %v1219_v57  ;;  %v1256_v9 = vadd.f32 %v1240_v14, %v1220_v55  ;;  %v1257_v45 = vadd.f32 %v1241_v27, %v1221_v54  ;;  %v4045_v55 = vld [vmem:[%s3098_s8 + $0xdb] sm:$0xff]  ;;  %v4048_v54 = vld [vmem:[%s3098_s8 + $0xe3] sm:$0xff] }
 0x13e   : >> { %v1258_v11 = vadd.f32 %v1242_v52, %v1222_v49  ;;  %v1259_v7 = vadd.f32 %v1243_v15, %v1223_v1  ;;  %v1260_v26 = vadd.f32 %v1244_v16, %v1224_v50  ;;  %v1261_v13 = vadd.f32 %v1245_v25, %v1225_v12 }
 0x13f   : >> { %v1262_v23 = vadd.f32 %v1246_v53, %v1226_v19  ;;  %v1263_v63 = vadd.f32 %v1247_v61, %v1227_v56  ;;  %v1264_v33 = vadd.f32 %v1248_v38, %v1228_v47  ;;  %v1265_v51 = vadd.f32 %v1249_v24, %v1229_v58 }
 0x140   : >> { %v1266_v34 = vadd.f32 %v1250_v43, %v1230_v42  ;;  %v1267_v17 = vadd.f32 %v1251_v10, %v1231_v32  ;;  %v1268_v4 = vadd.f32 %v1252_v39, %v1232_v62  ;;  %v1273_v21 = vmul.f32 %v5340_v5, %v3927_v2  ;;  %v5341_v39 = vld [vmem:[#allocation31_spill] sm:$0xff] }
 0x141   : >> { %v1274_v57 = vmul.f32 %v5340_v5, %v3930_v41  ;;  %v1275_v12 = vmul.f32 %v5340_v5, %v3933_v18  ;;  %v1276_v50 = vmul.f32 %v5340_v5, %v3936_v46  ;;  %v1277_v1 = vmul.f32 %v5340_v5, %v3945_v22 }
 0x142   : >> { %v1278_v62 = vmul.f32 %v5340_v5, %v3948_v35  ;;  %v1279_v2 = vmul.f32 %v5340_v5, %v3951_v36  ;;  %v1280_v41 = vmul.f32 %v5340_v5, %v3970_v59  ;;  %v1281_v32 = vmul.f32 %v5340_v5, %v3973_v60 }
 0x143   : >> { %v1282_v49 = vmul.f32 %v5340_v5, %v3976_v6  ;;  %v1283_v42 = vmul.f32 %v5340_v5, %v3987_v0  ;;  %v1284_v58 = vmul.f32 %v5340_v5, %v3990_v30  ;;  %v1285_v47 = vmul.f32 %v5340_v5, %v4007_v37 }
 0x144   : >> { %v1286_v19 = vmul.f32 %v5340_v5, %v4010_v28  ;;  %v1287_v56 = vmul.f32 %v5340_v5, %v4045_v55  ;;  %v1288_v8 = vmul.f32 %v5340_v5, %v4048_v54  ;;  %v1289_v44 = vadd.f32 %v1273_v21, %v1253_v31 }
 0x145   : >> { %v1290_v29 = vadd.f32 %v1274_v57, %v1254_v40  ;;  %v1291_v20 = vadd.f32 %v1275_v12, %v1255_v3  ;;  %v1292_v48 = vadd.f32 %v1276_v50, %v1256_v9  ;;  %v1293_v14 = vadd.f32 %v1277_v1, %v1257_v45  ;;  %v4083_v3 = vld [vmem:[%s3098_s8 + $0xf3] sm:$0xff]  ;;  %v4086_v9 = vld [vmem:[%s3098_s8 + $0xfb] sm:$0xff] }
 0x146   : >> { %v1294_v27 = vadd.f32 %v1278_v62, %v1258_v11  ;;  %v1295_v52 = vadd.f32 %v1279_v2, %v1259_v7  ;;  %v1296_v15 = vadd.f32 %v1280_v41, %v1260_v26  ;;  %v1297_v16 = vadd.f32 %v1281_v32, %v1261_v13 }
 0x147   : >> { %v1298_v25 = vadd.f32 %v1282_v49, %v1262_v23  ;;  %v1299_v53 = vadd.f32 %v1283_v42, %v1263_v63  ;;  %v1300_v61 = vadd.f32 %v1284_v58, %v1264_v33  ;;  %v1301_v38 = vadd.f32 %v1285_v47, %v1265_v51 }
 0x148   : >> { %v1302_v24 = vadd.f32 %v1286_v19, %v1266_v34  ;;  %v1303_v43 = vadd.f32 %v1287_v56, %v1267_v17  ;;  %v1304_v10 = vadd.f32 %v1288_v8, %v1268_v4  ;;  %v1309_v31 = vmul.f32 %v5341_v39, %v3933_v18  ;;  %v5342_v8 = vld [vmem:[#allocation32_spill] sm:$0xff] }
 0x149   : >> { %v1310_v40 = vmul.f32 %v5341_v39, %v3936_v46  ;;  %v1311_v45 = vmul.f32 %v5341_v39, %v3945_v22  ;;  %v1312_v11 = vmul.f32 %v5341_v39, %v3948_v35  ;;  %v1313_v7 = vmul.f32 %v5341_v39, %v3951_v36 }
 0x14a   : >> { %v1314_v26 = vmul.f32 %v5341_v39, %v3970_v59  ;;  %v1315_v18 = vmul.f32 %v5341_v39, %v3973_v60  ;;  %v1316_v46 = vmul.f32 %v5341_v39, %v3976_v6  ;;  %v1317_v13 = vmul.f32 %v5341_v39, %v3987_v0 }
 0x14b   : >> { %v1318_v23 = vmul.f32 %v5341_v39, %v3990_v30  ;;  %v1319_v63 = vmul.f32 %v5341_v39, %v4007_v37  ;;  %v1320_v33 = vmul.f32 %v5341_v39, %v4010_v28  ;;  %v1321_v51 = vmul.f32 %v5341_v39, %v4045_v55 }
 0x14c   : >> { %v1322_v34 = vmul.f32 %v5341_v39, %v4048_v54  ;;  %v1323_v17 = vmul.f32 %v5341_v39, %v4083_v3  ;;  %v1324_v4 = vmul.f32 %v5341_v39, %v4086_v9  ;;  %v1325_v5 = vadd.f32 %v1309_v31, %v1289_v44 }
 0x14d   : >> { %v1326_v21 = vadd.f32 %v1310_v40, %v1290_v29  ;;  %v1327_v57 = vadd.f32 %v1311_v45, %v1291_v20  ;;  %v1328_v12 = vadd.f32 %v1312_v11, %v1292_v48  ;;  %v1329_v50 = vadd.f32 %v1313_v7, %v1293_v14  ;;  %v4121_v20 = vld [vmem:[%s3098_s8 + $0x10b] sm:$0xff]  ;;  %v4124_v48 = vld [vmem:[%s3098_s8 + $0x113] sm:$0xff] }
 0x14e   : >> { %v1330_v1 = vadd.f32 %v1314_v26, %v1294_v27  ;;  %v1331_v62 = vadd.f32 %v1315_v18, %v1295_v52  ;;  %v1332_v2 = vadd.f32 %v1316_v46, %v1296_v15  ;;  %v1333_v41 = vadd.f32 %v1317_v13, %v1297_v16 }
 0x14f   : >> { %v1334_v32 = vadd.f32 %v1318_v23, %v1298_v25  ;;  %v1335_v49 = vadd.f32 %v1319_v63, %v1299_v53  ;;  %v1336_v42 = vadd.f32 %v1320_v33, %v1300_v61  ;;  %v1337_v58 = vadd.f32 %v1321_v51, %v1301_v38 }
 0x150   : >> { %v1338_v47 = vadd.f32 %v1322_v34, %v1302_v24  ;;  %v1339_v19 = vadd.f32 %v1323_v17, %v1303_v43  ;;  %v1340_v56 = vadd.f32 %v1324_v4, %v1304_v10  ;;  %v1345_v44 = vmul.f32 %v5342_v8, %v3945_v22  ;;  %v5343_v4 = vld [vmem:[#allocation33_spill] sm:$0xff] }
 0x151   : >> { %v1346_v29 = vmul.f32 %v5342_v8, %v3948_v35  ;;  %v1347_v14 = vmul.f32 %v5342_v8, %v3951_v36  ;;  %v1348_v27 = vmul.f32 %v5342_v8, %v3970_v59  ;;  %v1349_v52 = vmul.f32 %v5342_v8, %v3973_v60 }
 0x152   : >> { %v1350_v15 = vmul.f32 %v5342_v8, %v3976_v6  ;;  %v1351_v22 = vmul.f32 %v5342_v8, %v3987_v0  ;;  %v1352_v35 = vmul.f32 %v5342_v8, %v3990_v30  ;;  %v1353_v16 = vmul.f32 %v5342_v8, %v4007_v37 }
 0x153   : >> { %v1354_v25 = vmul.f32 %v5342_v8, %v4010_v28  ;;  %v1355_v53 = vmul.f32 %v5342_v8, %v4045_v55  ;;  %v1356_v61 = vmul.f32 %v5342_v8, %v4048_v54  ;;  %v1357_v38 = vmul.f32 %v5342_v8, %v4083_v3 }
 0x154   : >> { %v1358_v24 = vmul.f32 %v5342_v8, %v4086_v9  ;;  %v1359_v43 = vmul.f32 %v5342_v8, %v4121_v20  ;;  %v1360_v10 = vmul.f32 %v5342_v8, %v4124_v48  ;;  %v1361_v39 = vadd.f32 %v1345_v44, %v1325_v5 }
 0x155   : >> { %v1362_v31 = vadd.f32 %v1346_v29, %v1326_v21  ;;  %v1363_v40 = vadd.f32 %v1347_v14, %v1327_v57  ;;  %v1364_v45 = vadd.f32 %v1348_v27, %v1328_v12  ;;  %v1365_v11 = vadd.f32 %v1349_v52, %v1329_v50  ;;  %v1193_v57 = vld [vmem:[%s3098_s8 + $0x123] sm:$0xff]  ;;  %v1194_v12 = vld [vmem:[%s3098_s8 + $0x12b] sm:$0xff] }
 0x156   : >> { %v1366_v7 = vadd.f32 %v1350_v15, %v1330_v1  ;;  %v1367_v26 = vadd.f32 %v1351_v22, %v1331_v62  ;;  %v1368_v18 = vadd.f32 %v1352_v35, %v1332_v2  ;;  %v1369_v46 = vadd.f32 %v1353_v16, %v1333_v41 }
 0x157   : >> { %v1370_v13 = vadd.f32 %v1354_v25, %v1334_v32  ;;  %v1371_v23 = vadd.f32 %v1355_v53, %v1335_v49  ;;  %v1372_v63 = vadd.f32 %v1356_v61, %v1336_v42  ;;  %v1373_v33 = vadd.f32 %v1357_v38, %v1337_v58 }
 0x158   : >> { %v1374_v51 = vadd.f32 %v1358_v24, %v1338_v47  ;;  %v1375_v34 = vadd.f32 %v1359_v43, %v1339_v19  ;;  %v1376_v17 = vadd.f32 %v1360_v10, %v1340_v56  ;;  %v1381_v5 = vmul.f32 %v5343_v4, %v3951_v36  ;;  %v5344_v10 = vld [vmem:[#allocation34_spill] sm:$0xff] }
 0x159   : >> { %v1382_v21 = vmul.f32 %v5343_v4, %v3970_v59  ;;  %v1383_v50 = vmul.f32 %v5343_v4, %v3973_v60  ;;  %v1384_v1 = vmul.f32 %v5343_v4, %v3976_v6  ;;  %v1385_v62 = vmul.f32 %v5343_v4, %v3987_v0 }
 0x15a   : >> { %v1386_v2 = vmul.f32 %v5343_v4, %v3990_v30  ;;  %v1387_v36 = vmul.f32 %v5343_v4, %v4007_v37  ;;  %v1388_v59 = vmul.f32 %v5343_v4, %v4010_v28  ;;  %v1389_v41 = vmul.f32 %v5343_v4, %v4045_v55 }
 0x15b   : >> { %v1390_v32 = vmul.f32 %v5343_v4, %v4048_v54  ;;  %v1391_v49 = vmul.f32 %v5343_v4, %v4083_v3  ;;  %v1392_v42 = vmul.f32 %v5343_v4, %v4086_v9  ;;  %v1393_v58 = vmul.f32 %v5343_v4, %v4121_v20 }
 0x15c   : >> { %v1394_v47 = vmul.f32 %v5343_v4, %v4124_v48  ;;  %v1395_v19 = vmul.f32 %v5343_v4, %v1193_v57  ;;  %v1396_v56 = vmul.f32 %v5343_v4, %v1194_v12  ;;  %v1397_v8 = vadd.f32 %v1381_v5, %v1361_v39  ;;  %v4221_v4 = vld [vmem:[%s3098_s8 + $0x34] sm:$0xff] }
 0x15d   : >> { %v1398_v44 = vadd.f32 %v1382_v21, %v1362_v31  ;;  %v1399_v29 = vadd.f32 %v1383_v50, %v1363_v40  ;;  %v1400_v14 = vadd.f32 %v1384_v1, %v1364_v45  ;;  %v1401_v27 = vadd.f32 %v1385_v62, %v1365_v11  ;;  %v1195_v40 = vld [vmem:[%s3098_s8 + $0x13b] sm:$0xff]  ;;  %v1196_v45 = vld [vmem:[%s3098_s8 + $0x143] sm:$0xff]  ;;  %v4227_v1 = vld [vmem:[%s3098_s8 + $0x4c] sm:$0xff] }
 0x15e   : >> { %v1402_v52 = vadd.f32 %v1386_v2, %v1366_v7  ;;  %v1403_v15 = vadd.f32 %v1387_v36, %v1367_v26  ;;  %v1404_v22 = vadd.f32 %v1388_v59, %v1368_v18  ;;  %v1405_v35 = vadd.f32 %v1389_v41, %v1369_v46  ;;  %v4224_v50 = vld [vmem:[%s3098_s8 + $0x3c] sm:$0xff]  ;;  %v4230_v62 = vld [vmem:[%s3098_s8 + $0x54] sm:$0xff] }
 0x15f   : >> { %v1406_v16 = vadd.f32 %v1390_v32, %v1370_v13  ;;  %v1407_v25 = vadd.f32 %v1391_v49, %v1371_v23  ;;  %v1408_v53 = vadd.f32 %v1392_v42, %v1372_v63  ;;  %v1409_v61 = vadd.f32 %v1393_v58, %v1373_v33  ;;  %v1449_v23 = vld [vmem:[%s3098_s8 + $0x4] sm:$0xff]  ;;  %v1450_v63 = vld [vmem:[%s3098_s8 + $0xc] sm:$0xff]  ;;  %v4239_v42 = vld [vmem:[%s3098_s8 + $0x7c] sm:$0xff] }
 0x160   : >> { %v1410_v38 = vadd.f32 %v1394_v47, %v1374_v51  ;;  %v1411_v24 = vadd.f32 %v1395_v19, %v1375_v34  ;;  %v1412_v43 = vadd.f32 %v1396_v56, %v1376_v17  ;;  %v1417_v39 = vmul.f32 %v5344_v10, %v3973_v60  ;;  %v1451_v34 = vld [vmem:[%s3098_s8 + $0x1c] sm:$0xff]  ;;  %v1452_v17 = vld [vmem:[%s3098_s8 + $0x24] sm:$0xff]  ;;  %v4236_v49 = vld [vmem:[%s3098_s8 + $0x6c] sm:$0xff] }
 0x161   : >> { %v1418_v31 = vmul.f32 %v5344_v10, %v3976_v6  ;;  %v1419_v11 = vmul.f32 %v5344_v10, %v3987_v0  ;;  %v1420_v7 = vmul.f32 %v5344_v10, %v3990_v30  ;;  %v1421_v26 = vmul.f32 %v5344_v10, %v4007_v37  ;;  %v4233_v32 = vld [vmem:[%s3098_s8 + $0x64] sm:$0xff]  ;;  %v4245_v56 = vld [vmem:[%s3098_s8 + $0x94] sm:$0xff] }
 0x162   : >> { %v1422_v18 = vmul.f32 %v5344_v10, %v4010_v28  ;;  %v1423_v60 = vmul.f32 %v5344_v10, %v4045_v55  ;;  %v1424_v6 = vmul.f32 %v5344_v10, %v4048_v54  ;;  %v1425_v0 = vmul.f32 %v5344_v10, %v4083_v3  ;;  %v4242_v19 = vld [vmem:[%s3098_s8 + $0x84] sm:$0xff] }
 0x163   : >> { %v1426_v30 = vmul.f32 %v5344_v10, %v4086_v9  ;;  %v1427_v37 = vmul.f32 %v5344_v10, %v4121_v20  ;;  %v1428_v28 = vmul.f32 %v5344_v10, %v4124_v48  ;;  %v1429_v55 = vmul.f32 %v5344_v10, %v1193_v57 }
 0x164   : >> { %v1430_v46 = vmul.f32 %v5344_v10, %v1194_v12  ;;  %v1431_v54 = vmul.f32 %v5344_v10, %v1195_v40  ;;  %v1432_v3 = vmul.f32 %v5344_v10, %v1196_v45  ;;  %v1433_v13 = vadd.f32 %v1417_v39, %v1397_v8  ;;  %v4248_v8 = vld [vmem:[%s3098_s8 + $0x9c] sm:$0xff] }
 0x165   : >> { %v1434_v9 = vadd.f32 %v1418_v31, %v1398_v44  ;;  %v1435_v20 = vadd.f32 %v1419_v11, %v1399_v29  ;;  %v1436_v33 = vadd.f32 %v1420_v7, %v1400_v14  ;;  %v1437_v51 = vadd.f32 %v1421_v26, %v1401_v27  ;;  %v5345_v44 = vld [vmem:[#allocation35_spill] sm:$0xff] }
 0x166   : >> { %v1438_v48 = vadd.f32 %v1422_v18, %v1402_v52  ;;  %v1439_v5 = vadd.f32 %v1423_v60, %v1403_v15  ;;  %v1440_v21 = vadd.f32 %v1424_v6, %v1404_v22  ;;  %v1441_v57 = vadd.f32 %v1425_v0, %v1405_v35  ;;  %v4253_v27 = vld [vmem:[%s3098_s8 + $0xac] sm:$0xff]  ;;  %v4256_v52 = vld [vmem:[%s3098_s8 + $0xb4] sm:$0xff] }
 0x167   : >> { %v1442_v12 = vadd.f32 %v1426_v30, %v1406_v16  ;;  %v1443_v2 = vadd.f32 %v1427_v37, %v1407_v25  ;;  %v1444_v36 = vadd.f32 %v1428_v28, %v1408_v53  ;;  %v1445_v59 = vadd.f32 %v1429_v55, %v1409_v61 }
 0x168   : >> { %v1446_v41 = vadd.f32 %v1430_v46, %v1410_v38  ;;  %v1447_v58 = vadd.f32 %v1431_v54, %v1411_v24  ;;  %v1448_v47 = vadd.f32 %v1432_v3, %v1412_v43  ;;  %v1481_v29 = vmul.f32 %v5345_v44, %v1449_v23 }
 0x169   : >> { %v1482_v14 = vmul.f32 %v5345_v44, %v1450_v63  ;;  %v1483_v15 = vmul.f32 %v5345_v44, %v1451_v34  ;;  %v1484_v22 = vmul.f32 %v5345_v44, %v1452_v17  ;;  %v1485_v35 = vmul.f32 %v5345_v44, %v4221_v4  ;;  %v5346_v63 = vld [vmem:[#allocation36_spill] sm:$0xff] }
 0x16a   : >> { %v1486_v16 = vmul.f32 %v5345_v44, %v4224_v50  ;;  %v1487_v25 = vmul.f32 %v5345_v44, %v4227_v1  ;;  %v1488_v53 = vmul.f32 %v5345_v44, %v4230_v62  ;;  %v1489_v61 = vmul.f32 %v5345_v44, %v4233_v32 }
 0x16b   : >> { %v1490_v38 = vmul.f32 %v5345_v44, %v4236_v49  ;;  %v1491_v24 = vmul.f32 %v5345_v44, %v4239_v42  ;;  %v1492_v43 = vmul.f32 %v5345_v44, %v4242_v19  ;;  %v1493_v10 = vmul.f32 %v5345_v44, %v4245_v56 }
 0x16c   : >> { %v1494_v39 = vmul.f32 %v5345_v44, %v4248_v8  ;;  %v1495_v31 = vmul.f32 %v5345_v44, %v4253_v27  ;;  %v1496_v40 = vmul.f32 %v5345_v44, %v4256_v52  ;;  %v1497_v45 = vadd.f32 %v1481_v29, %v1433_v13  ;;  %v5347_v44 = vld [vmem:[#allocation22_spill] sm:$0xff] }
 0x16d   : >> { %v1498_v11 = vadd.f32 %v1482_v14, %v1434_v9  ;;  %v1499_v7 = vadd.f32 %v1483_v15, %v1435_v20  ;;  %v1500_v26 = vadd.f32 %v1484_v22, %v1436_v33  ;;  %v1501_v18 = vadd.f32 %v1485_v35, %v1437_v51  ;;  %v5348_v9 = vld [vmem:[#allocation23_spill] sm:$0xff]  ;;  %v5349_v33 = vld [vmem:[#allocation24_spill] sm:$0xff]  ;;  %v4311_v29 = vld [vmem:[%s3098_s8 + $0xc4] sm:$0xff] }
 0x16e   : >> { %v1502_v60 = vadd.f32 %v1486_v16, %v1438_v48  ;;  %v1503_v6 = vadd.f32 %v1487_v25, %v1439_v5  ;;  %v1504_v0 = vadd.f32 %v1488_v53, %v1440_v21  ;;  %v1505_v30 = vadd.f32 %v1489_v61, %v1441_v57  ;;  %v5351_v48 = vld [vmem:[#allocation25_spill] sm:$0xff]  ;;  %v5353_v21 = vld [vmem:[#allocation26_spill] sm:$0xff] }
 0x16f   : >> { %v1506_v37 = vadd.f32 %v1490_v38, %v1442_v12  ;;  %v1507_v28 = vadd.f32 %v1491_v24, %v1443_v2  ;;  %v1508_v55 = vadd.f32 %v1492_v43, %v1444_v36  ;;  %v1509_v46 = vadd.f32 %v1493_v10, %v1445_v59  ;;  %v5355_v12 = vld [vmem:[#allocation27_spill] sm:$0xff] }
 0x170   : >> { %v1510_v54 = vadd.f32 %v1494_v39, %v1446_v41  ;;  %v1511_v3 = vadd.f32 %v1495_v31, %v1447_v58  ;;  %v1512_v23 = vadd.f32 %v1496_v40, %v1448_v47  ;;  %v1516_v13 = vrot.slane %v5347_v44, %v5346_v63  ;;  %v5357_v41 = vld [vmem:[#allocation29_spill] sm:$0xff]  ;;  %v4314_v14 = vld [vmem:[%s3098_s8 + $0xcc] sm:$0xff] }
 0x171   : >> { %v1552_v20 = vrot.slane %v5348_v9, %v5346_v63  ;;  %v4290_v51 = vrot.slane %v5349_v33, %v5346_v63  ;;  %v4294_v5 = vrot.slane %v5351_v48, %v5346_v63  ;;  %v4298_v57 = vrot.slane %v5353_v21, %v5346_v63 }
 0x172   : >> { %v4302_v2 = vrot.slane %v5355_v12, %v5346_v63  ;;  %v1517_v36 = vmul.f32 %v1516_v13, %v1451_v34  ;;  %v1518_v59 = vmul.f32 %v1516_v13, %v1452_v17  ;;  %v4305_v58 = vsub.s32 5, %v5357_v41 }
 0x173   : >> { %5350 = vst [vmem:[#allocation30_spill] sm:$0xff] %v4290_v51  ;;  %5352 = vst [vmem:[#allocation31_spill] sm:$0xff] %v4294_v5  ;;  %v4308_v47 = vsub.s32 6, %v5357_v41  ;;  %v1519_v15 = vmul.f32 %v1516_v13, %v4221_v4  ;;  %v1520_v22 = vmul.f32 %v1516_v13, %v4224_v50  ;;  %v1521_v35 = vmul.f32 %v1516_v13, %v4227_v1 }
 0x174   : >> { %5354 = vst [vmem:[#allocation32_spill] sm:$0xff] %v4298_v57  ;;  %5356 = vst [vmem:[#allocation33_spill] sm:$0xff] %v4302_v2  ;;  %v1522_v16 = vmul.f32 %v1516_v13, %v4230_v62  ;;  %v1523_v34 = vmul.f32 %v1516_v13, %v4233_v32  ;;  %v1524_v17 = vmul.f32 %v1516_v13, %v4236_v49 }
 0x175   : >> { %5358 = vst [vmem:[#allocation34_spill] sm:$0xff] %v4305_v58  ;;  %5359 = vst [vmem:[#allocation35_spill] sm:$0xff] %v4308_v47  ;;  %v1525_v25 = vmul.f32 %v1516_v13, %v4239_v42  ;;  %v1526_v53 = vmul.f32 %v1516_v13, %v4242_v19  ;;  %v1527_v61 = vmul.f32 %v1516_v13, %v4245_v56 }
 0x176   : >> { %v1528_v38 = vmul.f32 %v1516_v13, %v4248_v8  ;;  %v1529_v24 = vmul.f32 %v1516_v13, %v4253_v27  ;;  %v1530_v43 = vmul.f32 %v1516_v13, %v4256_v52  ;;  %v1531_v10 = vmul.f32 %v1516_v13, %v4311_v29 }
 0x177   : >> { %v1532_v39 = vmul.f32 %v1516_v13, %v4314_v14  ;;  %v1533_v31 = vadd.f32 %v1517_v36, %v1497_v45  ;;  %v1534_v40 = vadd.f32 %v1518_v59, %v1498_v11  ;;  %v1535_v63 = vadd.f32 %v1519_v15, %v1499_v7  ;;  %v4333_v11 = vld [vmem:[%s3098_s8 + $0xdc] sm:$0xff]  ;;  %v4336_v7 = vld [vmem:[%s3098_s8 + $0xe4] sm:$0xff] }
 0x178   : >> { %v1536_v41 = vadd.f32 %v1520_v22, %v1500_v26  ;;  %v1537_v47 = vadd.f32 %v1521_v35, %v1501_v18  ;;  %v1538_v12 = vadd.f32 %v1522_v16, %v1502_v60  ;;  %v1539_v21 = vadd.f32 %v1523_v34, %v1503_v6 }
 0x179   : >> { %v1540_v48 = vadd.f32 %v1524_v17, %v1504_v0  ;;  %v1541_v33 = vadd.f32 %v1525_v25, %v1505_v30  ;;  %v1542_v9 = vadd.f32 %v1526_v53, %v1506_v37  ;;  %v1543_v44 = vadd.f32 %v1527_v61, %v1507_v28 }
 0x17a   : >> { %v1544_v58 = vadd.f32 %v1528_v38, %v1508_v55  ;;  %v1545_v2 = vadd.f32 %v1529_v24, %v1509_v46  ;;  %v1546_v57 = vadd.f32 %v1530_v43, %v1510_v54  ;;  %v1547_v5 = vadd.f32 %v1531_v10, %v1511_v3 }
 0x17b   : >> { %v1548_v51 = vadd.f32 %v1532_v39, %v1512_v23  ;;  %v1553_v13 = vmul.f32 %v1552_v20, %v4221_v4  ;;  %v1554_v45 = vmul.f32 %v1552_v20, %v4224_v50  ;;  %v1555_v26 = vmul.f32 %v1552_v20, %v4227_v1 }
 0x17c   : >> { %v1556_v18 = vmul.f32 %v1552_v20, %v4230_v62  ;;  %v1557_v60 = vmul.f32 %v1552_v20, %v4233_v32  ;;  %v1558_v6 = vmul.f32 %v1552_v20, %v4236_v49  ;;  %v1559_v0 = vmul.f32 %v1552_v20, %v4239_v42 }
 0x17d   : >> { %v1560_v30 = vmul.f32 %v1552_v20, %v4242_v19  ;;  %v1561_v4 = vmul.f32 %v1552_v20, %v4245_v56  ;;  %v1562_v50 = vmul.f32 %v1552_v20, %v4248_v8  ;;  %v1563_v37 = vmul.f32 %v1552_v20, %v4253_v27 }
 0x17e   : >> { %v1564_v28 = vmul.f32 %v1552_v20, %v4256_v52  ;;  %v1565_v55 = vmul.f32 %v1552_v20, %v4311_v29  ;;  %v1566_v46 = vmul.f32 %v1552_v20, %v4314_v14  ;;  %v1567_v54 = vmul.f32 %v1552_v20, %v4333_v11 }
 0x17f   : >> { %v1568_v3 = vmul.f32 %v1552_v20, %v4336_v7  ;;  %v1569_v23 = vadd.f32 %v1553_v13, %v1533_v31  ;;  %v1570_v36 = vadd.f32 %v1554_v45, %v1534_v40  ;;  %v1571_v59 = vadd.f32 %v1555_v26, %v1535_v63  ;;  %v5360_v20 = vld [vmem:[#allocation30_spill] sm:$0xff]  ;;  %v4357_v40 = vld [vmem:[%s3098_s8 + $0xf4] sm:$0xff] }
 0x180   : >> { %v1572_v15 = vadd.f32 %v1556_v18, %v1536_v41  ;;  %v1573_v22 = vadd.f32 %v1557_v60, %v1537_v47  ;;  %v1574_v35 = vadd.f32 %v1558_v6, %v1538_v12  ;;  %v1575_v16 = vadd.f32 %v1559_v0, %v1539_v21  ;;  %v4360_v47 = vld [vmem:[%s3098_s8 + $0xfc] sm:$0xff] }
 0x181   : >> { %v1576_v34 = vadd.f32 %v1560_v30, %v1540_v48  ;;  %v1577_v17 = vadd.f32 %v1561_v4, %v1541_v33  ;;  %v1578_v25 = vadd.f32 %v1562_v50, %v1542_v9  ;;  %v1579_v53 = vadd.f32 %v1563_v37, %v1543_v44 }
 0x182   : >> { %v1580_v61 = vadd.f32 %v1564_v28, %v1544_v58  ;;  %v1581_v38 = vadd.f32 %v1565_v55, %v1545_v2  ;;  %v1582_v24 = vadd.f32 %v1566_v46, %v1546_v57  ;;  %v1583_v43 = vadd.f32 %v1567_v54, %v1547_v5 }
 0x183   : >> { %v1584_v10 = vadd.f32 %v1568_v3, %v1548_v51  ;;  %v1589_v39 = vmul.f32 %v5360_v20, %v4227_v1  ;;  %v1590_v31 = vmul.f32 %v5360_v20, %v4230_v62  ;;  %v1591_v33 = vmul.f32 %v5360_v20, %v4233_v32  ;;  %v5361_v3 = vld [vmem:[#allocation31_spill] sm:$0xff] }
 0x184   : >> { %v1592_v44 = vmul.f32 %v5360_v20, %v4236_v49  ;;  %v1593_v9 = vmul.f32 %v5360_v20, %v4239_v42  ;;  %v1594_v51 = vmul.f32 %v5360_v20, %v4242_v19  ;;  %v1595_v1 = vmul.f32 %v5360_v20, %v4245_v56 }
 0x185   : >> { %v1596_v62 = vmul.f32 %v5360_v20, %v4248_v8  ;;  %v1597_v48 = vmul.f32 %v5360_v20, %v4253_v27  ;;  %v1598_v5 = vmul.f32 %v5360_v20, %v4256_v52  ;;  %v1599_v21 = vmul.f32 %v5360_v20, %v4311_v29 }
 0x186   : >> { %v1600_v57 = vmul.f32 %v5360_v20, %v4314_v14  ;;  %v1601_v12 = vmul.f32 %v5360_v20, %v4333_v11  ;;  %v1602_v2 = vmul.f32 %v5360_v20, %v4336_v7  ;;  %v1603_v58 = vmul.f32 %v5360_v20, %v4357_v40 }
 0x187   : >> { %v1604_v63 = vmul.f32 %v5360_v20, %v4360_v47  ;;  %v1605_v41 = vadd.f32 %v1589_v39, %v1569_v23  ;;  %v1606_v13 = vadd.f32 %v1590_v31, %v1570_v36  ;;  %v1607_v45 = vadd.f32 %v1591_v33, %v1571_v59  ;;  %v4395_v59 = vld [vmem:[%s3098_s8 + $0x10c] sm:$0xff] }
 0x188   : >> { %v1608_v26 = vadd.f32 %v1592_v44, %v1572_v15  ;;  %v1609_v18 = vadd.f32 %v1593_v9, %v1573_v22  ;;  %v1610_v60 = vadd.f32 %v1594_v51, %v1574_v35  ;;  %v1611_v6 = vadd.f32 %v1595_v1, %v1575_v16  ;;  %v4398_v15 = vld [vmem:[%s3098_s8 + $0x114] sm:$0xff] }
 0x189   : >> { %v1612_v0 = vadd.f32 %v1596_v62, %v1576_v34  ;;  %v1613_v30 = vadd.f32 %v1597_v48, %v1577_v17  ;;  %v1614_v4 = vadd.f32 %v1598_v5, %v1578_v25  ;;  %v1615_v50 = vadd.f32 %v1599_v21, %v1579_v53 }
 0x18a   : >> { %v1616_v37 = vadd.f32 %v1600_v57, %v1580_v61  ;;  %v1617_v28 = vadd.f32 %v1601_v12, %v1581_v38  ;;  %v1618_v55 = vadd.f32 %v1602_v2, %v1582_v24  ;;  %v1619_v46 = vadd.f32 %v1603_v58, %v1583_v43 }
 0x18b   : >> { %v1620_v54 = vadd.f32 %v1604_v63, %v1584_v10  ;;  %v1625_v23 = vmul.f32 %v5361_v3, %v4233_v32  ;;  %v1626_v36 = vmul.f32 %v5361_v3, %v4236_v49  ;;  %v1627_v22 = vmul.f32 %v5361_v3, %v4239_v42  ;;  %v5362_v63 = vld [vmem:[#allocation32_spill] sm:$0xff] }
 0x18c   : >> { %v1628_v35 = vmul.f32 %v5361_v3, %v4242_v19  ;;  %v1629_v16 = vmul.f32 %v5361_v3, %v4245_v56  ;;  %v1630_v34 = vmul.f32 %v5361_v3, %v4248_v8  ;;  %v1631_v32 = vmul.f32 %v5361_v3, %v4253_v27 }
 0x18d   : >> { %v1632_v49 = vmul.f32 %v5361_v3, %v4256_v52  ;;  %v1633_v17 = vmul.f32 %v5361_v3, %v4311_v29  ;;  %v1634_v25 = vmul.f32 %v5361_v3, %v4314_v14  ;;  %v1635_v53 = vmul.f32 %v5361_v3, %v4333_v11 }
 0x18e   : >> { %v1636_v61 = vmul.f32 %v5361_v3, %v4336_v7  ;;  %v1637_v38 = vmul.f32 %v5361_v3, %v4357_v40  ;;  %v1638_v24 = vmul.f32 %v5361_v3, %v4360_v47  ;;  %v1639_v43 = vmul.f32 %v5361_v3, %v4395_v59 }
 0x18f   : >> { %v1640_v10 = vmul.f32 %v5361_v3, %v4398_v15  ;;  %v1641_v20 = vadd.f32 %v1625_v23, %v1605_v41  ;;  %v1642_v39 = vadd.f32 %v1626_v36, %v1606_v13  ;;  %v1643_v31 = vadd.f32 %v1627_v22, %v1607_v45  ;;  %v1473_v45 = vld [vmem:[%s3098_s8 + $0x124] sm:$0xff] }
 0x190   : >> { %v1644_v33 = vadd.f32 %v1628_v35, %v1608_v26  ;;  %v1645_v44 = vadd.f32 %v1629_v16, %v1609_v18  ;;  %v1646_v9 = vadd.f32 %v1630_v34, %v1610_v60  ;;  %v1647_v51 = vadd.f32 %v1631_v32, %v1611_v6  ;;  %v1474_v26 = vld [vmem:[%s3098_s8 + $0x12c] sm:$0xff] }
 0x191   : >> { %v1648_v1 = vadd.f32 %v1632_v49, %v1612_v0  ;;  %v1649_v62 = vadd.f32 %v1633_v17, %v1613_v30  ;;  %v1650_v48 = vadd.f32 %v1634_v25, %v1614_v4  ;;  %v1651_v5 = vadd.f32 %v1635_v53, %v1615_v50 }
 0x192   : >> { %v1652_v21 = vadd.f32 %v1636_v61, %v1616_v37  ;;  %v1653_v57 = vadd.f32 %v1637_v38, %v1617_v28  ;;  %v1654_v12 = vadd.f32 %v1638_v24, %v1618_v55  ;;  %v1655_v2 = vadd.f32 %v1639_v43, %v1619_v46 }
 0x193   : >> { %v1656_v58 = vadd.f32 %v1640_v10, %v1620_v54  ;;  %v1661_v41 = vmul.f32 %v5362_v63, %v4239_v42  ;;  %v1662_v13 = vmul.f32 %v5362_v63, %v4242_v19  ;;  %v1663_v18 = vmul.f32 %v5362_v63, %v4245_v56  ;;  %v5363_v10 = vld [vmem:[#allocation33_spill] sm:$0xff] }
 0x194   : >> { %v1664_v60 = vmul.f32 %v5362_v63, %v4248_v8  ;;  %v1665_v6 = vmul.f32 %v5362_v63, %v4253_v27  ;;  %v1666_v0 = vmul.f32 %v5362_v63, %v4256_v52  ;;  %v1667_v42 = vmul.f32 %v5362_v63, %v4311_v29 }
 0x195   : >> { %v1668_v19 = vmul.f32 %v5362_v63, %v4314_v14  ;;  %v1669_v30 = vmul.f32 %v5362_v63, %v4333_v11  ;;  %v1670_v4 = vmul.f32 %v5362_v63, %v4336_v7  ;;  %v1671_v50 = vmul.f32 %v5362_v63, %v4357_v40 }
 0x196   : >> { %v1672_v37 = vmul.f32 %v5362_v63, %v4360_v47  ;;  %v1673_v28 = vmul.f32 %v5362_v63, %v4395_v59  ;;  %v1674_v55 = vmul.f32 %v5362_v63, %v4398_v15  ;;  %v1675_v46 = vmul.f32 %v5362_v63, %v1473_v45 }
 0x197   : >> { %v1676_v54 = vmul.f32 %v5362_v63, %v1474_v26  ;;  %v1677_v3 = vadd.f32 %v1661_v41, %v1641_v20  ;;  %v1678_v23 = vadd.f32 %v1662_v13, %v1642_v39  ;;  %v1679_v36 = vadd.f32 %v1663_v18, %v1643_v31  ;;  %v1475_v31 = vld [vmem:[%s3098_s8 + $0x13c] sm:$0xff]  ;;  %v1729_v63 = vld [vmem:[%s3098_s8 + $0x5] sm:$0xff]  ;;  %v1730_v41 = vld [vmem:[%s3098_s8 + $0xd] sm:$0xff] }
 0x198   : >> { %v1680_v22 = vadd.f32 %v1664_v60, %v1644_v33  ;;  %v1681_v35 = vadd.f32 %v1665_v6, %v1645_v44  ;;  %v1682_v16 = vadd.f32 %v1666_v0, %v1646_v9  ;;  %v1683_v34 = vadd.f32 %v1667_v42, %v1647_v51  ;;  %v1476_v33 = vld [vmem:[%s3098_s8 + $0x144] sm:$0xff]  ;;  %v4495_v0 = vld [vmem:[%s3098_s8 + $0x35] sm:$0xff] }
 0x199   : >> { %v1684_v32 = vadd.f32 %v1668_v19, %v1648_v1  ;;  %v1685_v49 = vadd.f32 %v1669_v30, %v1649_v62  ;;  %v1686_v17 = vadd.f32 %v1670_v4, %v1650_v48  ;;  %v1687_v25 = vadd.f32 %v1671_v50, %v1651_v5  ;;  %v1731_v60 = vld [vmem:[%s3098_s8 + $0x1d] sm:$0xff]  ;;  %v1732_v6 = vld [vmem:[%s3098_s8 + $0x25] sm:$0xff]  ;;  %v4501_v4 = vld [vmem:[%s3098_s8 + $0x4d] sm:$0xff] }
 0x19a   : >> { %v1688_v53 = vadd.f32 %v1672_v37, %v1652_v21  ;;  %v1689_v61 = vadd.f32 %v1673_v28, %v1653_v57  ;;  %v1690_v38 = vadd.f32 %v1674_v55, %v1654_v12  ;;  %v1691_v24 = vadd.f32 %v1675_v46, %v1655_v2  ;;  %v4498_v30 = vld [vmem:[%s3098_s8 + $0x3d] sm:$0xff]  ;;  %v4504_v50 = vld [vmem:[%s3098_s8 + $0x55] sm:$0xff]  ;;  %v5364_v37 = vld [vmem:[#allocation34_spill] sm:$0xff] }
 0x19b   : >> { %v1692_v43 = vadd.f32 %v1676_v54, %v1656_v58  ;;  %v1697_v20 = vmul.f32 %v5363_v10, %v4245_v56  ;;  %v1698_v39 = vmul.f32 %v5363_v10, %v4248_v8  ;;  %v1699_v44 = vmul.f32 %v5363_v10, %v4253_v27  ;;  %v5365_v28 = vld [vmem:[#allocation21_spill] sm:$0xff]  ;;  %v5366_v46 = vld [vmem:[#allocation22_spill] sm:$0xff] }
 0x19c   : >> { %v1700_v9 = vmul.f32 %v5363_v10, %v4256_v52  ;;  %v1701_v51 = vmul.f32 %v5363_v10, %v4311_v29  ;;  %v1702_v1 = vmul.f32 %v5363_v10, %v4314_v14  ;;  %v1703_v56 = vmul.f32 %v5363_v10, %v4333_v11 }
 0x19d   : >> { %v1704_v8 = vmul.f32 %v5363_v10, %v4336_v7  ;;  %v1705_v62 = vmul.f32 %v5363_v10, %v4357_v40  ;;  %v1706_v27 = vmul.f32 %v5363_v10, %v4360_v47  ;;  %v1707_v52 = vmul.f32 %v5363_v10, %v4395_v59 }
 0x19e   : >> { %v1708_v29 = vmul.f32 %v5363_v10, %v4398_v15  ;;  %v1709_v14 = vmul.f32 %v5363_v10, %v1473_v45  ;;  %v1710_v11 = vmul.f32 %v5363_v10, %v1474_v26  ;;  %v1711_v7 = vmul.f32 %v5363_v10, %v1475_v31 }
 0x19f   : >> { %v1712_v48 = vmul.f32 %v5363_v10, %v1476_v33  ;;  %v1713_v40 = vadd.f32 %v1697_v20, %v1677_v3  ;;  %v1714_v5 = vadd.f32 %v1698_v39, %v1678_v23  ;;  %v1715_v47 = vadd.f32 %v1699_v44, %v1679_v36  ;;  %v4513_v3 = vld [vmem:[%s3098_s8 + $0x65] sm:$0xff]  ;;  %v4516_v23 = vld [vmem:[%s3098_s8 + $0x6d] sm:$0xff]  ;;  %v4519_v36 = vld [vmem:[%s3098_s8 + $0x7d] sm:$0xff] }
 0x1a0   : >> { %v1716_v59 = vadd.f32 %v1700_v9, %v1680_v22  ;;  %v1717_v21 = vadd.f32 %v1701_v51, %v1681_v35  ;;  %v1718_v57 = vadd.f32 %v1702_v1, %v1682_v16  ;;  %v1719_v15 = vadd.f32 %v1703_v56, %v1683_v34  ;;  %v5367_v22 = vld [vmem:[#allocation23_spill] sm:$0xff]  ;;  %v5369_v16 = vld [vmem:[#allocation24_spill] sm:$0xff] }
 0x1a1   : >> { %v1720_v12 = vadd.f32 %v1704_v8, %v1684_v32  ;;  %v1721_v2 = vadd.f32 %v1705_v62, %v1685_v49  ;;  %v1722_v58 = vadd.f32 %v1706_v27, %v1686_v17  ;;  %v1723_v13 = vadd.f32 %v1707_v52, %v1687_v25  ;;  %v5371_v32 = vld [vmem:[#allocation25_spill] sm:$0xff]  ;;  %v5373_v17 = vld [vmem:[#allocation26_spill] sm:$0xff]  ;;  %v5375_v10 = vld [vmem:[#allocation27_spill] sm:$0xff] }
 0x1a2   : >> { %v1724_v45 = vadd.f32 %v1708_v29, %v1688_v53  ;;  %v1725_v26 = vadd.f32 %v1709_v14, %v1689_v61  ;;  %v1726_v18 = vadd.f32 %v1710_v11, %v1690_v38  ;;  %v1727_v42 = vadd.f32 %v1711_v7, %v1691_v24  ;;  %v4538_v53 = vld [vmem:[%s3098_s8 + $0x85] sm:$0xff]  ;;  %v4541_v61 = vld [vmem:[%s3098_s8 + $0x95] sm:$0xff]  ;;  %v4544_v38 = vld [vmem:[%s3098_s8 + $0x9d] sm:$0xff] }
 0x1a3   : >> { %v1728_v19 = vadd.f32 %v1712_v48, %v1692_v43  ;;  %v1760_v55 = vrot.slane %v5365_v28, %v5364_v37  ;;  %v4510_v54 = vrot.slane %v5366_v46, %v5364_v37  ;;  %v4523_v35 = vrot.slane %v5367_v22, %v5364_v37  ;;  %v5377_v39 = vld [vmem:[#allocation35_spill] sm:$0xff] }
 0x1a4   : >> { %v4527_v34 = vrot.slane %v5369_v16, %v5364_v37  ;;  %v4531_v49 = vrot.slane %v5371_v32, %v5364_v37  ;;  %v4535_v25 = vrot.slane %v5373_v17, %v5364_v37  ;;  %v4548_v20 = vrot.slane %v5375_v10, %v5364_v37  ;;  %v4555_v33 = vld [vmem:[%s3098_s8 + $0xad] sm:$0xff]  ;;  %v4558_v44 = vld [vmem:[%s3098_s8 + $0xb5] sm:$0xff] }
 0x1a5   : >> { %5368 = vst [vmem:[#allocation36_spill] sm:$0xff] %v4523_v35  ;;  %v1761_v24 = vmul.f32 %v1760_v55, %v1729_v63  ;;  %v1762_v43 = vmul.f32 %v1760_v55, %v1730_v41  ;;  %v4552_v31 = vrot.slane %v5365_v28, %v5377_v39  ;;  %v1763_v9 = vmul.f32 %v1760_v55, %v1731_v60 }
 0x1a6   : >> { %5370 = vst [vmem:[#allocation29_spill] sm:$0xff] %v4527_v34  ;;  %5372 = vst [vmem:[#allocation30_spill] sm:$0xff] %v4531_v49  ;;  %v1764_v51 = vmul.f32 %v1760_v55, %v1732_v6  ;;  %v1765_v1 = vmul.f32 %v1760_v55, %v4495_v0  ;;  %v1766_v56 = vmul.f32 %v1760_v55, %v4498_v30 }
 0x1a7   : >> { %5374 = vst [vmem:[#allocation31_spill] sm:$0xff] %v4535_v25  ;;  %5376 = vst [vmem:[#allocation32_spill] sm:$0xff] %v4548_v20  ;;  %v1767_v8 = vmul.f32 %v1760_v55, %v4501_v4  ;;  %v1768_v62 = vmul.f32 %v1760_v55, %v4504_v50  ;;  %v1769_v27 = vmul.f32 %v1760_v55, %v4513_v3 }
 0x1a8   : >> { %5378 = vst [vmem:[#allocation33_spill] sm:$0xff] %v4552_v31  ;;  %v1770_v52 = vmul.f32 %v1760_v55, %v4516_v23  ;;  %v1771_v29 = vmul.f32 %v1760_v55, %v4519_v36  ;;  %v1772_v14 = vmul.f32 %v1760_v55, %v4538_v53  ;;  %v1773_v11 = vmul.f32 %v1760_v55, %v4541_v61 }
 0x1a9   : >> { %v1774_v7 = vmul.f32 %v1760_v55, %v4544_v38  ;;  %v1775_v48 = vmul.f32 %v1760_v55, %v4555_v33  ;;  %v1776_v63 = vmul.f32 %v1760_v55, %v4558_v44  ;;  %v1777_v41 = vadd.f32 %v1761_v24, %v1713_v40 }
 0x1aa   : >> { %v1778_v37 = vadd.f32 %v1762_v43, %v1714_v5  ;;  %v1779_v28 = vadd.f32 %v1763_v9, %v1715_v47  ;;  %v1780_v10 = vadd.f32 %v1764_v51, %v1716_v59  ;;  %v1781_v17 = vadd.f32 %v1765_v1, %v1717_v21  ;;  %v4575_v5 = vld [vmem:[%s3098_s8 + $0xc5] sm:$0xff]  ;;  %v4578_v47 = vld [vmem:[%s3098_s8 + $0xcd] sm:$0xff] }
 0x1ab   : >> { %v1782_v32 = vadd.f32 %v1766_v56, %v1718_v57  ;;  %v1783_v16 = vadd.f32 %v1767_v8, %v1719_v15  ;;  %v1784_v22 = vadd.f32 %v1768_v62, %v1720_v12  ;;  %v1785_v46 = vadd.f32 %v1769_v27, %v1721_v2 }
 0x1ac   : >> { %v1786_v39 = vadd.f32 %v1770_v52, %v1722_v58  ;;  %v1787_v31 = vadd.f32 %v1771_v29, %v1723_v13  ;;  %v1788_v20 = vadd.f32 %v1772_v14, %v1724_v45  ;;  %v1789_v25 = vadd.f32 %v1773_v11, %v1725_v26 }
 0x1ad   : >> { %v1790_v49 = vadd.f32 %v1774_v7, %v1726_v18  ;;  %v1791_v34 = vadd.f32 %v1775_v48, %v1727_v42  ;;  %v1792_v35 = vadd.f32 %v1776_v63, %v1728_v19  ;;  %v1797_v55 = vmul.f32 %v4510_v54, %v1731_v60 }
 0x1ae   : >> { %v1798_v40 = vmul.f32 %v4510_v54, %v1732_v6  ;;  %v1799_v59 = vmul.f32 %v4510_v54, %v4495_v0  ;;  %v1800_v21 = vmul.f32 %v4510_v54, %v4498_v30  ;;  %v1801_v57 = vmul.f32 %v4510_v54, %v4501_v4 }
 0x1af   : >> { %v1802_v15 = vmul.f32 %v4510_v54, %v4504_v50  ;;  %v1803_v12 = vmul.f32 %v4510_v54, %v4513_v3  ;;  %v1804_v2 = vmul.f32 %v4510_v54, %v4516_v23  ;;  %v1805_v58 = vmul.f32 %v4510_v54, %v4519_v36 }
 0x1b0   : >> { %v1806_v13 = vmul.f32 %v4510_v54, %v4538_v53  ;;  %v1807_v45 = vmul.f32 %v4510_v54, %v4541_v61  ;;  %v1808_v26 = vmul.f32 %v4510_v54, %v4544_v38  ;;  %v1809_v18 = vmul.f32 %v4510_v54, %v4555_v33 }
 0x1b1   : >> { %v1810_v60 = vmul.f32 %v4510_v54, %v4558_v44  ;;  %v1811_v6 = vmul.f32 %v4510_v54, %v4575_v5  ;;  %v1812_v42 = vmul.f32 %v4510_v54, %v4578_v47  ;;  %v1813_v19 = vadd.f32 %v1797_v55, %v1777_v41  ;;  %v5379_v54 = vld [vmem:[#allocation36_spill] sm:$0xff] }
 0x1b2   : >> { %v1814_v24 = vadd.f32 %v1798_v40, %v1778_v37  ;;  %v1815_v43 = vadd.f32 %v1799_v59, %v1779_v28  ;;  %v1816_v9 = vadd.f32 %v1800_v21, %v1780_v10  ;;  %v1817_v51 = vadd.f32 %v1801_v57, %v1781_v17  ;;  %v4613_v10 = vld [vmem:[%s3098_s8 + $0xdd] sm:$0xff]  ;;  %v4616_v17 = vld [vmem:[%s3098_s8 + $0xe5] sm:$0xff] }
 0x1b3   : >> { %v1818_v1 = vadd.f32 %v1802_v15, %v1782_v32  ;;  %v1819_v56 = vadd.f32 %v1803_v12, %v1783_v16  ;;  %v1820_v8 = vadd.f32 %v1804_v2, %v1784_v22  ;;  %v1821_v62 = vadd.f32 %v1805_v58, %v1785_v46 }
 0x1b4   : >> { %v1822_v27 = vadd.f32 %v1806_v13, %v1786_v39  ;;  %v1823_v52 = vadd.f32 %v1807_v45, %v1787_v31  ;;  %v1824_v29 = vadd.f32 %v1808_v26, %v1788_v20  ;;  %v1825_v14 = vadd.f32 %v1809_v18, %v1789_v25 }
 0x1b5   : >> { %v1826_v11 = vadd.f32 %v1810_v60, %v1790_v49  ;;  %v1827_v7 = vadd.f32 %v1811_v6, %v1791_v34  ;;  %v1828_v48 = vadd.f32 %v1812_v42, %v1792_v35  ;;  %v1833_v63 = vmul.f32 %v5379_v54, %v4495_v0  ;;  %v5380_v42 = vld [vmem:[#allocation29_spill] sm:$0xff] }
 0x1b6   : >> { %v1834_v41 = vmul.f32 %v5379_v54, %v4498_v30  ;;  %v1835_v46 = vmul.f32 %v5379_v54, %v4501_v4  ;;  %v1836_v22 = vmul.f32 %v5379_v54, %v4504_v50  ;;  %v1837_v16 = vmul.f32 %v5379_v54, %v4513_v3 }
 0x1b7   : >> { %v1838_v35 = vmul.f32 %v5379_v54, %v4516_v23  ;;  %v1839_v0 = vmul.f32 %v5379_v54, %v4519_v36  ;;  %v1840_v30 = vmul.f32 %v5379_v54, %v4538_v53  ;;  %v1841_v34 = vmul.f32 %v5379_v54, %v4541_v61 }
 0x1b8   : >> { %v1842_v32 = vmul.f32 %v5379_v54, %v4544_v38  ;;  %v1843_v49 = vmul.f32 %v5379_v54, %v4555_v33  ;;  %v1844_v25 = vmul.f32 %v5379_v54, %v4558_v44  ;;  %v1845_v20 = vmul.f32 %v5379_v54, %v4575_v5 }
 0x1b9   : >> { %v1846_v39 = vmul.f32 %v5379_v54, %v4578_v47  ;;  %v1847_v31 = vmul.f32 %v5379_v54, %v4613_v10  ;;  %v1848_v37 = vmul.f32 %v5379_v54, %v4616_v17  ;;  %v1849_v28 = vadd.f32 %v1833_v63, %v1813_v19 }
 0x1ba   : >> { %v1850_v55 = vadd.f32 %v1834_v41, %v1814_v24  ;;  %v1851_v40 = vadd.f32 %v1835_v46, %v1815_v43  ;;  %v1852_v59 = vadd.f32 %v1836_v22, %v1816_v9  ;;  %v1853_v21 = vadd.f32 %v1837_v16, %v1817_v51  ;;  %v4651_v43 = vld [vmem:[%s3098_s8 + $0xf5] sm:$0xff]  ;;  %v4654_v9 = vld [vmem:[%s3098_s8 + $0xfd] sm:$0xff] }
 0x1bb   : >> { %v1854_v57 = vadd.f32 %v1838_v35, %v1818_v1  ;;  %v1855_v15 = vadd.f32 %v1839_v0, %v1819_v56  ;;  %v1856_v12 = vadd.f32 %v1840_v30, %v1820_v8  ;;  %v1857_v2 = vadd.f32 %v1841_v34, %v1821_v62 }
 0x1bc   : >> { %v1858_v58 = vadd.f32 %v1842_v32, %v1822_v27  ;;  %v1859_v13 = vadd.f32 %v1843_v49, %v1823_v52  ;;  %v1860_v45 = vadd.f32 %v1844_v25, %v1824_v29  ;;  %v1861_v26 = vadd.f32 %v1845_v20, %v1825_v14 }
 0x1bd   : >> { %v1862_v18 = vadd.f32 %v1846_v39, %v1826_v11  ;;  %v1863_v60 = vadd.f32 %v1847_v31, %v1827_v7  ;;  %v1864_v6 = vadd.f32 %v1848_v37, %v1828_v48  ;;  %v1869_v19 = vmul.f32 %v5380_v42, %v4501_v4  ;;  %v5381_v37 = vld [vmem:[#allocation30_spill] sm:$0xff] }
 0x1be   : >> { %v1870_v24 = vmul.f32 %v5380_v42, %v4504_v50  ;;  %v1871_v51 = vmul.f32 %v5380_v42, %v4513_v3  ;;  %v1872_v1 = vmul.f32 %v5380_v42, %v4516_v23  ;;  %v1873_v56 = vmul.f32 %v5380_v42, %v4519_v36 }
 0x1bf   : >> { %v1874_v8 = vmul.f32 %v5380_v42, %v4538_v53  ;;  %v1875_v4 = vmul.f32 %v5380_v42, %v4541_v61  ;;  %v1876_v50 = vmul.f32 %v5380_v42, %v4544_v38  ;;  %v1877_v62 = vmul.f32 %v5380_v42, %v4555_v33 }
 0x1c0   : >> { %v1878_v27 = vmul.f32 %v5380_v42, %v4558_v44  ;;  %v1879_v52 = vmul.f32 %v5380_v42, %v4575_v5  ;;  %v1880_v29 = vmul.f32 %v5380_v42, %v4578_v47  ;;  %v1881_v14 = vmul.f32 %v5380_v42, %v4613_v10 }
 0x1c1   : >> { %v1882_v11 = vmul.f32 %v5380_v42, %v4616_v17  ;;  %v1883_v7 = vmul.f32 %v5380_v42, %v4651_v43  ;;  %v1884_v48 = vmul.f32 %v5380_v42, %v4654_v9  ;;  %v1885_v54 = vadd.f32 %v1869_v19, %v1849_v28 }
 0x1c2   : >> { %v1886_v63 = vadd.f32 %v1870_v24, %v1850_v55  ;;  %v1887_v41 = vadd.f32 %v1871_v51, %v1851_v40  ;;  %v1888_v46 = vadd.f32 %v1872_v1, %v1852_v59  ;;  %v1889_v22 = vadd.f32 %v1873_v56, %v1853_v21  ;;  %v4689_v40 = vld [vmem:[%s3098_s8 + $0x10d] sm:$0xff]  ;;  %v4692_v59 = vld [vmem:[%s3098_s8 + $0x115] sm:$0xff] }
 0x1c3   : >> { %v1890_v16 = vadd.f32 %v1874_v8, %v1854_v57  ;;  %v1891_v35 = vadd.f32 %v1875_v4, %v1855_v15  ;;  %v1892_v0 = vadd.f32 %v1876_v50, %v1856_v12  ;;  %v1893_v30 = vadd.f32 %v1877_v62, %v1857_v2 }
 0x1c4   : >> { %v1894_v34 = vadd.f32 %v1878_v27, %v1858_v58  ;;  %v1895_v32 = vadd.f32 %v1879_v52, %v1859_v13  ;;  %v1896_v49 = vadd.f32 %v1880_v29, %v1860_v45  ;;  %v1897_v25 = vadd.f32 %v1881_v14, %v1861_v26 }
 0x1c5   : >> { %v1898_v20 = vadd.f32 %v1882_v11, %v1862_v18  ;;  %v1899_v39 = vadd.f32 %v1883_v7, %v1863_v60  ;;  %v1900_v31 = vadd.f32 %v1884_v48, %v1864_v6  ;;  %v1905_v28 = vmul.f32 %v5381_v37, %v4513_v3  ;;  %v5382_v48 = vld [vmem:[#allocation31_spill] sm:$0xff] }
 0x1c6   : >> { %v1906_v55 = vmul.f32 %v5381_v37, %v4516_v23  ;;  %v1907_v21 = vmul.f32 %v5381_v37, %v4519_v36  ;;  %v1908_v57 = vmul.f32 %v5381_v37, %v4538_v53  ;;  %v1909_v15 = vmul.f32 %v5381_v37, %v4541_v61 }
 0x1c7   : >> { %v1910_v12 = vmul.f32 %v5381_v37, %v4544_v38  ;;  %v1911_v3 = vmul.f32 %v5381_v37, %v4555_v33  ;;  %v1912_v23 = vmul.f32 %v5381_v37, %v4558_v44  ;;  %v1913_v2 = vmul.f32 %v5381_v37, %v4575_v5 }
 0x1c8   : >> { %v1914_v58 = vmul.f32 %v5381_v37, %v4578_v47  ;;  %v1915_v13 = vmul.f32 %v5381_v37, %v4613_v10  ;;  %v1916_v45 = vmul.f32 %v5381_v37, %v4616_v17  ;;  %v1917_v26 = vmul.f32 %v5381_v37, %v4651_v43 }
 0x1c9   : >> { %v1918_v18 = vmul.f32 %v5381_v37, %v4654_v9  ;;  %v1919_v60 = vmul.f32 %v5381_v37, %v4689_v40  ;;  %v1920_v6 = vmul.f32 %v5381_v37, %v4692_v59  ;;  %v1921_v42 = vadd.f32 %v1905_v28, %v1885_v54 }
 0x1ca   : >> { %v1922_v19 = vadd.f32 %v1906_v55, %v1886_v63  ;;  %v1923_v24 = vadd.f32 %v1907_v21, %v1887_v41  ;;  %v1924_v51 = vadd.f32 %v1908_v57, %v1888_v46  ;;  %v1925_v1 = vadd.f32 %v1909_v15, %v1889_v22  ;;  %v1753_v41 = vld [vmem:[%s3098_s8 + $0x125] sm:$0xff]  ;;  %v1754_v46 = vld [vmem:[%s3098_s8 + $0x12d] sm:$0xff] }
 0x1cb   : >> { %v1926_v56 = vadd.f32 %v1910_v12, %v1890_v16  ;;  %v1927_v8 = vadd.f32 %v1911_v3, %v1891_v35  ;;  %v1928_v4 = vadd.f32 %v1912_v23, %v1892_v0  ;;  %v1929_v50 = vadd.f32 %v1913_v2, %v1893_v30 }
 0x1cc   : >> { %v1930_v62 = vadd.f32 %v1914_v58, %v1894_v34  ;;  %v1931_v27 = vadd.f32 %v1915_v13, %v1895_v32  ;;  %v1932_v52 = vadd.f32 %v1916_v45, %v1896_v49  ;;  %v1933_v29 = vadd.f32 %v1917_v26, %v1897_v25 }
 0x1cd   : >> { %v1934_v14 = vadd.f32 %v1918_v18, %v1898_v20  ;;  %v1935_v11 = vadd.f32 %v1919_v60, %v1899_v39  ;;  %v1936_v7 = vadd.f32 %v1920_v6, %v1900_v31  ;;  %v1941_v54 = vmul.f32 %v5382_v48, %v4519_v36  ;;  %v5383_v6 = vld [vmem:[#allocation32_spill] sm:$0xff] }
 0x1ce   : >> { %v1942_v63 = vmul.f32 %v5382_v48, %v4538_v53  ;;  %v1943_v22 = vmul.f32 %v5382_v48, %v4541_v61  ;;  %v1944_v16 = vmul.f32 %v5382_v48, %v4544_v38  ;;  %v1945_v35 = vmul.f32 %v5382_v48, %v4555_v33 }
 0x1cf   : >> { %v1946_v0 = vmul.f32 %v5382_v48, %v4558_v44  ;;  %v1947_v36 = vmul.f32 %v5382_v48, %v4575_v5  ;;  %v1948_v53 = vmul.f32 %v5382_v48, %v4578_v47  ;;  %v1949_v30 = vmul.f32 %v5382_v48, %v4613_v10 }
 0x1d0   : >> { %v1950_v34 = vmul.f32 %v5382_v48, %v4616_v17  ;;  %v1951_v32 = vmul.f32 %v5382_v48, %v4651_v43  ;;  %v1952_v49 = vmul.f32 %v5382_v48, %v4654_v9  ;;  %v1953_v25 = vmul.f32 %v5382_v48, %v4689_v40 }
 0x1d1   : >> { %v1954_v20 = vmul.f32 %v5382_v48, %v4692_v59  ;;  %v1955_v39 = vmul.f32 %v5382_v48, %v1753_v41  ;;  %v1956_v31 = vmul.f32 %v5382_v48, %v1754_v46  ;;  %v1957_v37 = vadd.f32 %v1941_v54, %v1921_v42  ;;  %v4793_v48 = vld [vmem:[%s3098_s8 + $0x36] sm:$0xff] }
 0x1d2   : >> { %v1958_v28 = vadd.f32 %v1942_v63, %v1922_v19  ;;  %v1959_v55 = vadd.f32 %v1943_v22, %v1923_v24  ;;  %v1960_v21 = vadd.f32 %v1944_v16, %v1924_v51  ;;  %v1961_v57 = vadd.f32 %v1945_v35, %v1925_v1  ;;  %v1755_v24 = vld [vmem:[%s3098_s8 + $0x13d] sm:$0xff]  ;;  %v1756_v51 = vld [vmem:[%s3098_s8 + $0x145] sm:$0xff]  ;;  %v4799_v16 = vld [vmem:[%s3098_s8 + $0x4e] sm:$0xff] }
 0x1d3   : >> { %v1962_v15 = vadd.f32 %v1946_v0, %v1926_v56  ;;  %v1963_v12 = vadd.f32 %v1947_v36, %v1927_v8  ;;  %v1964_v3 = vadd.f32 %v1948_v53, %v1928_v4  ;;  %v1965_v23 = vadd.f32 %v1949_v30, %v1929_v50  ;;  %v4796_v22 = vld [vmem:[%s3098_s8 + $0x3e] sm:$0xff]  ;;  %v4802_v35 = vld [vmem:[%s3098_s8 + $0x56] sm:$0xff] }
 0x1d4   : >> { %v1966_v2 = vadd.f32 %v1950_v34, %v1930_v62  ;;  %v1967_v58 = vadd.f32 %v1951_v32, %v1931_v27  ;;  %v1968_v13 = vadd.f32 %v1952_v49, %v1932_v52  ;;  %v1969_v45 = vadd.f32 %v1953_v25, %v1933_v29  ;;  %v2009_v27 = vld [vmem:[%s3098_s8 + $0x6] sm:$0xff]  ;;  %v2010_v52 = vld [vmem:[%s3098_s8 + $0xe] sm:$0xff]  ;;  %v4811_v49 = vld [vmem:[%s3098_s8 + $0x7e] sm:$0xff] }
 0x1d5   : >> { %v1970_v26 = vadd.f32 %v1954_v20, %v1934_v14  ;;  %v1971_v18 = vadd.f32 %v1955_v39, %v1935_v11  ;;  %v1972_v60 = vadd.f32 %v1956_v31, %v1936_v7  ;;  %v1977_v42 = vmul.f32 %v5383_v6, %v4541_v61  ;;  %v4787_v11 = vld [vmem:[%s3098_s8 + $0x1e] sm:$0xff]  ;;  %v4790_v7 = vld [vmem:[%s3098_s8 + $0x26] sm:$0xff]  ;;  %v4808_v32 = vld [vmem:[%s3098_s8 + $0x6e] sm:$0xff] }
 0x1d6   : >> { %v1978_v19 = vmul.f32 %v5383_v6, %v4544_v38  ;;  %v1979_v1 = vmul.f32 %v5383_v6, %v4555_v33  ;;  %v1980_v56 = vmul.f32 %v5383_v6, %v4558_v44  ;;  %v1981_v8 = vmul.f32 %v5383_v6, %v4575_v5  ;;  %v4805_v34 = vld [vmem:[%s3098_s8 + $0x66] sm:$0xff]  ;;  %v4817_v31 = vld [vmem:[%s3098_s8 + $0x96] sm:$0xff] }
 0x1d7   : >> { %v1982_v4 = vmul.f32 %v5383_v6, %v4578_v47  ;;  %v1983_v61 = vmul.f32 %v5383_v6, %v4613_v10  ;;  %v1984_v38 = vmul.f32 %v5383_v6, %v4616_v17  ;;  %v1985_v33 = vmul.f32 %v5383_v6, %v4651_v43  ;;  %v4814_v39 = vld [vmem:[%s3098_s8 + $0x86] sm:$0xff] }
 0x1d8   : >> { %v1986_v44 = vmul.f32 %v5383_v6, %v4654_v9  ;;  %v1987_v5 = vmul.f32 %v5383_v6, %v4689_v40  ;;  %v1988_v47 = vmul.f32 %v5383_v6, %v4692_v59  ;;  %v1989_v10 = vmul.f32 %v5383_v6, %v1753_v41 }
 0x1d9   : >> { %v1990_v50 = vmul.f32 %v5383_v6, %v1754_v46  ;;  %v1991_v17 = vmul.f32 %v5383_v6, %v1755_v24  ;;  %v1992_v43 = vmul.f32 %v5383_v6, %v1756_v51  ;;  %v1993_v62 = vadd.f32 %v1977_v42, %v1957_v37  ;;  %v4820_v37 = vld [vmem:[%s3098_s8 + $0x9e] sm:$0xff] }
 0x1da   : >> { %v1994_v9 = vadd.f32 %v1978_v19, %v1958_v28  ;;  %v1995_v40 = vadd.f32 %v1979_v1, %v1959_v55  ;;  %v1996_v29 = vadd.f32 %v1980_v56, %v1960_v21  ;;  %v1997_v14 = vadd.f32 %v1981_v8, %v1961_v57  ;;  %v5384_v28 = vld [vmem:[#allocation33_spill] sm:$0xff]  ;;  %v4825_v57 = vld [vmem:[%s3098_s8 + $0xae] sm:$0xff] }
 0x1db   : >> { %v1998_v59 = vadd.f32 %v1982_v4, %v1962_v15  ;;  %v1999_v54 = vadd.f32 %v1983_v61, %v1963_v12  ;;  %v2000_v63 = vadd.f32 %v1984_v38, %v1964_v3  ;;  %v2001_v41 = vadd.f32 %v1985_v33, %v1965_v23  ;;  %v4828_v15 = vld [vmem:[%s3098_s8 + $0xb6] sm:$0xff] }
 0x1dc   : >> { %v2002_v46 = vadd.f32 %v1986_v44, %v1966_v2  ;;  %v2003_v0 = vadd.f32 %v1987_v5, %v1967_v58  ;;  %v2004_v36 = vadd.f32 %v1988_v47, %v1968_v13  ;;  %v2005_v53 = vadd.f32 %v1989_v10, %v1969_v45 }
 0x1dd   : >> { %v2006_v30 = vadd.f32 %v1990_v50, %v1970_v26  ;;  %v2007_v25 = vadd.f32 %v1991_v17, %v1971_v18  ;;  %v2008_v20 = vadd.f32 %v1992_v43, %v1972_v60  ;;  %v2041_v55 = vmul.f32 %v5384_v28, %v2009_v27 }
 0x1de   : >> { %v2042_v21 = vmul.f32 %v5384_v28, %v2010_v52  ;;  %v2043_v12 = vmul.f32 %v5384_v28, %v4787_v11  ;;  %v2044_v3 = vmul.f32 %v5384_v28, %v4790_v7  ;;  %v2045_v23 = vmul.f32 %v5384_v28, %v4793_v48  ;;  %v5385_v52 = vld [vmem:[#allocation35_spill] sm:$0xff] }
 0x1df   : >> { %v2046_v2 = vmul.f32 %v5384_v28, %v4796_v22  ;;  %v2047_v58 = vmul.f32 %v5384_v28, %v4799_v16  ;;  %v2048_v13 = vmul.f32 %v5384_v28, %v4802_v35  ;;  %v2049_v45 = vmul.f32 %v5384_v28, %v4805_v34 }
 0x1e0   : >> { %v2050_v26 = vmul.f32 %v5384_v28, %v4808_v32  ;;  %v2051_v18 = vmul.f32 %v5384_v28, %v4811_v49  ;;  %v2052_v60 = vmul.f32 %v5384_v28, %v4814_v39  ;;  %v2053_v6 = vmul.f32 %v5384_v28, %v4817_v31 }
 0x1e1   : >> { %v2054_v42 = vmul.f32 %v5384_v28, %v4820_v37  ;;  %v2055_v19 = vmul.f32 %v5384_v28, %v4825_v57  ;;  %v2056_v24 = vmul.f32 %v5384_v28, %v4828_v15  ;;  %v2057_v51 = vadd.f32 %v2041_v55, %v1993_v62  ;;  %v5386_v28 = vld [vmem:[#allocation22_spill] sm:$0xff] }
 0x1e2   : >> { %v2058_v1 = vadd.f32 %v2042_v21, %v1994_v9  ;;  %v2059_v56 = vadd.f32 %v2043_v12, %v1995_v40  ;;  %v2060_v8 = vadd.f32 %v2044_v3, %v1996_v29  ;;  %v2061_v4 = vadd.f32 %v2045_v23, %v1997_v14  ;;  %v5387_v9 = vld [vmem:[#allocation23_spill] sm:$0xff]  ;;  %v5388_v29 = vld [vmem:[#allocation24_spill] sm:$0xff] }
 0x1e3   : >> { %v2062_v61 = vadd.f32 %v2046_v2, %v1998_v59  ;;  %v2063_v38 = vadd.f32 %v2047_v58, %v1999_v54  ;;  %v2064_v33 = vadd.f32 %v2048_v13, %v2000_v63  ;;  %v2065_v44 = vadd.f32 %v2049_v45, %v2001_v41  ;;  %v5390_v59 = vld [vmem:[#allocation25_spill] sm:$0xff]  ;;  %v5392_v63 = vld [vmem:[#allocation26_spill] sm:$0xff] }
 0x1e4   : >> { %v2066_v5 = vadd.f32 %v2050_v26, %v2002_v46  ;;  %v2067_v47 = vadd.f32 %v2051_v18, %v2003_v0  ;;  %v2068_v10 = vadd.f32 %v2052_v60, %v2004_v36  ;;  %v2069_v50 = vadd.f32 %v2053_v6, %v2005_v53  ;;  %v5394_v46 = vld [vmem:[#allocation27_spill] sm:$0xff]  ;;  %v4879_v36 = vld [vmem:[%s3098_s8 + $0xc6] sm:$0xff] }
 0x1e5   : >> { %v2070_v17 = vadd.f32 %v2054_v42, %v2006_v30  ;;  %v2071_v43 = vadd.f32 %v2055_v19, %v2007_v25  ;;  %v2072_v27 = vadd.f32 %v2056_v24, %v2008_v20  ;;  %v2076_v62 = vrot.slane %v5386_v28, %v5385_v52  ;;  %5396 = vst [vmem:[#allocation31_spill] sm:$0xff] %v4879_v36  ;;  %v4882_v53 = vld [vmem:[%s3098_s8 + $0xce] sm:$0xff] }
 0x1e6   : >> { %v2112_v40 = vrot.slane %v5387_v9, %v5385_v52  ;;  %v4864_v14 = vrot.slane %v5388_v29, %v5385_v52  ;;  %v4868_v54 = vrot.slane %v5390_v59, %v5385_v52  ;;  %v4872_v41 = vrot.slane %v5392_v63, %v5385_v52 }
 0x1e7   : >> { %v4876_v0 = vrot.slane %v5394_v46, %v5385_v52  ;;  %v2077_v30 = vmul.f32 %v2076_v62, %v4787_v11  ;;  %v2078_v25 = vmul.f32 %v2076_v62, %v4790_v7  ;;  %v2079_v20 = vmul.f32 %v2076_v62, %v4793_v48 }
 0x1e8   : >> { %5389 = vst [vmem:[#allocation34_spill] sm:$0xff] %v4864_v14  ;;  %5391 = vst [vmem:[#allocation36_spill] sm:$0xff] %v4868_v54  ;;  %v2080_v55 = vmul.f32 %v2076_v62, %v4796_v22  ;;  %v2081_v21 = vmul.f32 %v2076_v62, %v4799_v16  ;;  %v2082_v12 = vmul.f32 %v2076_v62, %v4802_v35 }
 0x1e9   : >> { %5393 = vst [vmem:[#allocation29_spill] sm:$0xff] %v4872_v41  ;;  %5395 = vst [vmem:[#allocation30_spill] sm:$0xff] %v4876_v0  ;;  %v2083_v3 = vmul.f32 %v2076_v62, %v4805_v34  ;;  %v2084_v23 = vmul.f32 %v2076_v62, %v4808_v32  ;;  %v2085_v2 = vmul.f32 %v2076_v62, %v4811_v49 }
 0x1ea   : >> { %v2086_v58 = vmul.f32 %v2076_v62, %v4814_v39  ;;  %v2087_v11 = vmul.f32 %v2076_v62, %v4817_v31  ;;  %v2088_v7 = vmul.f32 %v2076_v62, %v4820_v37  ;;  %v2089_v13 = vmul.f32 %v2076_v62, %v4825_v57 }
 0x1eb   : >> { %v2090_v45 = vmul.f32 %v2076_v62, %v4828_v15  ;;  %v2091_v26 = vmul.f32 %v2076_v62, %v4879_v36  ;;  %v2092_v18 = vmul.f32 %v2076_v62, %v4882_v53  ;;  %v2093_v60 = vadd.f32 %v2077_v30, %v2057_v51  ;;  %v4901_v36 = vld [vmem:[%s3098_s8 + $0xde] sm:$0xff]  ;;  %v4904_v51 = vld [vmem:[%s3098_s8 + $0xe6] sm:$0xff] }
 0x1ec   : >> { %v2094_v6 = vadd.f32 %v2078_v25, %v2058_v1  ;;  %v2095_v42 = vadd.f32 %v2079_v20, %v2059_v56  ;;  %v2096_v19 = vadd.f32 %v2080_v55, %v2060_v8  ;;  %v2097_v24 = vadd.f32 %v2081_v21, %v2061_v4 }
 0x1ed   : >> { %v2098_v52 = vadd.f32 %v2082_v12, %v2062_v61  ;;  %v2099_v28 = vadd.f32 %v2083_v3, %v2063_v38  ;;  %v2100_v9 = vadd.f32 %v2084_v23, %v2064_v33  ;;  %v2101_v29 = vadd.f32 %v2085_v2, %v2065_v44 }
 0x1ee   : >> { %v2102_v59 = vadd.f32 %v2086_v58, %v2066_v5  ;;  %v2103_v63 = vadd.f32 %v2087_v11, %v2067_v47  ;;  %v2104_v46 = vadd.f32 %v2088_v7, %v2068_v10  ;;  %v2105_v0 = vadd.f32 %v2089_v13, %v2069_v50  ;;  %v5397_v10 = vld [vmem:[#allocation31_spill] sm:$0xff] }
 0x1ef   : >> { %v2106_v41 = vadd.f32 %v2090_v45, %v2070_v17  ;;  %v2107_v54 = vadd.f32 %v2091_v26, %v2071_v43  ;;  %v2108_v14 = vadd.f32 %v2092_v18, %v2072_v27  ;;  %v2113_v1 = vmul.f32 %v2112_v40, %v4793_v48  ;;  %v4923_v18 = vld [vmem:[%s3098_s8 + $0xf6] sm:$0xff] }
 0x1f0   : >> { %v2114_v56 = vmul.f32 %v2112_v40, %v4796_v22  ;;  %v2115_v8 = vmul.f32 %v2112_v40, %v4799_v16  ;;  %v2116_v4 = vmul.f32 %v2112_v40, %v4802_v35  ;;  %v2117_v61 = vmul.f32 %v2112_v40, %v4805_v34 }
 0x1f1   : >> { %v2118_v38 = vmul.f32 %v2112_v40, %v4808_v32  ;;  %v2119_v33 = vmul.f32 %v2112_v40, %v4811_v49  ;;  %v2120_v44 = vmul.f32 %v2112_v40, %v4814_v39  ;;  %v2121_v5 = vmul.f32 %v2112_v40, %v4817_v31 }
 0x1f2   : >> { %v2122_v47 = vmul.f32 %v2112_v40, %v4820_v37  ;;  %v2123_v48 = vmul.f32 %v2112_v40, %v4825_v57  ;;  %v2124_v22 = vmul.f32 %v2112_v40, %v4828_v15  ;;  %v2125_v50 = vmul.f32 %v2112_v40, %v5397_v10 }
 0x1f3   : >> { %v2126_v17 = vmul.f32 %v2112_v40, %v4882_v53  ;;  %v2127_v43 = vmul.f32 %v2112_v40, %v4901_v36  ;;  %v2128_v27 = vmul.f32 %v2112_v40, %v4904_v51  ;;  %v2129_v62 = vadd.f32 %v2113_v1, %v2093_v60  ;;  %v4926_v40 = vld [vmem:[%s3098_s8 + $0xfe] sm:$0xff]  ;;  %v5398_v60 = vld [vmem:[#allocation34_spill] sm:$0xff] }
 0x1f4   : >> { %v2130_v30 = vadd.f32 %v2114_v56, %v2094_v6  ;;  %v2131_v25 = vadd.f32 %v2115_v8, %v2095_v42  ;;  %v2132_v20 = vadd.f32 %v2116_v4, %v2096_v19  ;;  %v2133_v55 = vadd.f32 %v2117_v61, %v2097_v24 }
 0x1f5   : >> { %v2134_v21 = vadd.f32 %v2118_v38, %v2098_v52  ;;  %v2135_v12 = vadd.f32 %v2119_v33, %v2099_v28  ;;  %v2136_v3 = vadd.f32 %v2120_v44, %v2100_v9  ;;  %v2137_v23 = vadd.f32 %v2121_v5, %v2101_v29 }
 0x1f6   : >> { %v2138_v2 = vadd.f32 %v2122_v47, %v2102_v59  ;;  %v2139_v58 = vadd.f32 %v2123_v48, %v2103_v63  ;;  %v2140_v11 = vadd.f32 %v2124_v22, %v2104_v46  ;;  %v2141_v7 = vadd.f32 %v2125_v50, %v2105_v0 }
 0x1f7   : >> { %v2142_v13 = vadd.f32 %v2126_v17, %v2106_v41  ;;  %v2143_v45 = vadd.f32 %v2127_v43, %v2107_v54  ;;  %v2144_v26 = vadd.f32 %v2128_v27, %v2108_v14  ;;  %v2149_v6 = vmul.f32 %v5398_v60, %v4799_v16  ;;  %v4961_v27 = vld [vmem:[%s3098_s8 + $0x10e] sm:$0xff] }
 0x1f8   : >> { %v2150_v42 = vmul.f32 %v5398_v60, %v4802_v35  ;;  %v2151_v19 = vmul.f32 %v5398_v60, %v4805_v34  ;;  %v2152_v24 = vmul.f32 %v5398_v60, %v4808_v32  ;;  %v2153_v54 = vmul.f32 %v5398_v60, %v4811_v49 }
 0x1f9   : >> { %v2154_v14 = vmul.f32 %v5398_v60, %v4814_v39  ;;  %v2155_v41 = vmul.f32 %v5398_v60, %v4817_v31  ;;  %v2156_v16 = vmul.f32 %v5398_v60, %v4820_v37  ;;  %v2157_v35 = vmul.f32 %v5398_v60, %v4825_v57 }
 0x1fa   : >> { %v2158_v0 = vmul.f32 %v5398_v60, %v4828_v15  ;;  %v2159_v52 = vmul.f32 %v5398_v60, %v5397_v10  ;;  %v2160_v28 = vmul.f32 %v5398_v60, %v4882_v53  ;;  %v2161_v9 = vmul.f32 %v5398_v60, %v4901_v36 }
 0x1fb   : >> { %v2162_v29 = vmul.f32 %v5398_v60, %v4904_v51  ;;  %v2163_v59 = vmul.f32 %v5398_v60, %v4923_v18  ;;  %v2164_v63 = vmul.f32 %v5398_v60, %v4926_v40  ;;  %v2165_v46 = vadd.f32 %v2149_v6, %v2129_v62  ;;  %v4964_v62 = vld [vmem:[%s3098_s8 + $0x116] sm:$0xff] }
 0x1fc   : >> { %v2166_v1 = vadd.f32 %v2150_v42, %v2130_v30  ;;  %v2167_v56 = vadd.f32 %v2151_v19, %v2131_v25  ;;  %v2168_v8 = vadd.f32 %v2152_v24, %v2132_v20  ;;  %v2169_v4 = vadd.f32 %v2153_v54, %v2133_v55  ;;  %v5399_v30 = vld [vmem:[#allocation36_spill] sm:$0xff] }
 0x1fd   : >> { %v2170_v61 = vadd.f32 %v2154_v14, %v2134_v21  ;;  %v2171_v38 = vadd.f32 %v2155_v41, %v2135_v12  ;;  %v2172_v33 = vadd.f32 %v2156_v16, %v2136_v3  ;;  %v2173_v44 = vadd.f32 %v2157_v35, %v2137_v23 }
 0x1fe   : >> { %v2174_v5 = vadd.f32 %v2158_v0, %v2138_v2  ;;  %v2175_v47 = vadd.f32 %v2159_v52, %v2139_v58  ;;  %v2176_v48 = vadd.f32 %v2160_v28, %v2140_v11  ;;  %v2177_v22 = vadd.f32 %v2161_v9, %v2141_v7 }
 0x1ff   : >> { %v2178_v50 = vadd.f32 %v2162_v29, %v2142_v13  ;;  %v2179_v17 = vadd.f32 %v2163_v59, %v2143_v45  ;;  %v2180_v43 = vadd.f32 %v2164_v63, %v2144_v26  ;;  %v2185_v25 = vmul.f32 %v5399_v30, %v4805_v34  ;;  %v2033_v63 = vld [vmem:[%s3098_s8 + $0x126] sm:$0xff] }
 0x200   : >> { %v2186_v20 = vmul.f32 %v5399_v30, %v4808_v32  ;;  %v2187_v55 = vmul.f32 %v5399_v30, %v4811_v49  ;;  %v2188_v21 = vmul.f32 %v5399_v30, %v4814_v39  ;;  %v2189_v12 = vmul.f32 %v5399_v30, %v4817_v31 }
 0x201   : >> { %v2190_v3 = vmul.f32 %v5399_v30, %v4820_v37  ;;  %v2191_v23 = vmul.f32 %v5399_v30, %v4825_v57  ;;  %v2192_v34 = vmul.f32 %v5399_v30, %v4828_v15  ;;  %v2193_v32 = vmul.f32 %v5399_v30, %v5397_v10 }
 0x202   : >> { %v2194_v2 = vmul.f32 %v5399_v30, %v4882_v53  ;;  %v2195_v58 = vmul.f32 %v5399_v30, %v4901_v36  ;;  %v2196_v11 = vmul.f32 %v5399_v30, %v4904_v51  ;;  %v2197_v7 = vmul.f32 %v5399_v30, %v4923_v18 }
 0x203   : >> { %v2198_v13 = vmul.f32 %v5399_v30, %v4926_v40  ;;  %v2199_v45 = vmul.f32 %v5399_v30, %v4961_v27  ;;  %v2200_v26 = vmul.f32 %v5399_v30, %v4964_v62  ;;  %v2201_v60 = vadd.f32 %v2185_v25, %v2165_v46  ;;  %v2034_v30 = vld [vmem:[%s3098_s8 + $0x12e] sm:$0xff]  ;;  %v5400_v46 = vld [vmem:[#allocation29_spill] sm:$0xff] }
 0x204   : >> { %v2202_v6 = vadd.f32 %v2186_v20, %v2166_v1  ;;  %v2203_v42 = vadd.f32 %v2187_v55, %v2167_v56  ;;  %v2204_v19 = vadd.f32 %v2188_v21, %v2168_v8  ;;  %v2205_v24 = vadd.f32 %v2189_v12, %v2169_v4 }
 0x205   : >> { %v2206_v54 = vadd.f32 %v2190_v3, %v2170_v61  ;;  %v2207_v14 = vadd.f32 %v2191_v23, %v2171_v38  ;;  %v2208_v41 = vadd.f32 %v2192_v34, %v2172_v33  ;;  %v2209_v16 = vadd.f32 %v2193_v32, %v2173_v44 }
 0x206   : >> { %v2210_v35 = vadd.f32 %v2194_v2, %v2174_v5  ;;  %v2211_v0 = vadd.f32 %v2195_v58, %v2175_v47  ;;  %v2212_v52 = vadd.f32 %v2196_v11, %v2176_v48  ;;  %v2213_v28 = vadd.f32 %v2197_v7, %v2177_v22 }
 0x207   : >> { %v2214_v9 = vadd.f32 %v2198_v13, %v2178_v50  ;;  %v2215_v29 = vadd.f32 %v2199_v45, %v2179_v17  ;;  %v2216_v59 = vadd.f32 %v2200_v26, %v2180_v43  ;;  %v2221_v1 = vmul.f32 %v5400_v46, %v4811_v49  ;;  %v2035_v26 = vld [vmem:[%s3098_s8 + $0x13e] sm:$0xff] }
 0x208   : >> { %v2222_v56 = vmul.f32 %v5400_v46, %v4814_v39  ;;  %v2223_v8 = vmul.f32 %v5400_v46, %v4817_v31  ;;  %v2224_v4 = vmul.f32 %v5400_v46, %v4820_v37  ;;  %v2225_v61 = vmul.f32 %v5400_v46, %v4825_v57 }
 0x209   : >> { %v2226_v38 = vmul.f32 %v5400_v46, %v4828_v15  ;;  %v2227_v33 = vmul.f32 %v5400_v46, %v5397_v10  ;;  %v2228_v49 = vmul.f32 %v5400_v46, %v4882_v53  ;;  %v2229_v39 = vmul.f32 %v5400_v46, %v4901_v36 }
 0x20a   : >> { %v2230_v44 = vmul.f32 %v5400_v46, %v4904_v51  ;;  %v2231_v5 = vmul.f32 %v5400_v46, %v4923_v18  ;;  %v2232_v47 = vmul.f32 %v5400_v46, %v4926_v40  ;;  %v2233_v48 = vmul.f32 %v5400_v46, %v4961_v27 }
 0x20b   : >> { %v2234_v22 = vmul.f32 %v5400_v46, %v4964_v62  ;;  %v2235_v50 = vmul.f32 %v5400_v46, %v2033_v63  ;;  %v2236_v17 = vmul.f32 %v5400_v46, %v2034_v30  ;;  %v2237_v43 = vadd.f32 %v2221_v1, %v2201_v60  ;;  %v2036_v46 = vld [vmem:[%s3098_s8 + $0x146] sm:$0xff] }
 0x20c   : >> { %v2238_v25 = vadd.f32 %v2222_v56, %v2202_v6  ;;  %v2239_v20 = vadd.f32 %v2223_v8, %v2203_v42  ;;  %v2240_v55 = vadd.f32 %v2224_v4, %v2204_v19  ;;  %v2241_v21 = vadd.f32 %v2225_v61, %v2205_v24  ;;  %v5401_v60 = vld [vmem:[#allocation30_spill] sm:$0xff]  ;;  %v5403_v4 = vld [vmem:[#allocation28_spill] sm:$0xff] }
 0x20d   : >> { %v2242_v12 = vadd.f32 %v2226_v38, %v2206_v54  ;;  %v2243_v3 = vadd.f32 %v2227_v33, %v2207_v14  ;;  %v2244_v23 = vadd.f32 %v2228_v49, %v2208_v41  ;;  %v2245_v34 = vadd.f32 %v2229_v39, %v2209_v16 }
 0x20e   : >> { %v2246_v32 = vadd.f32 %v2230_v44, %v2210_v35  ;;  %v2247_v2 = vadd.f32 %v2231_v5, %v2211_v0  ;;  %v2248_v58 = vadd.f32 %v2232_v47, %v2212_v52  ;;  %v2249_v11 = vadd.f32 %v2233_v48, %v2213_v28 }
 0x20f   : >> { %v2250_v7 = vadd.f32 %v2234_v22, %v2214_v9  ;;  %v2251_v13 = vadd.f32 %v2235_v50, %v2215_v29  ;;  %v2252_v45 = vadd.f32 %v2236_v17, %v2216_v59  ;;  %v2257_v6 = vmul.f32 %v5401_v60, %v4817_v31 }
 0x210   : >> { %v2258_v42 = vmul.f32 %v5401_v60, %v4820_v37  ;;  %v2259_v19 = vmul.f32 %v5401_v60, %v4825_v57  ;;  %v2260_v24 = vmul.f32 %v5401_v60, %v4828_v15  ;;  %v2261_v54 = vmul.f32 %v5401_v60, %v5397_v10 }
 0x211   : >> { %v2262_v14 = vmul.f32 %v5401_v60, %v4882_v53  ;;  %v2263_v41 = vmul.f32 %v5401_v60, %v4901_v36  ;;  %v2264_v31 = vmul.f32 %v5401_v60, %v4904_v51  ;;  %v2265_v37 = vmul.f32 %v5401_v60, %v4923_v18 }
 0x212   : >> { %v2266_v57 = vmul.f32 %v5401_v60, %v4926_v40  ;;  %v2267_v15 = vmul.f32 %v5401_v60, %v4961_v27  ;;  %v2268_v10 = vmul.f32 %v5401_v60, %v4964_v62  ;;  %v2269_v53 = vmul.f32 %v5401_v60, %v2033_v63 }
 0x213   : >> { %v2270_v16 = vmul.f32 %v5401_v60, %v2034_v30  ;;  %v2271_v36 = vmul.f32 %v5401_v60, %v2035_v26  ;;  %v2272_v51 = vmul.f32 %v5401_v60, %v2036_v46  ;;  %v2273_v35 = vadd.f32 %v2257_v6, %v2237_v43 }
 0x214   : >> { %v2274_v0 = vadd.f32 %v2258_v42, %v2238_v25  ;;  %v2275_v18 = vadd.f32 %v2259_v19, %v2239_v20  ;;  %v2276_v52 = vadd.f32 %v2260_v24, %v2240_v55  ;;  %v2277_v40 = vadd.f32 %v2261_v54, %v2241_v21 }
 0x215   : >> { %v2278_v28 = vadd.f32 %v2262_v14, %v2242_v12  ;;  %v2279_v27 = vadd.f32 %v2263_v41, %v2243_v3  ;;  %v2280_v9 = vadd.f32 %v2264_v31, %v2244_v23  ;;  %v2281_v29 = vadd.f32 %v2265_v37, %v2245_v34 }
 0x216   : >> { %v2282_v62 = vadd.f32 %v2266_v57, %v2246_v32  ;;  %v2283_v59 = vadd.f32 %v2267_v15, %v2247_v2  ;;  %v2284_v63 = vadd.f32 %v2268_v10, %v2248_v58  ;;  %v2285_v1 = vadd.f32 %v2269_v53, %v2249_v11 }
 0x217   : >> { %v2286_v30 = vadd.f32 %v2270_v16, %v2250_v7  ;;  %v2287_v56 = vadd.f32 %v2271_v36, %v2251_v13  ;;  %v2288_v8 = vadd.f32 %v2272_v51, %v2252_v45  ;;  %v2295_v61 = vadd.f32 %v5403_v4, %v2273_v35 }
 0x218   : >> { %v2296_v38 = vadd.f32 %v5403_v4, %v2274_v0  ;;  %v2297_v33 = vadd.f32 %v5403_v4, %v2275_v18  ;;  %v2298_v49 = vadd.f32 %v5403_v4, %v2276_v52  ;;  %v2299_v39 = vadd.f32 %v5403_v4, %v2277_v40 }
 0x219   : >> { %v2300_v44 = vadd.f32 %v5403_v4, %v2278_v28  ;;  %v2301_v5 = vadd.f32 %v5403_v4, %v2279_v27  ;;  %v2302_v47 = vadd.f32 %v5403_v4, %v2280_v9  ;;  %v2303_v48 = vadd.f32 %v5403_v4, %v2281_v29  ;;  %2313 = vst [vmem:[%s5063_s7] sm:$0xff] %v2295_v61 }
 0x21a   : >> { %v2304_v22 = vadd.f32 %v5403_v4, %v2282_v62  ;;  %v2305_v50 = vadd.f32 %v5403_v4, %v2283_v59  ;;  %v2306_v17 = vadd.f32 %v5403_v4, %v2284_v63  ;;  %2314 = vst [vmem:[%s5063_s7 + $0x8] sm:$0xff] %v2296_v38  ;;  %2315 = vst [vmem:[%s5063_s7 + $0x10] sm:$0xff] %v2297_v33 }
 0x21b   : >> { %2316 = vst [vmem:[%s5063_s7 + $0x18] sm:$0xff] %v2298_v49  ;;  %v2307_v43 = vadd.f32 %v5403_v4, %v2285_v1  ;;  %v2308_v25 = vadd.f32 %v5403_v4, %v2286_v30  ;;  %v2309_v20 = vadd.f32 %v5403_v4, %v2287_v56  ;;  %v2310_v55 = vadd.f32 %v5403_v4, %v2288_v8  ;;  %323 = sbr.rel (!%p321_p8) target bundleno = 124 (0x7c), region = 97 }
 0x21c   : >> { %2317 = vst [vmem:[%s5063_s7 + $0x20] sm:$0xff] %v2299_v39  ;;  %2318 = vst [vmem:[%s5063_s7 + $0x28] sm:$0xff] %v2300_v44 }
 0x21d   : >> { %2319 = vst [vmem:[%s5063_s7 + $0x30] sm:$0xff] %v2301_v5  ;;  %2320 = vst [vmem:[%s5063_s7 + $0x38] sm:$0xff] %v2302_v47 }
 0x21e   : >> { %2321 = vst [vmem:[%s5063_s7 + $0x40] sm:$0xff] %v2303_v48  ;;  %2322 = vst [vmem:[%s5063_s7 + $0x48] sm:$0xff] %v2304_v22 }
 0x21f   : >> { %2323 = vst [vmem:[%s5063_s7 + $0x50] sm:$0xff] %v2305_v50  ;;  %2324 = vst [vmem:[%s5063_s7 + $0x58] sm:$0xff] %v2306_v17 }
 0x220   : >> { %2325 = vst [vmem:[%s5063_s7 + $0x60] sm:$0xff] %v2307_v43  ;;  %2326 = vst [vmem:[%s5063_s7 + $0x68] sm:$0xff] %v2308_v25 }
 0x221   : >> { %2327 = vst [vmem:[%s5063_s7 + $0x70] sm:$0xff] %v2309_v20  ;;  %2328 = vst [vmem:[%s5063_s7 + $0x78] sm:$0xff] %v2310_v55 }
 0x222   : > { %2663 = shalt.err (!%p2660_p10)
}
 0x223   : > { %s2664_s1 = scalar_lea.hbm %s5108_s27, 4096  ;;  %s2668_s20 = scalar_lea.hbm %s5178_s3, 16384 }
 0x224   : > { %p2665_p11 = scmp.ne.s32.totalorder %s5108_s27, %s2664_s1  ;;  %p2669_p12 = scmp.lt.u32.totalorder %s5108_s27, %s5178_s3 }
 0x225   : > { %p2670_p13 = scmp.lt.u32.totalorder %s2668_s20, %s2664_s1  ;;  %p2672_p2 = scmp.lt.u32.totalorder %s2664_s1, %s5108_s27 }
 0x226   : > { %p2666_p5 = pnand %p2665_p11, %p5406_p4 }
 0x227   : > { %p2671_p8 = por %p2670_p13, %p2669_p12 }
 0x228   : > { %p2667_p7 = pneg %p2666_p5 }
 0x229   : > { %p2673_p0 = por %p2672_p2, %p2671_p8 }
 0x22b   : > { %p2674_p1 = pnand %p2673_p0, %p2667_p7 }
 0x22d   : > { %2677 = shalt.err (!%p2674_p1)
}
 0x22e   : > { %s2799_s15 = smov 128   ;;  %s2800_s28 = smov 256  }
 0x22f   : > { %s2801_s7 = smov 8  }
 0x230   : > { %2496 = dma.vmem_to_hbm [thread:$0]  (%p5406_p4), %s5110_s11, 4096, %s5108_s27, %s5114_s19, %s2799_s15, %s2800_s28, %s2801_s7  }
 0x231 PF: > { %p2507_p3 = scmp.ge.s32.totalorder %s2778_s22, 2  ;;  %s2362_s21 = sand.u32 1, %s2738_s12  }
 0x232   : > { %p5407_p6 = scmp.ne.s32.totalorder %s5257_s10, 0  ;;  %s2363_s25 = scalar_lea.sflag [#allocation6], %s2362_s21 }
 0x234   : > { %p2503_p9 = pnand %p2507_p3, %p5407_p6 }
 0x236   : > { %2733 = dma.done.wait (!%p2503_p9), %s2363_s25, 4096  }
 0x237   : > { %2735 = vsyncadd (!%p2503_p9), %s2363_s25, 4294963200  ;;  %s19_s22 = sadd.s32 1, %s2778_s22   ;;  %s5408_s23 = sld [smem:[#allocation20_spill]] }
 0x238   : > { %p16_p10 = scmp.ge.s32.totalorder %s19_s22, 6   ;;  %s5409_s15 = sld [smem:[#allocation13_spill]] }
 0x239   : > { %s5410_s16 = sld [smem:[#allocation14_spill]]  ;;  %s5411_s17 = sld [smem:[#allocation19_spill]] }
 0x23a   : > { %s5412_s18 = sld [smem:[#allocation15_spill]]  ;;  %s5413_s19 = sld [smem:[#allocation16_spill]] }
 0x23b   : > { %s5414_s20 = sld [smem:[#allocation17_spill]]  ;;  %s5415_s21 = sld [smem:[#allocation18_spill]] }
 0x23c   : > { %s5416_s12 = smov %s2742_s13  ;;  %s5417_s13 = smov %s2746_s14 }
 0x23d   : > { %s5418_s14 = smov %s5408_s23  ;;  %18 = sbr.rel (!%p16_p10) target bundleno = 11 (0xb), region = 108 }
 0x244   :  { %2368 = vsyncpa [#allocation5], 1 }
 0x245   :  { %2370 = vsyncpa [#allocation5 + $0x1], 1 }
 0x246   :  { %2371 = vsyncpa [#allocation6], 1 }
 0x247   :  { %2373 = vsyncpa [#allocation6 + $0x1], 1 }
 0x248   :  { %2374 = vsyncmov [#allocation3] }
 0x24b   :  { %s2375_s9 = vpop.sfrf %2374 }
 0x24c   :  { %p2490_p4 = scmp.ne.s32.totalorder %s2375_s9, 0 }
 0x24e   :  { %2379 = shalt.err (%p2490_p4)  }

</bundles_post_ra>
